<compile_context>
chip_gen: v7x
topology: tpu7x:2x2x1
jax: 0.10.0
libtpu: 0.0.40
codegen_flags: <defaults>
</compile_context>

<pallas_src>
import functools
import math

import jax
import jax.numpy as jnp
from jax.experimental import pallas as pl
from jax.experimental.pallas import tpu as pltpu

_BN_EPS = 1e-5
_PARALLEL = pltpu.CompilerParams(dimension_semantics=("parallel",))


def _const_spec(shape):
    """BlockSpec for an array that is identical for every grid step."""
    n = len(shape)
    return pl.BlockSpec(tuple(shape), lambda b: (0,) * n)


def _batch_spec(tail):
    """BlockSpec selecting batch element b of a (B, *tail) array."""
    n = len(tail) + 1
    return pl.BlockSpec((1,) + tuple(tail), lambda b: (b,) + (0,) * (n - 1))


# ---------------------------------------------------------------------------
# Kernel 1: DataEmbedding (circular token conv + positional encoding).
# ---------------------------------------------------------------------------

def _embedding_kernel(x_ref, w_ref, b_ref, pe_ref, o_ref, *, L, K):
    x = x_ref[0]                                      # (L, E)
    pad = (K - 1) // 2
    acc = b_ref[...] + pe_ref[...]                    # (L, D)
    for k in range(K):
        d = (k - pad) % L
        # circular shift as static slice + concat (sublane axis) — no matmul.
        xs = x if d == 0 else jnp.concatenate([x[d:], x[:d]], axis=0)
        acc = acc + jnp.dot(xs, w_ref[k], preferred_element_type=jnp.float32)
    o_ref[0] = acc


def embedding_call(x, w_kio, bias, pe, *, K):
    B, L, E = x.shape
    D = w_kio.shape[2]
    kernel = functools.partial(_embedding_kernel, L=L, K=K)
    return pl.pallas_call(
        kernel,
        out_shape=jax.ShapeDtypeStruct((B, L, D), jnp.float32),
        grid=(B,),
        in_specs=[_batch_spec((L, E)), _const_spec((K, E, D)),
                  _const_spec((1, D)), _const_spec((L, D))],
        out_specs=_batch_spec((L, D)),
        compiler_params=_PARALLEL,
    )(x, w_kio, bias, pe)


# ---------------------------------------------------------------------------
# Kernel 2a: attention block (optional input-BN affine, causal-conv Q/K,
# linear V, causal multi-head softmax, out-proj, residual) + BN partials.
# ---------------------------------------------------------------------------

def _attn_block_kernel(*refs, L, H, ck, scale, output_attention):
    if output_attention:
        (x_ref, sc_ref, sh_ref, wq_ref, bq_ref, wk_ref, bk_ref, wv_ref, bv_ref,
         wo_ref, bo_ref, y_ref, st_ref, attn_ref) = refs
    else:
        (x_ref, sc_ref, sh_ref, wq_ref, bq_ref, wk_ref, bk_ref, wv_ref, bv_ref,
         wo_ref, bo_ref, y_ref, st_ref) = refs
        attn_ref = None

    # BN of the previous layer (or identity for layer 0) folded in as affine.
    x = x_ref[0] * sc_ref[...] + sh_ref[...]          # (L, D)
    D = x.shape[1]
    Dh = D // H

    # Causal (left-zero-padded) shifts: static concat, no selection matmuls.
    shifted = [x]
    for s in range(1, ck):
        shifted.append(jnp.concatenate(
            [jnp.zeros((s, D), jnp.float32), x[:L - s]], axis=0))

    def causal_conv(w_ref, b_ref):
        acc = b_ref[...]
        for k in range(ck):
            acc = acc + jnp.dot(shifted[ck - 1 - k], w_ref[k],
                                preferred_element_type=jnp.float32)
        return acc

    q = causal_conv(wq_ref, bq_ref) * scale           # fold 1/sqrt(Dh) into q
    kk = causal_conv(wk_ref, bk_ref)
    v = jnp.dot(x, wv_ref[...], preferred_element_type=jnp.float32) + bv_ref[...]

    rowL = jax.lax.broadcasted_iota(jnp.int32, (L, L), 0)
    colL = jax.lax.broadcasted_iota(jnp.int32, (L, L), 1)
    causal = colL <= rowL

    # Batch axis is handled by the grid; only the (small) head axis is
    # unrolled here.  # TODO(synk): switch to a single batched contraction
    # once leading-dim transposes are cheap in Mosaic for these shapes.
    heads = []
    for h in range(H):
        c0, c1 = h * Dh, (h + 1) * Dh
        qh, kh, vh = q[:, c0:c1], kk[:, c0:c1], v[:, c0:c1]
        s = jax.lax.dot_general(qh, kh, (((1,), (1,)), ((), ())),
                                preferred_element_type=jnp.float32)
        s = jnp.where(causal, s, jnp.float32(-1e30))
        m = jnp.max(s, axis=-1, keepdims=True)
        e = jnp.exp(s - m)
        p = e / jnp.sum(e, axis=-1, keepdims=True)    # exact softmax
        if attn_ref is not None:
            attn_ref[0, h] = p
        heads.append(jnp.dot(p, vh, preferred_element_type=jnp.float32))
    ctx = jnp.concatenate(heads, axis=1)              # (L, D), lane-dense

    new_x = jnp.dot(ctx, wo_ref[...], preferred_element_type=jnp.float32) + bo_ref[...]
    y = x + new_x                                     # residual (pre-BN1)
    y_ref[0] = y
    st_ref[0] = jnp.concatenate(
        [jnp.sum(y, axis=0, keepdims=True),
         jnp.sum(y * y, axis=0, keepdims=True)], axis=0)


def attn_block_call(x, in_scale, in_shift, lw, *, H, ck, output_attention):
    B, L, D = x.shape
    scale = 1.0 / math.sqrt(D // H)
    kernel = functools.partial(_attn_block_kernel, L=L, H=H, ck=ck,
                               scale=scale, output_attention=output_attention)
    args = (x, in_scale, in_shift, lw['wq'], lw['bq'], lw['wk'], lw['bk'],
            lw['wv'], lw['bv'], lw['wo'], lw['bo'])
    in_specs = [_batch_spec((L, D))] + [_const_spec(a.shape) for a in args[1:]]
    out_shape = [jax.ShapeDtypeStruct((B, L, D), jnp.float32),
                 jax.ShapeDtypeStruct((B, 2, D), jnp.float32)]
    out_specs = [_batch_spec((L, D)), _batch_spec((2, D))]
    if output_attention:
        out_shape.append(jax.ShapeDtypeStruct((B, H, L, L), jnp.float32))
        out_specs.append(_batch_spec((H, L, L)))
    res = pl.pallas_call(
        kernel, out_shape=tuple(out_shape), grid=(B,),
        in_specs=in_specs, out_specs=tuple(out_specs),
        compiler_params=_PARALLEL,
    )(*args)
    if output_attention:
        return res[0], res[1], res[2]
    return res[0], res[1], None


# ---------------------------------------------------------------------------
# Kernel 2b: FFN block (apply BN1 affine, k=1 conv -> relu -> k=1 conv,
# residual) + BN2 partials.
# ---------------------------------------------------------------------------

def _ffn_block_kernel(y_ref, sc_ref, sh_ref, w1_ref, b1_ref, w2_ref, b2_ref,
                      z_ref, st_ref):
    y1 = y_ref[0] * sc_ref[...] + sh_ref[...]         # BN1 applied as affine
    ff = jnp.maximum(
        jnp.dot(y1, w1_ref[...], preferred_element_type=jnp.float32) + b1_ref[...],
        0.0)
    ff = jnp.dot(ff, w2_ref[...], preferred_element_type=jnp.float32) + b2_ref[...]
    z = y1 + ff                                       # residual (pre-BN2)
    z_ref[0] = z
    st_ref[0] = jnp.concatenate(
        [jnp.sum(z, axis=0, keepdims=True),
         jnp.sum(z * z, axis=0, keepdims=True)], axis=0)


def ffn_block_call(y, sc, sh, lw):
    B, L, D = y.shape
    args = (y, sc, sh, lw['w1'], lw['b1'], lw['w2'], lw['b2'])
    in_specs = [_batch_spec((L, D))] + [_const_spec(a.shape) for a in args[1:]]
    return pl.pallas_call(
        _ffn_block_kernel,
        out_shape=(jax.ShapeDtypeStruct((B, L, D), jnp.float32),
                   jax.ShapeDtypeStruct((B, 2, D), jnp.float32)),
        grid=(B,),
        in_specs=in_specs,
        out_specs=(_batch_spec((L, D)), _batch_spec((2, D))),
        compiler_params=_PARALLEL,
    )(*args)


# ---------------------------------------------------------------------------
# Kernel 3: head down-conv (apply input BN affine, replicate-pad conv k=3,
# relu) + BN partials.  Used twice (D->D/2 and D/2->1).
# ---------------------------------------------------------------------------

def _head_conv_kernel(x_ref, sc_ref, sh_ref, w_ref, b_ref, o_ref, st_ref, *, L):
    x = x_ref[0] * sc_ref[...] + sh_ref[...]          # (L, Cin)
    xm = jnp.concatenate([x[0:1], x[:L - 1]], axis=0)   # replicate pad, tap t-1
    xp = jnp.concatenate([x[1:], x[L - 1:L]], axis=0)   # replicate pad, tap t+1
    h = (jnp.dot(xm, w_ref[0], preferred_element_type=jnp.float32)
         + jnp.dot(x, w_ref[1], preferred_element_type=jnp.float32)
         + jnp.dot(xp, w_ref[2], preferred_element_type=jnp.float32)
         + b_ref[...])
    h = jnp.maximum(h, 0.0)
    o_ref[0] = h
    st_ref[0] = jnp.concatenate(
        [jnp.sum(h, axis=0, keepdims=True),
         jnp.sum(h * h, axis=0, keepdims=True)], axis=0)


def head_conv_call(x, sc, sh, w, b):
    B, L, Cin = x.shape
    Cout = w.shape[2]
    kernel = functools.partial(_head_conv_kernel, L=L)
    args = (x, sc, sh, w, b)
    in_specs = [_batch_spec((L, Cin))] + [_const_spec(a.shape) for a in args[1:]]
    return pl.pallas_call(
        kernel,
        out_shape=(jax.ShapeDtypeStruct((B, L, Cout), jnp.float32),
                   jax.ShapeDtypeStruct((B, 2, Cout), jnp.float32)),
        grid=(B,),
        in_specs=in_specs,
        out_specs=(_batch_spec((L, Cout)), _batch_spec((2, Cout))),
        compiler_params=_PARALLEL,
    )(*args)


# ---------------------------------------------------------------------------
# Kernel 4: head predict (apply BN2 affine, Linear(L -> c_out)).
# ---------------------------------------------------------------------------

def _predict_kernel(h_ref, sc_ref, sh_ref, pw_ref, pb_ref, o_ref):
    z = h_ref[0] * sc_ref[...] + sh_ref[...]          # (L, 1)
    out = jnp.sum(z * pw_ref[...], axis=0, keepdims=True) + pb_ref[...]
    o_ref[0] = out                                    # (1, c_out)


def predict_call(h, sc, sh, pw, pb):
    B, L, _ = h.shape
    c_out = pw.shape[1]
    args = (h, sc, sh, pw, pb)
    in_specs = [_batch_spec((L, 1))] + [_const_spec(a.shape) for a in args[1:]]
    out = pl.pallas_call(
        _predict_kernel,
        out_shape=jax.ShapeDtypeStruct((B, 1, c_out), jnp.float32),
        grid=(B,),
        in_specs=in_specs,
        out_specs=_batch_spec((1, c_out)),
        compiler_params=_PARALLEL,
    )(*args)
    return out.reshape(B, c_out)


# ---------------------------------------------------------------------------
# Tiny JAX-side glue: BN stats -> per-feature affine (scale, shift)
# ---------------------------------------------------------------------------

def _bn_affine(stats, gamma, beta, count):
    total = jnp.sum(stats, axis=0)                    # (2, C)
    mean = total[0] / count
    var = total[1] / count - mean * mean              # biased (torch training BN)
    scale = gamma * jax.lax.rsqrt(var + _BN_EPS)
    shift = beta - mean * scale
    return scale.reshape(1, -1), shift.reshape(1, -1)


def sinusoidal_pe(L, d_model):
    pos = jnp.arange(L, dtype=jnp.float32)[:, None]
    i = jnp.arange(0, d_model, 2, dtype=jnp.float32)
    div = jnp.exp(-math.log(10000.0) * i / d_model)
    pe = jnp.zeros((L, d_model), dtype=jnp.float32)
    pe = pe.at[:, 0::2].set(jnp.sin(pos * div))
    pe = pe.at[:, 1::2].set(jnp.cos(pos * div))
    return pe


def _prep_layer_params(lp):
    f32 = jnp.float32
    return dict(
        wq=jnp.transpose(lp['wq'], (2, 1, 0)).astype(f32),   # (ck, D_in, D_out)
        bq=lp['bq'].reshape(1, -1).astype(f32),
        wk=jnp.transpose(lp['wk'], (2, 1, 0)).astype(f32),
        bk=lp['bk'].reshape(1, -1).astype(f32),
        wv=lp['wv'][:, :, 0].T.astype(f32),                   # value_kernel_size == 1
        bv=lp['bv'].reshape(1, -1).astype(f32),
        wo=lp['wo'].astype(f32),
        bo=lp['bo'].reshape(1, -1).astype(f32),
        w1=lp['ff1_w'][:, :, 0].T.astype(f32),                # forward_kernel_size == 1
        b1=lp['ff1_b'].reshape(1, -1).astype(f32),
        w2=lp['ff2_w'][:, :, 0].T.astype(f32),
        b2=lp['ff2_b'].reshape(1, -1).astype(f32),
        g1=lp['bn1_g'].astype(f32), be1=lp['bn1_b'].astype(f32),
        g2=lp['bn2_g'].astype(f32), be2=lp['bn2_b'].astype(f32),
    )


def _prep_head_params(p):
    f32 = jnp.float32
    return dict(
        w1=jnp.transpose(p['down1_w'], (2, 1, 0)).astype(f32),   # (3, D, D//2)
        b1=p['down1_b'].reshape(1, -1).astype(f32),
        g1=p['tbn1_g'].astype(f32), be1=p['tbn1_b'].astype(f32),
        w2=jnp.transpose(p['down2_w'], (2, 1, 0)).astype(f32),   # (3, D//2, 1)
        b2=p['down2_b'].reshape(1, -1).astype(f32),
        g2=p['tbn2_g'].astype(f32), be2=p['tbn2_b'].astype(f32),
        pw=p['pred_w'].astype(f32),                              # (L, c_out)
        pb=p['pred_b'].reshape(1, -1).astype(f32),
    )


# ---------------------------------------------------------------------------
# Forward pass
# ---------------------------------------------------------------------------

def tstransformer_forward(x, params, cfg, output_attention=True):
    """x: (B, L, enc_in) channels-last. Returns (pred (B, c_out), [attn ...])."""
    B, L, _ = x.shape
    D = cfg['d_model']
    H = cfg['n_heads']
    ck = cfg['causal_kernel_size']
    K = cfg['embedd_kernel_size']
    assert cfg['value_kernel_size'] == 1 and cfg['forward_kernel_size'] == 1, \
        "kernels assume k=1 value / feed-forward convs"
    assert K % 2 == 1
    count = float(B * L)
    x = x.astype(jnp.float32)

    # ---- DataEmbedding (fused kernel) + dropout(identity) -------------------
    emb_w = jnp.transpose(params['emb_w'], (2, 1, 0)).astype(jnp.float32)  # (K,E,D)
    emb_b = params['emb_b'].reshape(1, -1).astype(jnp.float32)
    pe = sinusoidal_pe(L, D)
    cur = embedding_call(x, emb_w, emb_b, pe, K=K)                          # (B,L,D)

    # ---- Encoder stack: 2 batch-parallel pallas_calls per layer -------------
    # BatchNorm is applied as an affine folded into the *next* kernel;
    # the affine comes from per-batch partial sums reduced here (tiny).
    in_scale = jnp.ones((1, D), jnp.float32)
    in_shift = jnp.zeros((1, D), jnp.float32)
    attns = []
    for lp_raw in params['layers']:
        lw = _prep_layer_params(lp_raw)
        y, st1, attn = attn_block_call(cur, in_scale, in_shift, lw, H=H, ck=ck,
                                       output_attention=output_attention)
        s1, sh1 = _bn_affine(st1, lw['g1'], lw['be1'], count)
        cur, st2 = ffn_block_call(y, s1, sh1, lw)
        in_scale, in_shift = _bn_affine(st2, lw['g2'], lw['be2'], count)
        if output_attention:
            attns.append(attn)

    # ---- Head: downconv1 -> relu -> BN -> downconv2 -> relu -> BN -> predict
    hw = _prep_head_params(params)
    h1, hst1 = head_conv_call(cur, in_scale, in_shift, hw['w1'], hw['b1'])
    s1, sh1 = _bn_affine(hst1, hw['g1'], hw['be1'], count)
    h2, hst2 = head_conv_call(h1, s1, sh1, hw['w2'], hw['b2'])
    s2, sh2 = _bn_affine(hst2, hw['g2'], hw['be2'], count)
    pred = predict_call(h2, s2, sh2, hw['pw'], hw['pb'])                    # (B,c_out)

    if output_attention:
        return pred, attns
    return pred


# ---------------------------------------------------------------------------
# Deterministic parameter initialization (synthetic)
# ---------------------------------------------------------------------------

def init_params(key, cfg):
    D, E = cfg['d_model'], cfg['enc_in']
    dff = cfg['d_ff']
    ck, fk, vk = (cfg['causal_kernel_size'], cfg['forward_kernel_size'],
                  cfg['value_kernel_size'])
    L, Co = cfg['input_length'], cfg['c_out']
    keys = iter(jax.random.split(key, 256))

    def w(shape, scale=0.1):
        return (scale * jax.random.normal(next(keys), shape)).astype(jnp.float32)

    params = dict(
        emb_w=w((D, E, cfg['embedd_kernel_size'])), emb_b=w((D,)),
        down1_w=w((D // 2, D, 3)), down1_b=w((D // 2,)),
        tbn1_g=1.0 + w((D // 2,)), tbn1_b=w((D // 2,)),
        down2_w=w((1, D // 2, 3)), down2_b=w((1,)),
        tbn2_g=1.0 + w((1,)), tbn2_b=w((1,)),
        pred_w=w((L, Co)), pred_b=w((Co,)),
        layers=[],
    )
    for _ in range(cfg['e_layers']):
        params['layers'].append(dict(
            wq=w((D, D, ck)), bq=w((D,)),
            wk=w((D, D, ck)), bk=w((D,)),
            wv=w((D, D, vk)), bv=w((D,)),
            wo=w((D, D)), bo=w((D,)),
            ff1_w=w((dff, D, fk)), ff1_b=w((dff,)),
            ff2_w=w((D, dff, fk)), ff2_b=w((D,)),
            bn1_g=1.0 + w((D,)), bn1_b=w((D,)),
            bn2_g=1.0 + w((D,)), bn2_b=w((D,)),
        ))
    return params


# ---------------------------------------------------------------------------
# Demo
# ---------------------------------------------------------------------------

if __name__ == "__main__":
    cfg = dict(
        enc_in=4, input_length=16, c_out=16,
        d_model=32, n_heads=4, e_layers=2, d_ff=128,
        embedd_kernel_size=3, causal_kernel_size=3,
        forward_kernel_size=1, value_kernel_size=1,
    )
    key = jax.random.PRNGKey(0)
    kx, kp = jax.random.split(key)
    # input: (batch=2, seq=input_length=16, channels=enc_in=4), channels-last
    x = jax.random.normal(kx, (2, cfg['input_length'], cfg['enc_in']),
                          dtype=jnp.float32)
    params = init_params(kp, cfg)

    fwd = jax.jit(functools.partial(tstransformer_forward, cfg=cfg))
    pred, attns = fwd(x, params)
    jax.block_until_ready(pred)
    for a in attns:
        jax.block_until_ready(a)

    assert pred.shape == (2, cfg['c_out'])
    assert all(a.shape == (2, cfg['n_heads'], cfg['input_length'],
                           cfg['input_length']) for a in attns)
    print("KERNEL_OK")
</pallas_src>

<mosaic_0001>
module attributes {stable_mosaic.version = 11 : i64} {
  func.func @_embedding_kernel(%arg0: i32, %arg1: memref<1x16x4xf32, #tpu.memory_space<vmem>>, %arg2: memref<3x4x32xf32, #tpu.memory_space<vmem>>, %arg3: memref<1x32xf32, #tpu.memory_space<vmem>>, %arg4: memref<16x32xf32, #tpu.memory_space<vmem>>, %arg5: memref<1x16x32xf32, #tpu.memory_space<vmem>>) attributes {dimension_semantics = [#tpu.dimension_semantics<parallel>], iteration_bounds = array<i64: 2>, scalar_prefetch = 0 : i64, scratch_operands = 0 : i64, tpu.core_type = #tpu.core_type<tc>, window_params = [{transform_indices = @transform_0, window_bounds = array<i64: 1, 16, 4>}, {pipeline_mode = #tpu.pipeline_mode<synchronous>, transform_indices = @transform_1, window_bounds = array<i64: 3, 4, 32>}, {pipeline_mode = #tpu.pipeline_mode<synchronous>, transform_indices = @transform_2, window_bounds = array<i64: 1, 32>}, {pipeline_mode = #tpu.pipeline_mode<synchronous>, transform_indices = @transform_3, window_bounds = array<i64: 16, 32>}, {transform_indices = @transform_4, window_bounds = array<i64: 1, 16, 32>}]} {
    %c0 = arith.constant 0 : index
    %c0_0 = arith.constant 0 : index
    %c0_1 = arith.constant 0 : index
    %0 = vector.load %arg1[%c0, %c0_0, %c0_1] : memref<1x16x4xf32, #tpu.memory_space<vmem>>, vector<1x16x4xf32>
    %1 = vector.shape_cast %0 : vector<1x16x4xf32> to vector<16x4xf32>
    %c0_2 = arith.constant 0 : index
    %c0_3 = arith.constant 0 : index
    %2 = vector.load %arg3[%c0_2, %c0_3] : memref<1x32xf32, #tpu.memory_space<vmem>>, vector<1x32xf32>
    %c0_4 = arith.constant 0 : index
    %c0_5 = arith.constant 0 : index
    %3 = vector.load %arg4[%c0_4, %c0_5] : memref<16x32xf32, #tpu.memory_space<vmem>>, vector<16x32xf32>
    %4 = vector.broadcast %2 : vector<1x32xf32> to vector<16x32xf32>
    %5 = arith.addf %4, %3 : vector<16x32xf32>
    %6 = vector.extract_strided_slice %1 {offsets = [15, 0], sizes = [1, 4], strides = [1, 1]} : vector<16x4xf32> to vector<1x4xf32>
    %7 = vector.extract_strided_slice %1 {offsets = [0, 0], sizes = [15, 4], strides = [1, 1]} : vector<16x4xf32> to vector<15x4xf32>
    %8 = tpu.concatenate %6, %7 in 0 : vector<1x4xf32>, vector<15x4xf32> -> vector<16x4xf32>
    %c0_6 = arith.constant 0 : index
    %c0_7 = arith.constant 0 : index
    %c0_8 = arith.constant 0 : index
    %9 = vector.load %arg2[%c0_6, %c0_7, %c0_8] : memref<3x4x32xf32, #tpu.memory_space<vmem>>, vector<1x4x32xf32>
    %10 = vector.shape_cast %9 : vector<1x4x32xf32> to vector<4x32xf32>
    %cst = arith.constant dense<0.000000e+00> : vector<16x32xf32>
    %11 = tpu.matmul %8, %10, %cst {dimension_numbers = #tpu.dot_dimension_numbers<[1], [0], [0], [1], [0, 0, 1, 1], [], []>} : vector<16x4xf32>, vector<4x32xf32>, vector<16x32xf32> -> vector<16x32xf32>
    %12 = arith.addf %5, %11 : vector<16x32xf32>
    %c1 = arith.constant 1 : index
    %c0_9 = arith.constant 0 : index
    %c0_10 = arith.constant 0 : index
    %13 = vector.load %arg2[%c1, %c0_9, %c0_10] : memref<3x4x32xf32, #tpu.memory_space<vmem>>, vector<1x4x32xf32>
    %14 = vector.shape_cast %13 : vector<1x4x32xf32> to vector<4x32xf32>
    %cst_11 = arith.constant dense<0.000000e+00> : vector<16x32xf32>
    %15 = tpu.matmul %1, %14, %cst_11 {dimension_numbers = #tpu.dot_dimension_numbers<[1], [0], [0], [1], [0, 0, 1, 1], [], []>} : vector<16x4xf32>, vector<4x32xf32>, vector<16x32xf32> -> vector<16x32xf32>
    %16 = arith.addf %12, %15 : vector<16x32xf32>
    %17 = vector.extract_strided_slice %1 {offsets = [1, 0], sizes = [15, 4], strides = [1, 1]} : vector<16x4xf32> to vector<15x4xf32>
    %18 = vector.extract_strided_slice %1 {offsets = [0, 0], sizes = [1, 4], strides = [1, 1]} : vector<16x4xf32> to vector<1x4xf32>
    %19 = tpu.concatenate %17, %18 in 0 : vector<15x4xf32>, vector<1x4xf32> -> vector<16x4xf32>
    %c2 = arith.constant 2 : index
    %c0_12 = arith.constant 0 : index
    %c0_13 = arith.constant 0 : index
    %20 = vector.load %arg2[%c2, %c0_12, %c0_13] : memref<3x4x32xf32, #tpu.memory_space<vmem>>, vector<1x4x32xf32>
    %21 = vector.shape_cast %20 : vector<1x4x32xf32> to vector<4x32xf32>
    %cst_14 = arith.constant dense<0.000000e+00> : vector<16x32xf32>
    %22 = tpu.matmul %19, %21, %cst_14 {dimension_numbers = #tpu.dot_dimension_numbers<[1], [0], [0], [1], [0, 0, 1, 1], [], []>} : vector<16x4xf32>, vector<4x32xf32>, vector<16x32xf32> -> vector<16x32xf32>
    %23 = arith.addf %16, %22 : vector<16x32xf32>
    %c0_15 = arith.constant 0 : index
    %c0_16 = arith.constant 0 : index
    %c0_17 = arith.constant 0 : index
    %24 = vector.load %arg5[%c0_15, %c0_16, %c0_17] : memref<1x16x32xf32, #tpu.memory_space<vmem>>, vector<1x16x32xf32>
    %25 = vector.shape_cast %24 : vector<1x16x32xf32> to vector<16x32xf32>
    %26 = vector.shape_cast %23 : vector<16x32xf32> to vector<1x16x32xf32>
    tpu.vector_store %arg5[%c0_15, %c0_16, %c0_17], %26 {strides = array<i32>} : memref<1x16x32xf32, #tpu.memory_space<vmem>>, vector<1x16x32xf32>,
    return
  }
  func.func @transform_0(%arg0: i32) -> (i32, i32, i32) {
    %c0_i32 = arith.constant 0 : i32
    %c0_i32_0 = arith.constant 0 : i32
    %c0_i32_1 = arith.constant 0 : i32
    return %arg0, %c0_i32, %c0_i32_0 : i32, i32, i32
  }
  func.func @transform_1(%arg0: i32) -> (i32, i32, i32) {
    %c0_i32 = arith.constant 0 : i32
    %c0_i32_0 = arith.constant 0 : i32
    %c0_i32_1 = arith.constant 0 : i32
    %c0_i32_2 = arith.constant 0 : i32
    return %c0_i32, %c0_i32_0, %c0_i32_1 : i32, i32, i32
  }
  func.func @transform_2(%arg0: i32) -> (i32, i32) {
    %c0_i32 = arith.constant 0 : i32
    %c0_i32_0 = arith.constant 0 : i32
    %c0_i32_1 = arith.constant 0 : i32
    return %c0_i32, %c0_i32_0 : i32, i32
  }
  func.func @transform_3(%arg0: i32) -> (i32, i32) {
    %c0_i32 = arith.constant 0 : i32
    %c0_i32_0 = arith.constant 0 : i32
    %c0_i32_1 = arith.constant 0 : i32
    return %c0_i32, %c0_i32_0 : i32, i32
  }
  func.func @transform_4(%arg0: i32) -> (i32, i32, i32) {
    %c0_i32 = arith.constant 0 : i32
    %c0_i32_0 = arith.constant 0 : i32
    %c0_i32_1 = arith.constant 0 : i32
    return %arg0, %c0_i32, %c0_i32_0 : i32, i32, i32
  }
}

module attributes {stable_mosaic.version = 11 : i64} {
  func.func @_attn_block_kernel(%arg0: i32, %arg1: memref<1x16x32xf32, #tpu.memory_space<vmem>>, %arg2: memref<1x32xf32, #tpu.memory_space<vmem>>, %arg3: memref<1x32xf32, #tpu.memory_space<vmem>>, %arg4: memref<3x32x32xf32, #tpu.memory_space<vmem>>, %arg5: memref<1x32xf32, #tpu.memory_space<vmem>>, %arg6: memref<3x32x32xf32, #tpu.memory_space<vmem>>, %arg7: memref<1x32xf32, #tpu.memory_space<vmem>>, %arg8: memref<32x32xf32, #tpu.memory_space<vmem>>, %arg9: memref<1x32xf32, #tpu.memory_space<vmem>>, %arg10: memref<32x32xf32, #tpu.memory_space<vmem>>, %arg11: memref<1x32xf32, #tpu.memory_space<vmem>>, %arg12: memref<1x16x32xf32, #tpu.memory_space<vmem>>, %arg13: memref<1x2x32xf32, #tpu.memory_space<vmem>>, %arg14: memref<1x4x16x16xf32, #tpu.memory_space<vmem>>) attributes {dimension_semantics = [#tpu.dimension_semantics<parallel>], iteration_bounds = array<i64: 2>, scalar_prefetch = 0 : i64, scratch_operands = 0 : i64, tpu.core_type = #tpu.core_type<tc>, window_params = [{transform_indices = @transform_0, window_bounds = array<i64: 1, 16, 32>}, {pipeline_mode = #tpu.pipeline_mode<synchronous>, transform_indices = @transform_1, window_bounds = array<i64: 1, 32>}, {pipeline_mode = #tpu.pipeline_mode<synchronous>, transform_indices = @transform_2, window_bounds = array<i64: 1, 32>}, {pipeline_mode = #tpu.pipeline_mode<synchronous>, transform_indices = @transform_3, window_bounds = array<i64: 3, 32, 32>}, {pipeline_mode = #tpu.pipeline_mode<synchronous>, transform_indices = @transform_4, window_bounds = array<i64: 1, 32>}, {pipeline_mode = #tpu.pipeline_mode<synchronous>, transform_indices = @transform_5, window_bounds = array<i64: 3, 32, 32>}, {pipeline_mode = #tpu.pipeline_mode<synchronous>, transform_indices = @transform_6, window_bounds = array<i64: 1, 32>}, {pipeline_mode = #tpu.pipeline_mode<synchronous>, transform_indices = @transform_7, window_bounds = array<i64: 32, 32>}, {pipeline_mode = #tpu.pipeline_mode<synchronous>, transform_indices = @transform_8, window_bounds = array<i64: 1, 32>}, {pipeline_mode = #tpu.pipeline_mode<synchronous>, transform_indices = @transform_9, window_bounds = array<i64: 32, 32>}, {pipeline_mode = #tpu.pipeline_mode<synchronous>, transform_indices = @transform_10, window_bounds = array<i64: 1, 32>}, {transform_indices = @transform_11, window_bounds = array<i64: 1, 16, 32>}, {transform_indices = @transform_12, window_bounds = array<i64: 1, 2, 32>}, {transform_indices = @transform_13, window_bounds = array<i64: 1, 4, 16, 16>}]} {
    %c0 = arith.constant 0 : index
    %c0_0 = arith.constant 0 : index
    %c0_1 = arith.constant 0 : index
    %0 = vector.load %arg1[%c0, %c0_0, %c0_1] : memref<1x16x32xf32, #tpu.memory_space<vmem>>, vector<1x16x32xf32>
    %1 = vector.shape_cast %0 : vector<1x16x32xf32> to vector<16x32xf32>
    %c0_2 = arith.constant 0 : index
    %c0_3 = arith.constant 0 : index
    %2 = vector.load %arg2[%c0_2, %c0_3] : memref<1x32xf32, #tpu.memory_space<vmem>>, vector<1x32xf32>
    %3 = vector.broadcast %2 : vector<1x32xf32> to vector<16x32xf32>
    %4 = arith.mulf %1, %3 : vector<16x32xf32>
    %c0_4 = arith.constant 0 : index
    %c0_5 = arith.constant 0 : index
    %5 = vector.load %arg3[%c0_4, %c0_5] : memref<1x32xf32, #tpu.memory_space<vmem>>, vector<1x32xf32>
    %6 = vector.broadcast %5 : vector<1x32xf32> to vector<16x32xf32>
    %7 = arith.addf %4, %6 : vector<16x32xf32>
    %cst = arith.constant 0.000000e+00 : f32
    %8 = vector.broadcast %cst : f32 to vector<1x32xf32>
    %9 = vector.extract_strided_slice %7 {offsets = [0, 0], sizes = [15, 32], strides = [1, 1]} : vector<16x32xf32> to vector<15x32xf32>
    %10 = tpu.concatenate %8, %9 in 0 : vector<1x32xf32>, vector<15x32xf32> -> vector<16x32xf32>
    %cst_6 = arith.constant 0.000000e+00 : f32
    %11 = vector.broadcast %cst_6 : f32 to vector<2x32xf32>
    %12 = vector.extract_strided_slice %7 {offsets = [0, 0], sizes = [14, 32], strides = [1, 1]} : vector<16x32xf32> to vector<14x32xf32>
    %13 = tpu.concatenate %11, %12 in 0 : vector<2x32xf32>, vector<14x32xf32> -> vector<16x32xf32>
    %c0_7 = arith.constant 0 : index
    %c0_8 = arith.constant 0 : index
    %14 = vector.load %arg5[%c0_7, %c0_8] : memref<1x32xf32, #tpu.memory_space<vmem>>, vector<1x32xf32>
    %c0_9 = arith.constant 0 : index
    %c0_10 = arith.constant 0 : index
    %c0_11 = arith.constant 0 : index
    %15 = vector.load %arg4[%c0_9, %c0_10, %c0_11] : memref<3x32x32xf32, #tpu.memory_space<vmem>>, vector<1x32x32xf32>
    %16 = vector.shape_cast %15 : vector<1x32x32xf32> to vector<32x32xf32>
    %cst_12 = arith.constant dense<0.000000e+00> : vector<16x32xf32>
    %17 = tpu.matmul %13, %16, %cst_12 {dimension_numbers = #tpu.dot_dimension_numbers<[1], [0], [0], [1], [0, 0, 1, 1], [], []>} : vector<16x32xf32>, vector<32x32xf32>, vector<16x32xf32> -> vector<16x32xf32>
    %18 = vector.broadcast %14 : vector<1x32xf32> to vector<16x32xf32>
    %19 = arith.addf %18, %17 : vector<16x32xf32>
    %c1 = arith.constant 1 : index
    %c0_13 = arith.constant 0 : index
    %c0_14 = arith.constant 0 : index
    %20 = vector.load %arg4[%c1, %c0_13, %c0_14] : memref<3x32x32xf32, #tpu.memory_space<vmem>>, vector<1x32x32xf32>
    %21 = vector.shape_cast %20 : vector<1x32x32xf32> to vector<32x32xf32>
    %cst_15 = arith.constant dense<0.000000e+00> : vector<16x32xf32>
    %22 = tpu.matmul %10, %21, %cst_15 {dimension_numbers = #tpu.dot_dimension_numbers<[1], [0], [0], [1], [0, 0, 1, 1], [], []>} : vector<16x32xf32>, vector<32x32xf32>, vector<16x32xf32> -> vector<16x32xf32>
    %23 = arith.addf %19, %22 : vector<16x32xf32>
    %c2 = arith.constant 2 : index
    %c0_16 = arith.constant 0 : index
    %c0_17 = arith.constant 0 : index
    %24 = vector.load %arg4[%c2, %c0_16, %c0_17] : memref<3x32x32xf32, #tpu.memory_space<vmem>>, vector<1x32x32xf32>
    %25 = vector.shape_cast %24 : vector<1x32x32xf32> to vector<32x32xf32>
    %cst_18 = arith.constant dense<0.000000e+00> : vector<16x32xf32>
    %26 = tpu.matmul %7, %25, %cst_18 {dimension_numbers = #tpu.dot_dimension_numbers<[1], [0], [0], [1], [0, 0, 1, 1], [], []>} : vector<16x32xf32>, vector<32x32xf32>, vector<16x32xf32> -> vector<16x32xf32>
    %27 = arith.addf %23, %26 : vector<16x32xf32>
    %cst_19 = arith.constant 0.353553385 : f32
    %28 = vector.broadcast %cst_19 : f32 to vector<16x32xf32>
    %29 = arith.mulf %27, %28 : vector<16x32xf32>
    %c0_20 = arith.constant 0 : index
    %c0_21 = arith.constant 0 : index
    %30 = vector.load %arg7[%c0_20, %c0_21] : memref<1x32xf32, #tpu.memory_space<vmem>>, vector<1x32xf32>
    %c0_22 = arith.constant 0 : index
    %c0_23 = arith.constant 0 : index
    %c0_24 = arith.constant 0 : index
    %31 = vector.load %arg6[%c0_22, %c0_23, %c0_24] : memref<3x32x32xf32, #tpu.memory_space<vmem>>, vector<1x32x32xf32>
    %32 = vector.shape_cast %31 : vector<1x32x32xf32> to vector<32x32xf32>
    %cst_25 = arith.constant dense<0.000000e+00> : vector<16x32xf32>
    %33 = tpu.matmul %13, %32, %cst_25 {dimension_numbers = #tpu.dot_dimension_numbers<[1], [0], [0], [1], [0, 0, 1, 1], [], []>} : vector<16x32xf32>, vector<32x32xf32>, vector<16x32xf32> -> vector<16x32xf32>
    %34 = vector.broadcast %30 : vector<1x32xf32> to vector<16x32xf32>
    %35 = arith.addf %34, %33 : vector<16x32xf32>
    %c1_26 = arith.constant 1 : index
    %c0_27 = arith.constant 0 : index
    %c0_28 = arith.constant 0 : index
    %36 = vector.load %arg6[%c1_26, %c0_27, %c0_28] : memref<3x32x32xf32, #tpu.memory_space<vmem>>, vector<1x32x32xf32>
    %37 = vector.shape_cast %36 : vector<1x32x32xf32> to vector<32x32xf32>
    %cst_29 = arith.constant dense<0.000000e+00> : vector<16x32xf32>
    %38 = tpu.matmul %10, %37, %cst_29 {dimension_numbers = #tpu.dot_dimension_numbers<[1], [0], [0], [1], [0, 0, 1, 1], [], []>} : vector<16x32xf32>, vector<32x32xf32>, vector<16x32xf32> -> vector<16x32xf32>
    %39 = arith.addf %35, %38 : vector<16x32xf32>
    %c2_30 = arith.constant 2 : index
    %c0_31 = arith.constant 0 : index
    %c0_32 = arith.constant 0 : index
    %40 = vector.load %arg6[%c2_30, %c0_31, %c0_32] : memref<3x32x32xf32, #tpu.memory_space<vmem>>, vector<1x32x32xf32>
    %41 = vector.shape_cast %40 : vector<1x32x32xf32> to vector<32x32xf32>
    %cst_33 = arith.constant dense<0.000000e+00> : vector<16x32xf32>
    %42 = tpu.matmul %7, %41, %cst_33 {dimension_numbers = #tpu.dot_dimension_numbers<[1], [0], [0], [1], [0, 0, 1, 1], [], []>} : vector<16x32xf32>, vector<32x32xf32>, vector<16x32xf32> -> vector<16x32xf32>
    %43 = arith.addf %39, %42 : vector<16x32xf32>
    %c0_34 = arith.constant 0 : index
    %c0_35 = arith.constant 0 : index
    %44 = vector.load %arg8[%c0_34, %c0_35] : memref<32x32xf32, #tpu.memory_space<vmem>>, vector<32x32xf32>
    %cst_36 = arith.constant dense<0.000000e+00> : vector<16x32xf32>
    %45 = tpu.matmul %7, %44, %cst_36 {dimension_numbers = #tpu.dot_dimension_numbers<[1], [0], [0], [1], [0, 0, 1, 1], [], []>} : vector<16x32xf32>, vector<32x32xf32>, vector<16x32xf32> -> vector<16x32xf32>
    %c0_37 = arith.constant 0 : index
    %c0_38 = arith.constant 0 : index
    %46 = vector.load %arg9[%c0_37, %c0_38] : memref<1x32xf32, #tpu.memory_space<vmem>>, vector<1x32xf32>
    %47 = vector.broadcast %46 : vector<1x32xf32> to vector<16x32xf32>
    %48 = arith.addf %45, %47 : vector<16x32xf32>
    %49 = tpu.iota {dimensions = array<i32: 0>} : vector<16x16xi32>
    %50 = tpu.iota {dimensions = array<i32: 1>} : vector<16x16xi32>
    %51 = arith.cmpi sle, %50, %49 : vector<16x16xi32>
    %52 = vector.extract_strided_slice %29 {offsets = [0, 0], sizes = [16, 8], strides = [1, 1]} : vector<16x32xf32> to vector<16x8xf32>
    %53 = vector.extract_strided_slice %43 {offsets = [0, 0], sizes = [16, 8], strides = [1, 1]} : vector<16x32xf32> to vector<16x8xf32>
    %54 = vector.extract_strided_slice %48 {offsets = [0, 0], sizes = [16, 8], strides = [1, 1]} : vector<16x32xf32> to vector<16x8xf32>
    %cst_39 = arith.constant dense<0.000000e+00> : vector<16x16xf32>
    %55 = tpu.matmul %52, %53, %cst_39 {dimension_numbers = #tpu.dot_dimension_numbers<[1], [1], [0], [0], [0, 0, 1, 0], [], []>} : vector<16x8xf32>, vector<16x8xf32>, vector<16x16xf32> -> vector<16x16xf32>
    %cst_40 = arith.constant -1.000000e+30 : f32
    %56 = vector.broadcast %cst_40 : f32 to vector<16x16xf32>
    %57 = arith.select %51, %55, %56 : vector<16x16xi1>, vector<16x16xf32>
    %cst_41 = arith.constant dense<0xFF800000> : vector<16xf32>
    %58 = vector.multi_reduction <maximumf>, %57, %cst_41 [1] : vector<16x16xf32> to vector<16xf32>
    %59 = vector.shape_cast %58 : vector<16xf32> to vector<16x1xf32>
    %60 = vector.broadcast %59 : vector<16x1xf32> to vector<16x16xf32>
    %61 = arith.subf %57, %60 : vector<16x16xf32>
    %62 = math.exp %61 : vector<16x16xf32>
    %cst_42 = arith.constant dense<0.000000e+00> : vector<16xf32>
    %63 = vector.multi_reduction <add>, %62, %cst_42 [1] : vector<16x16xf32> to vector<16xf32>
    %64 = vector.shape_cast %63 : vector<16xf32> to vector<16x1xf32>
    %65 = vector.broadcast %64 : vector<16x1xf32> to vector<16x16xf32>
    %66 = arith.divf %62, %65 : vector<16x16xf32>
    %c0_43 = arith.constant 0 : index
    %c0_44 = arith.constant 0 : index
    %c0_45 = arith.constant 0 : index
    %c0_46 = arith.constant 0 : index
    %67 = vector.load %arg14[%c0_43, %c0_44, %c0_45, %c0_46] : memref<1x4x16x16xf32, #tpu.memory_space<vmem>>, vector<1x1x16x16xf32>
    %68 = vector.shape_cast %67 : vector<1x1x16x16xf32> to vector<16x16xf32>
    %69 = vector.shape_cast %66 : vector<16x16xf32> to vector<1x1x16x16xf32>
    tpu.vector_store %arg14[%c0_43, %c0_44, %c0_45, %c0_46], %69 {strides = array<i32>} : memref<1x4x16x16xf32, #tpu.memory_space<vmem>>, vector<1x1x16x16xf32>,
    %cst_47 = arith.constant dense<0.000000e+00> : vector<16x8xf32>
    %70 = tpu.matmul %66, %54, %cst_47 {dimension_numbers = #tpu.dot_dimension_numbers<[1], [0], [0], [1], [0, 0, 1, 1], [], []>} : vector<16x16xf32>, vector<16x8xf32>, vector<16x8xf32> -> vector<16x8xf32>
    %71 = vector.extract_strided_slice %29 {offsets = [0, 8], sizes = [16, 8], strides = [1, 1]} : vector<16x32xf32> to vector<16x8xf32>
    %72 = vector.extract_strided_slice %43 {offsets = [0, 8], sizes = [16, 8], strides = [1, 1]} : vector<16x32xf32> to vector<16x8xf32>
    %73 = vector.extract_strided_slice %48 {offsets = [0, 8], sizes = [16, 8], strides = [1, 1]} : vector<16x32xf32> to vector<16x8xf32>
    %cst_48 = arith.constant dense<0.000000e+00> : vector<16x16xf32>
    %74 = tpu.matmul %71, %72, %cst_48 {dimension_numbers = #tpu.dot_dimension_numbers<[1], [1], [0], [0], [0, 0, 1, 0], [], []>} : vector<16x8xf32>, vector<16x8xf32>, vector<16x16xf32> -> vector<16x16xf32>
    %cst_49 = arith.constant -1.000000e+30 : f32
    %75 = vector.broadcast %cst_49 : f32 to vector<16x16xf32>
    %76 = arith.select %51, %74, %75 : vector<16x16xi1>, vector<16x16xf32>
    %cst_50 = arith.constant dense<0xFF800000> : vector<16xf32>
    %77 = vector.multi_reduction <maximumf>, %76, %cst_50 [1] : vector<16x16xf32> to vector<16xf32>
    %78 = vector.shape_cast %77 : vector<16xf32> to vector<16x1xf32>
    %79 = vector.broadcast %78 : vector<16x1xf32> to vector<16x16xf32>
    %80 = arith.subf %76, %79 : vector<16x16xf32>
    %81 = math.exp %80 : vector<16x16xf32>
    %cst_51 = arith.constant dense<0.000000e+00> : vector<16xf32>
    %82 = vector.multi_reduction <add>, %81, %cst_51 [1] : vector<16x16xf32> to vector<16xf32>
    %83 = vector.shape_cast %82 : vector<16xf32> to vector<16x1xf32>
    %84 = vector.broadcast %83 : vector<16x1xf32> to vector<16x16xf32>
    %85 = arith.divf %81, %84 : vector<16x16xf32>
    %c0_52 = arith.constant 0 : index
    %c1_53 = arith.constant 1 : index
    %c0_54 = arith.constant 0 : index
    %c0_55 = arith.constant 0 : index
    %86 = vector.load %arg14[%c0_52, %c1_53, %c0_54, %c0_55] : memref<1x4x16x16xf32, #tpu.memory_space<vmem>>, vector<1x1x16x16xf32>
    %87 = vector.shape_cast %86 : vector<1x1x16x16xf32> to vector<16x16xf32>
    %88 = vector.shape_cast %85 : vector<16x16xf32> to vector<1x1x16x16xf32>
    tpu.vector_store %arg14[%c0_52, %c1_53, %c0_54, %c0_55], %88 {strides = array<i32>} : memref<1x4x16x16xf32, #tpu.memory_space<vmem>>, vector<1x1x16x16xf32>,
    %cst_56 = arith.constant dense<0.000000e+00> : vector<16x8xf32>
    %89 = tpu.matmul %85, %73, %cst_56 {dimension_numbers = #tpu.dot_dimension_numbers<[1], [0], [0], [1], [0, 0, 1, 1], [], []>} : vector<16x16xf32>, vector<16x8xf32>, vector<16x8xf32> -> vector<16x8xf32>
    %90 = vector.extract_strided_slice %29 {offsets = [0, 16], sizes = [16, 8], strides = [1, 1]} : vector<16x32xf32> to vector<16x8xf32>
    %91 = vector.extract_strided_slice %43 {offsets = [0, 16], sizes = [16, 8], strides = [1, 1]} : vector<16x32xf32> to vector<16x8xf32>
    %92 = vector.extract_strided_slice %48 {offsets = [0, 16], sizes = [16, 8], strides = [1, 1]} : vector<16x32xf32> to vector<16x8xf32>
    %cst_57 = arith.constant dense<0.000000e+00> : vector<16x16xf32>
    %93 = tpu.matmul %90, %91, %cst_57 {dimension_numbers = #tpu.dot_dimension_numbers<[1], [1], [0], [0], [0, 0, 1, 0], [], []>} : vector<16x8xf32>, vector<16x8xf32>, vector<16x16xf32> -> vector<16x16xf32>
    %cst_58 = arith.constant -1.000000e+30 : f32
    %94 = vector.broadcast %cst_58 : f32 to vector<16x16xf32>
    %95 = arith.select %51, %93, %94 : vector<16x16xi1>, vector<16x16xf32>
    %cst_59 = arith.constant dense<0xFF800000> : vector<16xf32>
    %96 = vector.multi_reduction <maximumf>, %95, %cst_59 [1] : vector<16x16xf32> to vector<16xf32>
    %97 = vector.shape_cast %96 : vector<16xf32> to vector<16x1xf32>
    %98 = vector.broadcast %97 : vector<16x1xf32> to vector<16x16xf32>
    %99 = arith.subf %95, %98 : vector<16x16xf32>
    %100 = math.exp %99 : vector<16x16xf32>
    %cst_60 = arith.constant dense<0.000000e+00> : vector<16xf32>
    %101 = vector.multi_reduction <add>, %100, %cst_60 [1] : vector<16x16xf32> to vector<16xf32>
    %102 = vector.shape_cast %101 : vector<16xf32> to vector<16x1xf32>
    %103 = vector.broadcast %102 : vector<16x1xf32> to vector<16x16xf32>
    %104 = arith.divf %100, %103 : vector<16x16xf32>
    %c0_61 = arith.constant 0 : index
    %c2_62 = arith.constant 2 : index
    %c0_63 = arith.constant 0 : index
    %c0_64 = arith.constant 0 : index
    %105 = vector.load %arg14[%c0_61, %c2_62, %c0_63, %c0_64] : memref<1x4x16x16xf32, #tpu.memory_space<vmem>>, vector<1x1x16x16xf32>
    %106 = vector.shape_cast %105 : vector<1x1x16x16xf32> to vector<16x16xf32>
    %107 = vector.shape_cast %104 : vector<16x16xf32> to vector<1x1x16x16xf32>
    tpu.vector_store %arg14[%c0_61, %c2_62, %c0_63, %c0_64], %107 {strides = array<i32>} : memref<1x4x16x16xf32, #tpu.memory_space<vmem>>, vector<1x1x16x16xf32>,
    %cst_65 = arith.constant dense<0.000000e+00> : vector<16x8xf32>
    %108 = tpu.matmul %104, %92, %cst_65 {dimension_numbers = #tpu.dot_dimension_numbers<[1], [0], [0], [1], [0, 0, 1, 1], [], []>} : vector<16x16xf32>, vector<16x8xf32>, vector<16x8xf32> -> vector<16x8xf32>
    %109 = vector.extract_strided_slice %29 {offsets = [0, 24], sizes = [16, 8], strides = [1, 1]} : vector<16x32xf32> to vector<16x8xf32>
    %110 = vector.extract_strided_slice %43 {offsets = [0, 24], sizes = [16, 8], strides = [1, 1]} : vector<16x32xf32> to vector<16x8xf32>
    %111 = vector.extract_strided_slice %48 {offsets = [0, 24], sizes = [16, 8], strides = [1, 1]} : vector<16x32xf32> to vector<16x8xf32>
    %cst_66 = arith.constant dense<0.000000e+00> : vector<16x16xf32>
    %112 = tpu.matmul %109, %110, %cst_66 {dimension_numbers = #tpu.dot_dimension_numbers<[1], [1], [0], [0], [0, 0, 1, 0], [], []>} : vector<16x8xf32>, vector<16x8xf32>, vector<16x16xf32> -> vector<16x16xf32>
    %cst_67 = arith.constant -1.000000e+30 : f32
    %113 = vector.broadcast %cst_67 : f32 to vector<16x16xf32>
    %114 = arith.select %51, %112, %113 : vector<16x16xi1>, vector<16x16xf32>
    %cst_68 = arith.constant dense<0xFF800000> : vector<16xf32>
    %115 = vector.multi_reduction <maximumf>, %114, %cst_68 [1] : vector<16x16xf32> to vector<16xf32>
    %116 = vector.shape_cast %115 : vector<16xf32> to vector<16x1xf32>
    %117 = vector.broadcast %116 : vector<16x1xf32> to vector<16x16xf32>
    %118 = arith.subf %114, %117 : vector<16x16xf32>
    %119 = math.exp %118 : vector<16x16xf32>
    %cst_69 = arith.constant dense<0.000000e+00> : vector<16xf32>
    %120 = vector.multi_reduction <add>, %119, %cst_69 [1] : vector<16x16xf32> to vector<16xf32>
    %121 = vector.shape_cast %120 : vector<16xf32> to vector<16x1xf32>
    %122 = vector.broadcast %121 : vector<16x1xf32> to vector<16x16xf32>
    %123 = arith.divf %119, %122 : vector<16x16xf32>
    %c0_70 = arith.constant 0 : index
    %c3 = arith.constant 3 : index
    %c0_71 = arith.constant 0 : index
    %c0_72 = arith.constant 0 : index
    %124 = vector.load %arg14[%c0_70, %c3, %c0_71, %c0_72] : memref<1x4x16x16xf32, #tpu.memory_space<vmem>>, vector<1x1x16x16xf32>
    %125 = vector.shape_cast %124 : vector<1x1x16x16xf32> to vector<16x16xf32>
    %126 = vector.shape_cast %123 : vector<16x16xf32> to vector<1x1x16x16xf32>
    tpu.vector_store %arg14[%c0_70, %c3, %c0_71, %c0_72], %126 {strides = array<i32>} : memref<1x4x16x16xf32, #tpu.memory_space<vmem>>, vector<1x1x16x16xf32>,
    %cst_73 = arith.constant dense<0.000000e+00> : vector<16x8xf32>
    %127 = tpu.matmul %123, %111, %cst_73 {dimension_numbers = #tpu.dot_dimension_numbers<[1], [0], [0], [1], [0, 0, 1, 1], [], []>} : vector<16x16xf32>, vector<16x8xf32>, vector<16x8xf32> -> vector<16x8xf32>
    %128 = tpu.concatenate %70, %89, %108, %127 in 1 : vector<16x8xf32>, vector<16x8xf32>, vector<16x8xf32>, vector<16x8xf32> -> vector<16x32xf32>
    %c0_74 = arith.constant 0 : index
    %c0_75 = arith.constant 0 : index
    %129 = vector.load %arg10[%c0_74, %c0_75] : memref<32x32xf32, #tpu.memory_space<vmem>>, vector<32x32xf32>
    %cst_76 = arith.constant dense<0.000000e+00> : vector<16x32xf32>
    %130 = tpu.matmul %128, %129, %cst_76 {dimension_numbers = #tpu.dot_dimension_numbers<[1], [0], [0], [1], [0, 0, 1, 1], [], []>} : vector<16x32xf32>, vector<32x32xf32>, vector<16x32xf32> -> vector<16x32xf32>
    %c0_77 = arith.constant 0 : index
    %c0_78 = arith.constant 0 : index
    %131 = vector.load %arg11[%c0_77, %c0_78] : memref<1x32xf32, #tpu.memory_space<vmem>>, vector<1x32xf32>
    %132 = vector.broadcast %131 : vector<1x32xf32> to vector<16x32xf32>
    %133 = arith.addf %130, %132 : vector<16x32xf32>
    %134 = arith.addf %7, %133 : vector<16x32xf32>
    %c0_79 = arith.constant 0 : index
    %c0_80 = arith.constant 0 : index
    %c0_81 = arith.constant 0 : index
    %135 = vector.load %arg12[%c0_79, %c0_80, %c0_81] : memref<1x16x32xf32, #tpu.memory_space<vmem>>, vector<1x16x32xf32>
    %136 = vector.shape_cast %135 : vector<1x16x32xf32> to vector<16x32xf32>
    %137 = vector.shape_cast %134 : vector<16x32xf32> to vector<1x16x32xf32>
    tpu.vector_store %arg12[%c0_79, %c0_80, %c0_81], %137 {strides = array<i32>} : memref<1x16x32xf32, #tpu.memory_space<vmem>>, vector<1x16x32xf32>,
    %cst_82 = arith.constant dense<0.000000e+00> : vector<32xf32>
    %138 = vector.multi_reduction <add>, %134, %cst_82 [0] : vector<16x32xf32> to vector<32xf32>
    %139 = vector.shape_cast %138 : vector<32xf32> to vector<1x32xf32>
    %140 = arith.mulf %134, %134 : vector<16x32xf32>
    %cst_83 = arith.constant dense<0.000000e+00> : vector<32xf32>
    %141 = vector.multi_reduction <add>, %140, %cst_83 [0] : vector<16x32xf32> to vector<32xf32>
    %142 = vector.shape_cast %141 : vector<32xf32> to vector<1x32xf32>
    %143 = tpu.concatenate %139, %142 in 0 : vector<1x32xf32>, vector<1x32xf32> -> vector<2x32xf32>
    %c0_84 = arith.constant 0 : index
    %c0_85 = arith.constant 0 : index
    %c0_86 = arith.constant 0 : index
    %144 = vector.load %arg13[%c0_84, %c0_85, %c0_86] : memref<1x2x32xf32, #tpu.memory_space<vmem>>, vector<1x2x32xf32>
    %145 = vector.shape_cast %144 : vector<1x2x32xf32> to vector<2x32xf32>
    %146 = vector.shape_cast %143 : vector<2x32xf32> to vector<1x2x32xf32>
    tpu.vector_store %arg13[%c0_84, %c0_85, %c0_86], %146 {strides = array<i32>} : memref<1x2x32xf32, #tpu.memory_space<vmem>>, vector<1x2x32xf32>,
    return
  }
  func.func @transform_0(%arg0: i32) -> (i32, i32, i32) {
    %c0_i32 = arith.constant 0 : i32
    %c0_i32_0 = arith.constant 0 : i32
    %c0_i32_1 = arith.constant 0 : i32
    return %arg0, %c0_i32, %c0_i32_0 : i32, i32, i32
  }
  func.func @transform_1(%arg0: i32) -> (i32, i32) {
    %c0_i32 = arith.constant 0 : i32
    %c0_i32_0 = arith.constant 0 : i32
    %c0_i32_1 = arith.constant 0 : i32
    return %c0_i32, %c0_i32_0 : i32, i32
  }
  func.func @transform_2(%arg0: i32) -> (i32, i32) {
    %c0_i32 = arith.constant 0 : i32
    %c0_i32_0 = arith.constant 0 : i32
    %c0_i32_1 = arith.constant 0 : i32
    return %c0_i32, %c0_i32_0 : i32, i32
  }
  func.func @transform_3(%arg0: i32) -> (i32, i32, i32) {
    %c0_i32 = arith.constant 0 : i32
    %c0_i32_0 = arith.constant 0 : i32
    %c0_i32_1 = arith.constant 0 : i32
    %c0_i32_2 = arith.constant 0 : i32
    return %c0_i32, %c0_i32_0, %c0_i32_1 : i32, i32, i32
  }
  func.func @transform_4(%arg0: i32) -> (i32, i32) {
    %c0_i32 = arith.constant 0 : i32
    %c0_i32_0 = arith.constant 0 : i32
    %c0_i32_1 = arith.constant 0 : i32
    return %c0_i32, %c0_i32_0 : i32, i32
  }
  func.func @transform_5(%arg0: i32) -> (i32, i32, i32) {
    %c0_i32 = arith.constant 0 : i32
    %c0_i32_0 = arith.constant 0 : i32
    %c0_i32_1 = arith.constant 0 : i32
    %c0_i32_2 = arith.constant 0 : i32
    return %c0_i32, %c0_i32_0, %c0_i32_1 : i32, i32, i32
  }
  func.func @transform_6(%arg0: i32) -> (i32, i32) {
    %c0_i32 = arith.constant 0 : i32
    %c0_i32_0 = arith.constant 0 : i32
    %c0_i32_1 = arith.constant 0 : i32
    return %c0_i32, %c0_i32_0 : i32, i32
  }
  func.func @transform_7(%arg0: i32) -> (i32, i32) {
    %c0_i32 = arith.constant 0 : i32
    %c0_i32_0 = arith.constant 0 : i32
    %c0_i32_1 = arith.constant 0 : i32
    return %c0_i32, %c0_i32_0 : i32, i32
  }
  func.func @transform_8(%arg0: i32) -> (i32, i32) {
    %c0_i32 = arith.constant 0 : i32
    %c0_i32_0 = arith.constant 0 : i32
    %c0_i32_1 = arith.constant 0 : i32
    return %c0_i32, %c0_i32_0 : i32, i32
  }
  func.func @transform_9(%arg0: i32) -> (i32, i32) {
    %c0_i32 = arith.constant 0 : i32
    %c0_i32_0 = arith.constant 0 : i32
    %c0_i32_1 = arith.constant 0 : i32
    return %c0_i32, %c0_i32_0 : i32, i32
  }
  func.func @transform_10(%arg0: i32) -> (i32, i32) {
    %c0_i32 = arith.constant 0 : i32
    %c0_i32_0 = arith.constant 0 : i32
    %c0_i32_1 = arith.constant 0 : i32
    return %c0_i32, %c0_i32_0 : i32, i32
  }
  func.func @transform_11(%arg0: i32) -> (i32, i32, i32) {
    %c0_i32 = arith.constant 0 : i32
    %c0_i32_0 = arith.constant 0 : i32
    %c0_i32_1 = arith.constant 0 : i32
    return %arg0, %c0_i32, %c0_i32_0 : i32, i32, i32
  }
  func.func @transform_12(%arg0: i32) -> (i32, i32, i32) {
    %c0_i32 = arith.constant 0 : i32
    %c0_i32_0 = arith.constant 0 : i32
    %c0_i32_1 = arith.constant 0 : i32
    return %arg0, %c0_i32, %c0_i32_0 : i32, i32, i32
  }
  func.func @transform_13(%arg0: i32) -> (i32, i32, i32, i32) {
    %c0_i32 = arith.constant 0 : i32
    %c0_i32_0 = arith.constant 0 : i32
    %c0_i32_1 = arith.constant 0 : i32
    %c0_i32_2 = arith.constant 0 : i32
    return %arg0, %c0_i32, %c0_i32_0, %c0_i32_1 : i32, i32, i32, i32
  }
}

module attributes {stable_mosaic.version = 11 : i64} {
  func.func @_ffn_block_kernel(%arg0: i32, %arg1: memref<1x16x32xf32, #tpu.memory_space<vmem>>, %arg2: memref<1x32xf32, #tpu.memory_space<vmem>>, %arg3: memref<1x32xf32, #tpu.memory_space<vmem>>, %arg4: memref<32x128xf32, #tpu.memory_space<vmem>>, %arg5: memref<1x128xf32, #tpu.memory_space<vmem>>, %arg6: memref<128x32xf32, #tpu.memory_space<vmem>>, %arg7: memref<1x32xf32, #tpu.memory_space<vmem>>, %arg8: memref<1x16x32xf32, #tpu.memory_space<vmem>>, %arg9: memref<1x2x32xf32, #tpu.memory_space<vmem>>) attributes {dimension_semantics = [#tpu.dimension_semantics<parallel>], iteration_bounds = array<i64: 2>, scalar_prefetch = 0 : i64, scratch_operands = 0 : i64, tpu.core_type = #tpu.core_type<tc>, window_params = [{transform_indices = @transform_0, window_bounds = array<i64: 1, 16, 32>}, {pipeline_mode = #tpu.pipeline_mode<synchronous>, transform_indices = @transform_1, window_bounds = array<i64: 1, 32>}, {pipeline_mode = #tpu.pipeline_mode<synchronous>, transform_indices = @transform_2, window_bounds = array<i64: 1, 32>}, {pipeline_mode = #tpu.pipeline_mode<synchronous>, transform_indices = @transform_3, window_bounds = array<i64: 32, 128>}, {pipeline_mode = #tpu.pipeline_mode<synchronous>, transform_indices = @transform_4, window_bounds = array<i64: 1, 128>}, {pipeline_mode = #tpu.pipeline_mode<synchronous>, transform_indices = @transform_5, window_bounds = array<i64: 128, 32>}, {pipeline_mode = #tpu.pipeline_mode<synchronous>, transform_indices = @transform_6, window_bounds = array<i64: 1, 32>}, {transform_indices = @transform_7, window_bounds = array<i64: 1, 16, 32>}, {transform_indices = @transform_8, window_bounds = array<i64: 1, 2, 32>}]} {
    %c0 = arith.constant 0 : index
    %c0_0 = arith.constant 0 : index
    %c0_1 = arith.constant 0 : index
    %0 = vector.load %arg1[%c0, %c0_0, %c0_1] : memref<1x16x32xf32, #tpu.memory_space<vmem>>, vector<1x16x32xf32>
    %1 = vector.shape_cast %0 : vector<1x16x32xf32> to vector<16x32xf32>
    %c0_2 = arith.constant 0 : index
    %c0_3 = arith.constant 0 : index
    %2 = vector.load %arg2[%c0_2, %c0_3] : memref<1x32xf32, #tpu.memory_space<vmem>>, vector<1x32xf32>
    %3 = vector.broadcast %2 : vector<1x32xf32> to vector<16x32xf32>
    %4 = arith.mulf %1, %3 : vector<16x32xf32>
    %c0_4 = arith.constant 0 : index
    %c0_5 = arith.constant 0 : index
    %5 = vector.load %arg3[%c0_4, %c0_5] : memref<1x32xf32, #tpu.memory_space<vmem>>, vector<1x32xf32>
    %6 = vector.broadcast %5 : vector<1x32xf32> to vector<16x32xf32>
    %7 = arith.addf %4, %6 : vector<16x32xf32>
    %c0_6 = arith.constant 0 : index
    %c0_7 = arith.constant 0 : index
    %8 = vector.load %arg4[%c0_6, %c0_7] : memref<32x128xf32, #tpu.memory_space<vmem>>, vector<32x128xf32>
    %cst = arith.constant dense<0.000000e+00> : vector<16x128xf32>
    %9 = tpu.matmul %7, %8, %cst {dimension_numbers = #tpu.dot_dimension_numbers<[1], [0], [0], [1], [0, 0, 1, 1], [], []>} : vector<16x32xf32>, vector<32x128xf32>, vector<16x128xf32> -> vector<16x128xf32>
    %c0_8 = arith.constant 0 : index
    %c0_9 = arith.constant 0 : index
    %10 = vector.load %arg5[%c0_8, %c0_9] : memref<1x128xf32, #tpu.memory_space<vmem>>, vector<1x128xf32>
    %11 = vector.broadcast %10 : vector<1x128xf32> to vector<16x128xf32>
    %12 = arith.addf %9, %11 : vector<16x128xf32>
    %cst_10 = arith.constant 0.000000e+00 : f32
    %13 = vector.broadcast %cst_10 : f32 to vector<16x128xf32>
    %14 = arith.maximumf %12, %13 : vector<16x128xf32>
    %c0_11 = arith.constant 0 : index
    %c0_12 = arith.constant 0 : index
    %15 = vector.load %arg6[%c0_11, %c0_12] : memref<128x32xf32, #tpu.memory_space<vmem>>, vector<128x32xf32>
    %cst_13 = arith.constant dense<0.000000e+00> : vector<16x32xf32>
    %16 = tpu.matmul %14, %15, %cst_13 {dimension_numbers = #tpu.dot_dimension_numbers<[1], [0], [0], [1], [0, 0, 1, 1], [], []>} : vector<16x128xf32>, vector<128x32xf32>, vector<16x32xf32> -> vector<16x32xf32>
    %c0_14 = arith.constant 0 : index
    %c0_15 = arith.constant 0 : index
    %17 = vector.load %arg7[%c0_14, %c0_15] : memref<1x32xf32, #tpu.memory_space<vmem>>, vector<1x32xf32>
    %18 = vector.broadcast %17 : vector<1x32xf32> to vector<16x32xf32>
    %19 = arith.addf %16, %18 : vector<16x32xf32>
    %20 = arith.addf %7, %19 : vector<16x32xf32>
    %c0_16 = arith.constant 0 : index
    %c0_17 = arith.constant 0 : index
    %c0_18 = arith.constant 0 : index
    %21 = vector.load %arg8[%c0_16, %c0_17, %c0_18] : memref<1x16x32xf32, #tpu.memory_space<vmem>>, vector<1x16x32xf32>
    %22 = vector.shape_cast %21 : vector<1x16x32xf32> to vector<16x32xf32>
    %23 = vector.shape_cast %20 : vector<16x32xf32> to vector<1x16x32xf32>
    tpu.vector_store %arg8[%c0_16, %c0_17, %c0_18], %23 {strides = array<i32>} : memref<1x16x32xf32, #tpu.memory_space<vmem>>, vector<1x16x32xf32>,
    %cst_19 = arith.constant dense<0.000000e+00> : vector<32xf32>
    %24 = vector.multi_reduction <add>, %20, %cst_19 [0] : vector<16x32xf32> to vector<32xf32>
    %25 = vector.shape_cast %24 : vector<32xf32> to vector<1x32xf32>
    %26 = arith.mulf %20, %20 : vector<16x32xf32>
    %cst_20 = arith.constant dense<0.000000e+00> : vector<32xf32>
    %27 = vector.multi_reduction <add>, %26, %cst_20 [0] : vector<16x32xf32> to vector<32xf32>
    %28 = vector.shape_cast %27 : vector<32xf32> to vector<1x32xf32>
    %29 = tpu.concatenate %25, %28 in 0 : vector<1x32xf32>, vector<1x32xf32> -> vector<2x32xf32>
    %c0_21 = arith.constant 0 : index
    %c0_22 = arith.constant 0 : index
    %c0_23 = arith.constant 0 : index
    %30 = vector.load %arg9[%c0_21, %c0_22, %c0_23] : memref<1x2x32xf32, #tpu.memory_space<vmem>>, vector<1x2x32xf32>
    %31 = vector.shape_cast %30 : vector<1x2x32xf32> to vector<2x32xf32>
    %32 = vector.shape_cast %29 : vector<2x32xf32> to vector<1x2x32xf32>
    tpu.vector_store %arg9[%c0_21, %c0_22, %c0_23], %32 {strides = array<i32>} : memref<1x2x32xf32, #tpu.memory_space<vmem>>, vector<1x2x32xf32>,
    return
  }
  func.func @transform_0(%arg0: i32) -> (i32, i32, i32) {
    %c0_i32 = arith.constant 0 : i32
    %c0_i32_0 = arith.constant 0 : i32
    %c0_i32_1 = arith.constant 0 : i32
    return %arg0, %c0_i32, %c0_i32_0 : i32, i32, i32
  }
  func.func @transform_1(%arg0: i32) -> (i32, i32) {
    %c0_i32 = arith.constant 0 : i32
    %c0_i32_0 = arith.constant 0 : i32
    %c0_i32_1 = arith.constant 0 : i32
    return %c0_i32, %c0_i32_0 : i32, i32
  }
  func.func @transform_2(%arg0: i32) -> (i32, i32) {
    %c0_i32 = arith.constant 0 : i32
    %c0_i32_0 = arith.constant 0 : i32
    %c0_i32_1 = arith.constant 0 : i32
    return %c0_i32, %c0_i32_0 : i32, i32
  }
  func.func @transform_3(%arg0: i32) -> (i32, i32) {
    %c0_i32 = arith.constant 0 : i32
    %c0_i32_0 = arith.constant 0 : i32
    %c0_i32_1 = arith.constant 0 : i32
    return %c0_i32, %c0_i32_0 : i32, i32
  }
  func.func @transform_4(%arg0: i32) -> (i32, i32) {
    %c0_i32 = arith.constant 0 : i32
    %c0_i32_0 = arith.constant 0 : i32
    %c0_i32_1 = arith.constant 0 : i32
    return %c0_i32, %c0_i32_0 : i32, i32
  }
  func.func @transform_5(%arg0: i32) -> (i32, i32) {
    %c0_i32 = arith.constant 0 : i32
    %c0_i32_0 = arith.constant 0 : i32
    %c0_i32_1 = arith.constant 0 : i32
    return %c0_i32, %c0_i32_0 : i32, i32
  }
  func.func @transform_6(%arg0: i32) -> (i32, i32) {
    %c0_i32 = arith.constant 0 : i32
    %c0_i32_0 = arith.constant 0 : i32
    %c0_i32_1 = arith.constant 0 : i32
    return %c0_i32, %c0_i32_0 : i32, i32
  }
  func.func @transform_7(%arg0: i32) -> (i32, i32, i32) {
    %c0_i32 = arith.constant 0 : i32
    %c0_i32_0 = arith.constant 0 : i32
    %c0_i32_1 = arith.constant 0 : i32
    return %arg0, %c0_i32, %c0_i32_0 : i32, i32, i32
  }
  func.func @transform_8(%arg0: i32) -> (i32, i32, i32) {
    %c0_i32 = arith.constant 0 : i32
    %c0_i32_0 = arith.constant 0 : i32
    %c0_i32_1 = arith.constant 0 : i32
    return %arg0, %c0_i32, %c0_i32_0 : i32, i32, i32
  }
}

module attributes {stable_mosaic.version = 11 : i64} {
  func.func @_head_conv_kernel(%arg0: i32, %arg1: memref<1x16x32xf32, #tpu.memory_space<vmem>>, %arg2: memref<1x32xf32, #tpu.memory_space<vmem>>, %arg3: memref<1x32xf32, #tpu.memory_space<vmem>>, %arg4: memref<3x32x16xf32, #tpu.memory_space<vmem>>, %arg5: memref<1x16xf32, #tpu.memory_space<vmem>>, %arg6: memref<1x16x16xf32, #tpu.memory_space<vmem>>, %arg7: memref<1x2x16xf32, #tpu.memory_space<vmem>>) attributes {dimension_semantics = [#tpu.dimension_semantics<parallel>], iteration_bounds = array<i64: 2>, scalar_prefetch = 0 : i64, scratch_operands = 0 : i64, tpu.core_type = #tpu.core_type<tc>, window_params = [{transform_indices = @transform_0, window_bounds = array<i64: 1, 16, 32>}, {pipeline_mode = #tpu.pipeline_mode<synchronous>, transform_indices = @transform_1, window_bounds = array<i64: 1, 32>}, {pipeline_mode = #tpu.pipeline_mode<synchronous>, transform_indices = @transform_2, window_bounds = array<i64: 1, 32>}, {pipeline_mode = #tpu.pipeline_mode<synchronous>, transform_indices = @transform_3, window_bounds = array<i64: 3, 32, 16>}, {pipeline_mode = #tpu.pipeline_mode<synchronous>, transform_indices = @transform_4, window_bounds = array<i64: 1, 16>}, {transform_indices = @transform_5, window_bounds = array<i64: 1, 16, 16>}, {transform_indices = @transform_6, window_bounds = array<i64: 1, 2, 16>}]} {
    %c0 = arith.constant 0 : index
    %c0_0 = arith.constant 0 : index
    %c0_1 = arith.constant 0 : index
    %0 = vector.load %arg1[%c0, %c0_0, %c0_1] : memref<1x16x32xf32, #tpu.memory_space<vmem>>, vector<1x16x32xf32>
    %1 = vector.shape_cast %0 : vector<1x16x32xf32> to vector<16x32xf32>
    %c0_2 = arith.constant 0 : index
    %c0_3 = arith.constant 0 : index
    %2 = vector.load %arg2[%c0_2, %c0_3] : memref<1x32xf32, #tpu.memory_space<vmem>>, vector<1x32xf32>
    %3 = vector.broadcast %2 : vector<1x32xf32> to vector<16x32xf32>
    %4 = arith.mulf %1, %3 : vector<16x32xf32>
    %c0_4 = arith.constant 0 : index
    %c0_5 = arith.constant 0 : index
    %5 = vector.load %arg3[%c0_4, %c0_5] : memref<1x32xf32, #tpu.memory_space<vmem>>, vector<1x32xf32>
    %6 = vector.broadcast %5 : vector<1x32xf32> to vector<16x32xf32>
    %7 = arith.addf %4, %6 : vector<16x32xf32>
    %8 = vector.extract_strided_slice %7 {offsets = [0, 0], sizes = [1, 32], strides = [1, 1]} : vector<16x32xf32> to vector<1x32xf32>
    %9 = vector.extract_strided_slice %7 {offsets = [0, 0], sizes = [15, 32], strides = [1, 1]} : vector<16x32xf32> to vector<15x32xf32>
    %10 = tpu.concatenate %8, %9 in 0 : vector<1x32xf32>, vector<15x32xf32> -> vector<16x32xf32>
    %11 = vector.extract_strided_slice %7 {offsets = [1, 0], sizes = [15, 32], strides = [1, 1]} : vector<16x32xf32> to vector<15x32xf32>
    %12 = vector.extract_strided_slice %7 {offsets = [15, 0], sizes = [1, 32], strides = [1, 1]} : vector<16x32xf32> to vector<1x32xf32>
    %13 = tpu.concatenate %11, %12 in 0 : vector<15x32xf32>, vector<1x32xf32> -> vector<16x32xf32>
    %c0_6 = arith.constant 0 : index
    %c0_7 = arith.constant 0 : index
    %c0_8 = arith.constant 0 : index
    %14 = vector.load %arg4[%c0_6, %c0_7, %c0_8] : memref<3x32x16xf32, #tpu.memory_space<vmem>>, vector<1x32x16xf32>
    %15 = vector.shape_cast %14 : vector<1x32x16xf32> to vector<32x16xf32>
    %cst = arith.constant dense<0.000000e+00> : vector<16x16xf32>
    %16 = tpu.matmul %10, %15, %cst {dimension_numbers = #tpu.dot_dimension_numbers<[1], [0], [0], [1], [0, 0, 1, 1], [], []>} : vector<16x32xf32>, vector<32x16xf32>, vector<16x16xf32> -> vector<16x16xf32>
    %c1 = arith.constant 1 : index
    %c0_9 = arith.constant 0 : index
    %c0_10 = arith.constant 0 : index
    %17 = vector.load %arg4[%c1, %c0_9, %c0_10] : memref<3x32x16xf32, #tpu.memory_space<vmem>>, vector<1x32x16xf32>
    %18 = vector.shape_cast %17 : vector<1x32x16xf32> to vector<32x16xf32>
    %cst_11 = arith.constant dense<0.000000e+00> : vector<16x16xf32>
    %19 = tpu.matmul %7, %18, %cst_11 {dimension_numbers = #tpu.dot_dimension_numbers<[1], [0], [0], [1], [0, 0, 1, 1], [], []>} : vector<16x32xf32>, vector<32x16xf32>, vector<16x16xf32> -> vector<16x16xf32>
    %20 = arith.addf %16, %19 : vector<16x16xf32>
    %c2 = arith.constant 2 : index
    %c0_12 = arith.constant 0 : index
    %c0_13 = arith.constant 0 : index
    %21 = vector.load %arg4[%c2, %c0_12, %c0_13] : memref<3x32x16xf32, #tpu.memory_space<vmem>>, vector<1x32x16xf32>
    %22 = vector.shape_cast %21 : vector<1x32x16xf32> to vector<32x16xf32>
    %cst_14 = arith.constant dense<0.000000e+00> : vector<16x16xf32>
    %23 = tpu.matmul %13, %22, %cst_14 {dimension_numbers = #tpu.dot_dimension_numbers<[1], [0], [0], [1], [0, 0, 1, 1], [], []>} : vector<16x32xf32>, vector<32x16xf32>, vector<16x16xf32> -> vector<16x16xf32>
    %24 = arith.addf %20, %23 : vector<16x16xf32>
    %c0_15 = arith.constant 0 : index
    %c0_16 = arith.constant 0 : index
    %25 = vector.load %arg5[%c0_15, %c0_16] : memref<1x16xf32, #tpu.memory_space<vmem>>, vector<1x16xf32>
    %26 = vector.broadcast %25 : vector<1x16xf32> to vector<16x16xf32>
    %27 = arith.addf %24, %26 : vector<16x16xf32>
    %cst_17 = arith.constant 0.000000e+00 : f32
    %28 = vector.broadcast %cst_17 : f32 to vector<16x16xf32>
    %29 = arith.maximumf %27, %28 : vector<16x16xf32>
    %c0_18 = arith.constant 0 : index
    %c0_19 = arith.constant 0 : index
    %c0_20 = arith.constant 0 : index
    %30 = vector.load %arg6[%c0_18, %c0_19, %c0_20] : memref<1x16x16xf32, #tpu.memory_space<vmem>>, vector<1x16x16xf32>
    %31 = vector.shape_cast %30 : vector<1x16x16xf32> to vector<16x16xf32>
    %32 = vector.shape_cast %29 : vector<16x16xf32> to vector<1x16x16xf32>
    tpu.vector_store %arg6[%c0_18, %c0_19, %c0_20], %32 {strides = array<i32>} : memref<1x16x16xf32, #tpu.memory_space<vmem>>, vector<1x16x16xf32>,
    %cst_21 = arith.constant dense<0.000000e+00> : vector<16xf32>
    %33 = vector.multi_reduction <add>, %29, %cst_21 [0] : vector<16x16xf32> to vector<16xf32>
    %34 = vector.shape_cast %33 : vector<16xf32> to vector<1x16xf32>
    %35 = arith.mulf %29, %29 : vector<16x16xf32>
    %cst_22 = arith.constant dense<0.000000e+00> : vector<16xf32>
    %36 = vector.multi_reduction <add>, %35, %cst_22 [0] : vector<16x16xf32> to vector<16xf32>
    %37 = vector.shape_cast %36 : vector<16xf32> to vector<1x16xf32>
    %38 = tpu.concatenate %34, %37 in 0 : vector<1x16xf32>, vector<1x16xf32> -> vector<2x16xf32>
    %c0_23 = arith.constant 0 : index
    %c0_24 = arith.constant 0 : index
    %c0_25 = arith.constant 0 : index
    %39 = vector.load %arg7[%c0_23, %c0_24, %c0_25] : memref<1x2x16xf32, #tpu.memory_space<vmem>>, vector<1x2x16xf32>
    %40 = vector.shape_cast %39 : vector<1x2x16xf32> to vector<2x16xf32>
    %41 = vector.shape_cast %38 : vector<2x16xf32> to vector<1x2x16xf32>
    tpu.vector_store %arg7[%c0_23, %c0_24, %c0_25], %41 {strides = array<i32>} : memref<1x2x16xf32, #tpu.memory_space<vmem>>, vector<1x2x16xf32>,
    return
  }
  func.func @transform_0(%arg0: i32) -> (i32, i32, i32) {
    %c0_i32 = arith.constant 0 : i32
    %c0_i32_0 = arith.constant 0 : i32
    %c0_i32_1 = arith.constant 0 : i32
    return %arg0, %c0_i32, %c0_i32_0 : i32, i32, i32
  }
  func.func @transform_1(%arg0: i32) -> (i32, i32) {
    %c0_i32 = arith.constant 0 : i32
    %c0_i32_0 = arith.constant 0 : i32
    %c0_i32_1 = arith.constant 0 : i32
    return %c0_i32, %c0_i32_0 : i32, i32
  }
  func.func @transform_2(%arg0: i32) -> (i32, i32) {
    %c0_i32 = arith.constant 0 : i32
    %c0_i32_0 = arith.constant 0 : i32
    %c0_i32_1 = arith.constant 0 : i32
    return %c0_i32, %c0_i32_0 : i32, i32
  }
  func.func @transform_3(%arg0: i32) -> (i32, i32, i32) {
    %c0_i32 = arith.constant 0 : i32
    %c0_i32_0 = arith.constant 0 : i32
    %c0_i32_1 = arith.constant 0 : i32
    %c0_i32_2 = arith.constant 0 : i32
    return %c0_i32, %c0_i32_0, %c0_i32_1 : i32, i32, i32
  }
  func.func @transform_4(%arg0: i32) -> (i32, i32) {
    %c0_i32 = arith.constant 0 : i32
    %c0_i32_0 = arith.constant 0 : i32
    %c0_i32_1 = arith.constant 0 : i32
    return %c0_i32, %c0_i32_0 : i32, i32
  }
  func.func @transform_5(%arg0: i32) -> (i32, i32, i32) {
    %c0_i32 = arith.constant 0 : i32
    %c0_i32_0 = arith.constant 0 : i32
    %c0_i32_1 = arith.constant 0 : i32
    return %arg0, %c0_i32, %c0_i32_0 : i32, i32, i32
  }
  func.func @transform_6(%arg0: i32) -> (i32, i32, i32) {
    %c0_i32 = arith.constant 0 : i32
    %c0_i32_0 = arith.constant 0 : i32
    %c0_i32_1 = arith.constant 0 : i32
    return %arg0, %c0_i32, %c0_i32_0 : i32, i32, i32
  }
}

module attributes {stable_mosaic.version = 11 : i64} {
  func.func @_head_conv_kernel(%arg0: i32, %arg1: memref<1x16x16xf32, #tpu.memory_space<vmem>>, %arg2: memref<1x16xf32, #tpu.memory_space<vmem>>, %arg3: memref<1x16xf32, #tpu.memory_space<vmem>>, %arg4: memref<3x16x1xf32, #tpu.memory_space<vmem>>, %arg5: memref<1x1xf32, #tpu.memory_space<vmem>>, %arg6: memref<1x16x1xf32, #tpu.memory_space<vmem>>, %arg7: memref<1x2x1xf32, #tpu.memory_space<vmem>>) attributes {dimension_semantics = [#tpu.dimension_semantics<parallel>], iteration_bounds = array<i64: 2>, scalar_prefetch = 0 : i64, scratch_operands = 0 : i64, tpu.core_type = #tpu.core_type<tc>, window_params = [{transform_indices = @transform_0, window_bounds = array<i64: 1, 16, 16>}, {pipeline_mode = #tpu.pipeline_mode<synchronous>, transform_indices = @transform_1, window_bounds = array<i64: 1, 16>}, {pipeline_mode = #tpu.pipeline_mode<synchronous>, transform_indices = @transform_2, window_bounds = array<i64: 1, 16>}, {pipeline_mode = #tpu.pipeline_mode<synchronous>, transform_indices = @transform_3, window_bounds = array<i64: 3, 16, 1>}, {pipeline_mode = #tpu.pipeline_mode<synchronous>, transform_indices = @transform_4, window_bounds = array<i64: 1, 1>}, {transform_indices = @transform_5, window_bounds = array<i64: 1, 16, 1>}, {transform_indices = @transform_6, window_bounds = array<i64: 1, 2, 1>}]} {
    %c0 = arith.constant 0 : index
    %c0_0 = arith.constant 0 : index
    %c0_1 = arith.constant 0 : index
    %0 = vector.load %arg1[%c0, %c0_0, %c0_1] : memref<1x16x16xf32, #tpu.memory_space<vmem>>, vector<1x16x16xf32>
    %1 = vector.shape_cast %0 : vector<1x16x16xf32> to vector<16x16xf32>
    %c0_2 = arith.constant 0 : index
    %c0_3 = arith.constant 0 : index
    %2 = vector.load %arg2[%c0_2, %c0_3] : memref<1x16xf32, #tpu.memory_space<vmem>>, vector<1x16xf32>
    %3 = vector.broadcast %2 : vector<1x16xf32> to vector<16x16xf32>
    %4 = arith.mulf %1, %3 : vector<16x16xf32>
    %c0_4 = arith.constant 0 : index
    %c0_5 = arith.constant 0 : index
    %5 = vector.load %arg3[%c0_4, %c0_5] : memref<1x16xf32, #tpu.memory_space<vmem>>, vector<1x16xf32>
    %6 = vector.broadcast %5 : vector<1x16xf32> to vector<16x16xf32>
    %7 = arith.addf %4, %6 : vector<16x16xf32>
    %8 = vector.extract_strided_slice %7 {offsets = [0, 0], sizes = [1, 16], strides = [1, 1]} : vector<16x16xf32> to vector<1x16xf32>
    %9 = vector.extract_strided_slice %7 {offsets = [0, 0], sizes = [15, 16], strides = [1, 1]} : vector<16x16xf32> to vector<15x16xf32>
    %10 = tpu.concatenate %8, %9 in 0 : vector<1x16xf32>, vector<15x16xf32> -> vector<16x16xf32>
    %11 = vector.extract_strided_slice %7 {offsets = [1, 0], sizes = [15, 16], strides = [1, 1]} : vector<16x16xf32> to vector<15x16xf32>
    %12 = vector.extract_strided_slice %7 {offsets = [15, 0], sizes = [1, 16], strides = [1, 1]} : vector<16x16xf32> to vector<1x16xf32>
    %13 = tpu.concatenate %11, %12 in 0 : vector<15x16xf32>, vector<1x16xf32> -> vector<16x16xf32>
    %c0_6 = arith.constant 0 : index
    %c0_7 = arith.constant 0 : index
    %c0_8 = arith.constant 0 : index
    %14 = vector.load %arg4[%c0_6, %c0_7, %c0_8] : memref<3x16x1xf32, #tpu.memory_space<vmem>>, vector<1x16x1xf32>
    %15 = vector.shape_cast %14 : vector<1x16x1xf32> to vector<16x1xf32>
    %cst = arith.constant dense<0.000000e+00> : vector<16x1xf32>
    %16 = tpu.matmul %10, %15, %cst {dimension_numbers = #tpu.dot_dimension_numbers<[1], [0], [0], [1], [0, 0, 1, 1], [], []>} : vector<16x16xf32>, vector<16x1xf32>, vector<16x1xf32> -> vector<16x1xf32>
    %c1 = arith.constant 1 : index
    %c0_9 = arith.constant 0 : index
    %c0_10 = arith.constant 0 : index
    %17 = vector.load %arg4[%c1, %c0_9, %c0_10] : memref<3x16x1xf32, #tpu.memory_space<vmem>>, vector<1x16x1xf32>
    %18 = vector.shape_cast %17 : vector<1x16x1xf32> to vector<16x1xf32>
    %cst_11 = arith.constant dense<0.000000e+00> : vector<16x1xf32>
    %19 = tpu.matmul %7, %18, %cst_11 {dimension_numbers = #tpu.dot_dimension_numbers<[1], [0], [0], [1], [0, 0, 1, 1], [], []>} : vector<16x16xf32>, vector<16x1xf32>, vector<16x1xf32> -> vector<16x1xf32>
    %20 = arith.addf %16, %19 : vector<16x1xf32>
    %c2 = arith.constant 2 : index
    %c0_12 = arith.constant 0 : index
    %c0_13 = arith.constant 0 : index
    %21 = vector.load %arg4[%c2, %c0_12, %c0_13] : memref<3x16x1xf32, #tpu.memory_space<vmem>>, vector<1x16x1xf32>
    %22 = vector.shape_cast %21 : vector<1x16x1xf32> to vector<16x1xf32>
    %cst_14 = arith.constant dense<0.000000e+00> : vector<16x1xf32>
    %23 = tpu.matmul %13, %22, %cst_14 {dimension_numbers = #tpu.dot_dimension_numbers<[1], [0], [0], [1], [0, 0, 1, 1], [], []>} : vector<16x16xf32>, vector<16x1xf32>, vector<16x1xf32> -> vector<16x1xf32>
    %24 = arith.addf %20, %23 : vector<16x1xf32>
    %c0_15 = arith.constant 0 : index
    %c0_16 = arith.constant 0 : index
    %25 = vector.load %arg5[%c0_15, %c0_16] : memref<1x1xf32, #tpu.memory_space<vmem>>, vector<1x1xf32>
    %26 = vector.broadcast %25 : vector<1x1xf32> to vector<16x1xf32>
    %27 = arith.addf %24, %26 : vector<16x1xf32>
    %cst_17 = arith.constant 0.000000e+00 : f32
    %28 = vector.broadcast %cst_17 : f32 to vector<16x1xf32>
    %29 = arith.maximumf %27, %28 : vector<16x1xf32>
    %c0_18 = arith.constant 0 : index
    %c0_19 = arith.constant 0 : index
    %c0_20 = arith.constant 0 : index
    %30 = vector.load %arg6[%c0_18, %c0_19, %c0_20] : memref<1x16x1xf32, #tpu.memory_space<vmem>>, vector<1x16x1xf32>
    %31 = vector.shape_cast %30 : vector<1x16x1xf32> to vector<16x1xf32>
    %32 = vector.shape_cast %29 : vector<16x1xf32> to vector<1x16x1xf32>
    tpu.vector_store %arg6[%c0_18, %c0_19, %c0_20], %32 {strides = array<i32>} : memref<1x16x1xf32, #tpu.memory_space<vmem>>, vector<1x16x1xf32>,
    %cst_21 = arith.constant dense<0.000000e+00> : vector<1xf32>
    %33 = vector.multi_reduction <add>, %29, %cst_21 [0] : vector<16x1xf32> to vector<1xf32>
    %34 = vector.shape_cast %33 : vector<1xf32> to vector<1x1xf32>
    %35 = arith.mulf %29, %29 : vector<16x1xf32>
    %cst_22 = arith.constant dense<0.000000e+00> : vector<1xf32>
    %36 = vector.multi_reduction <add>, %35, %cst_22 [0] : vector<16x1xf32> to vector<1xf32>
    %37 = vector.shape_cast %36 : vector<1xf32> to vector<1x1xf32>
    %38 = tpu.concatenate %34, %37 in 0 : vector<1x1xf32>, vector<1x1xf32> -> vector<2x1xf32>
    %c0_23 = arith.constant 0 : index
    %c0_24 = arith.constant 0 : index
    %c0_25 = arith.constant 0 : index
    %39 = vector.load %arg7[%c0_23, %c0_24, %c0_25] : memref<1x2x1xf32, #tpu.memory_space<vmem>>, vector<1x2x1xf32>
    %40 = vector.shape_cast %39 : vector<1x2x1xf32> to vector<2x1xf32>
    %41 = vector.shape_cast %38 : vector<2x1xf32> to vector<1x2x1xf32>
    tpu.vector_store %arg7[%c0_23, %c0_24, %c0_25], %41 {strides = array<i32>} : memref<1x2x1xf32, #tpu.memory_space<vmem>>, vector<1x2x1xf32>,
    return
  }
  func.func @transform_0(%arg0: i32) -> (i32, i32, i32) {
    %c0_i32 = arith.constant 0 : i32
    %c0_i32_0 = arith.constant 0 : i32
    %c0_i32_1 = arith.constant 0 : i32
    return %arg0, %c0_i32, %c0_i32_0 : i32, i32, i32
  }
  func.func @transform_1(%arg0: i32) -> (i32, i32) {
    %c0_i32 = arith.constant 0 : i32
    %c0_i32_0 = arith.constant 0 : i32
    %c0_i32_1 = arith.constant 0 : i32
    return %c0_i32, %c0_i32_0 : i32, i32
  }
  func.func @transform_2(%arg0: i32) -> (i32, i32) {
    %c0_i32 = arith.constant 0 : i32
    %c0_i32_0 = arith.constant 0 : i32
    %c0_i32_1 = arith.constant 0 : i32
    return %c0_i32, %c0_i32_0 : i32, i32
  }
  func.func @transform_3(%arg0: i32) -> (i32, i32, i32) {
    %c0_i32 = arith.constant 0 : i32
    %c0_i32_0 = arith.constant 0 : i32
    %c0_i32_1 = arith.constant 0 : i32
    %c0_i32_2 = arith.constant 0 : i32
    return %c0_i32, %c0_i32_0, %c0_i32_1 : i32, i32, i32
  }
  func.func @transform_4(%arg0: i32) -> (i32, i32) {
    %c0_i32 = arith.constant 0 : i32
    %c0_i32_0 = arith.constant 0 : i32
    %c0_i32_1 = arith.constant 0 : i32
    return %c0_i32, %c0_i32_0 : i32, i32
  }
  func.func @transform_5(%arg0: i32) -> (i32, i32, i32) {
    %c0_i32 = arith.constant 0 : i32
    %c0_i32_0 = arith.constant 0 : i32
    %c0_i32_1 = arith.constant 0 : i32
    return %arg0, %c0_i32, %c0_i32_0 : i32, i32, i32
  }
  func.func @transform_6(%arg0: i32) -> (i32, i32, i32) {
    %c0_i32 = arith.constant 0 : i32
    %c0_i32_0 = arith.constant 0 : i32
    %c0_i32_1 = arith.constant 0 : i32
    return %arg0, %c0_i32, %c0_i32_0 : i32, i32, i32
  }
}

module attributes {stable_mosaic.version = 11 : i64} {
  func.func @_predict_kernel(%arg0: i32, %arg1: memref<1x16x1xf32, #tpu.memory_space<vmem>>, %arg2: memref<1x1xf32, #tpu.memory_space<vmem>>, %arg3: memref<1x1xf32, #tpu.memory_space<vmem>>, %arg4: memref<16x16xf32, #tpu.memory_space<vmem>>, %arg5: memref<1x16xf32, #tpu.memory_space<vmem>>, %arg6: memref<1x1x16xf32, #tpu.memory_space<vmem>>) attributes {dimension_semantics = [#tpu.dimension_semantics<parallel>], iteration_bounds = array<i64: 2>, scalar_prefetch = 0 : i64, scratch_operands = 0 : i64, tpu.core_type = #tpu.core_type<tc>, window_params = [{transform_indices = @transform_0, window_bounds = array<i64: 1, 16, 1>}, {pipeline_mode = #tpu.pipeline_mode<synchronous>, transform_indices = @transform_1, window_bounds = array<i64: 1, 1>}, {pipeline_mode = #tpu.pipeline_mode<synchronous>, transform_indices = @transform_2, window_bounds = array<i64: 1, 1>}, {pipeline_mode = #tpu.pipeline_mode<synchronous>, transform_indices = @transform_3, window_bounds = array<i64: 16, 16>}, {pipeline_mode = #tpu.pipeline_mode<synchronous>, transform_indices = @transform_4, window_bounds = array<i64: 1, 16>}, {transform_indices = @transform_5, window_bounds = array<i64: 1, 1, 16>}]} {
    %c0 = arith.constant 0 : index
    %c0_0 = arith.constant 0 : index
    %c0_1 = arith.constant 0 : index
    %0 = vector.load %arg1[%c0, %c0_0, %c0_1] : memref<1x16x1xf32, #tpu.memory_space<vmem>>, vector<1x16x1xf32>
    %1 = vector.shape_cast %0 : vector<1x16x1xf32> to vector<16x1xf32>
    %c0_2 = arith.constant 0 : index
    %c0_3 = arith.constant 0 : index
    %2 = vector.load %arg2[%c0_2, %c0_3] : memref<1x1xf32, #tpu.memory_space<vmem>>, vector<1x1xf32>
    %3 = vector.broadcast %2 : vector<1x1xf32> to vector<16x1xf32>
    %4 = arith.mulf %1, %3 : vector<16x1xf32>
    %c0_4 = arith.constant 0 : index
    %c0_5 = arith.constant 0 : index
    %5 = vector.load %arg3[%c0_4, %c0_5] : memref<1x1xf32, #tpu.memory_space<vmem>>, vector<1x1xf32>
    %6 = vector.broadcast %5 : vector<1x1xf32> to vector<16x1xf32>
    %7 = arith.addf %4, %6 : vector<16x1xf32>
    %c0_6 = arith.constant 0 : index
    %c0_7 = arith.constant 0 : index
    %8 = vector.load %arg4[%c0_6, %c0_7] : memref<16x16xf32, #tpu.memory_space<vmem>>, vector<16x16xf32>
    %9 = vector.broadcast %7 : vector<16x1xf32> to vector<16x16xf32>
    %10 = arith.mulf %9, %8 : vector<16x16xf32>
    %cst = arith.constant dense<0.000000e+00> : vector<16xf32>
    %11 = vector.multi_reduction <add>, %10, %cst [0] : vector<16x16xf32> to vector<16xf32>
    %12 = vector.shape_cast %11 : vector<16xf32> to vector<1x16xf32>
    %c0_8 = arith.constant 0 : index
    %c0_9 = arith.constant 0 : index
    %13 = vector.load %arg5[%c0_8, %c0_9] : memref<1x16xf32, #tpu.memory_space<vmem>>, vector<1x16xf32>
    %14 = arith.addf %12, %13 : vector<1x16xf32>
    %c0_10 = arith.constant 0 : index
    %c0_11 = arith.constant 0 : index
    %c0_12 = arith.constant 0 : index
    %15 = vector.load %arg6[%c0_10, %c0_11, %c0_12] : memref<1x1x16xf32, #tpu.memory_space<vmem>>, vector<1x1x16xf32>
    %16 = vector.shape_cast %15 : vector<1x1x16xf32> to vector<1x16xf32>
    %17 = vector.shape_cast %14 : vector<1x16xf32> to vector<1x1x16xf32>
    tpu.vector_store %arg6[%c0_10, %c0_11, %c0_12], %17 {strides = array<i32>} : memref<1x1x16xf32, #tpu.memory_space<vmem>>, vector<1x1x16xf32>,
    return
  }
  func.func @transform_0(%arg0: i32) -> (i32, i32, i32) {
    %c0_i32 = arith.constant 0 : i32
    %c0_i32_0 = arith.constant 0 : i32
    %c0_i32_1 = arith.constant 0 : i32
    return %arg0, %c0_i32, %c0_i32_0 : i32, i32, i32
  }
  func.func @transform_1(%arg0: i32) -> (i32, i32) {
    %c0_i32 = arith.constant 0 : i32
    %c0_i32_0 = arith.constant 0 : i32
    %c0_i32_1 = arith.constant 0 : i32
    return %c0_i32, %c0_i32_0 : i32, i32
  }
  func.func @transform_2(%arg0: i32) -> (i32, i32) {
    %c0_i32 = arith.constant 0 : i32
    %c0_i32_0 = arith.constant 0 : i32
    %c0_i32_1 = arith.constant 0 : i32
    return %c0_i32, %c0_i32_0 : i32, i32
  }
  func.func @transform_3(%arg0: i32) -> (i32, i32) {
    %c0_i32 = arith.constant 0 : i32
    %c0_i32_0 = arith.constant 0 : i32
    %c0_i32_1 = arith.constant 0 : i32
    return %c0_i32, %c0_i32_0 : i32, i32
  }
  func.func @transform_4(%arg0: i32) -> (i32, i32) {
    %c0_i32 = arith.constant 0 : i32
    %c0_i32_0 = arith.constant 0 : i32
    %c0_i32_1 = arith.constant 0 : i32
    return %c0_i32, %c0_i32_0 : i32, i32
  }
  func.func @transform_5(%arg0: i32) -> (i32, i32, i32) {
    %c0_i32 = arith.constant 0 : i32
    %c0_i32_0 = arith.constant 0 : i32
    %c0_i32_1 = arith.constant 0 : i32
    return %arg0, %c0_i32, %c0_i32_0 : i32, i32, i32
  }
}

</mosaic_0001>

<bundles_post_ra>
// kernel: tstransformer_forward.8
= control target key start
LH: loop header
LB: loop body
LE: loop exit
PB: predicated region body
PF: predicated region fallthrough
CT: control target
= control target key end

     0   :  { %s642_s15 = smov 0   ;;  %s696_s0 = inlined_call_operand.vmem [shape: f32[2,16,4], index: 0, kind: input, shape index: {}]   ;;  %s697_s1 = inlined_call_operand.vmem [shape: f32[3,4,32], index: 1, kind: input, shape index: {}]   ;;  %s698_s2 = inlined_call_operand.vmem [shape: f32[1,32], index: 2, kind: input, shape index: {}]   ;;  %s699_s3 = inlined_call_operand.vmem [shape: f32[16,32], index: 3, kind: input, shape index: {}]   ;;  %s700_s4 = inlined_call_operand.vmem [shape: f32[2,16,32], index: 4, kind: output, shape index: {}]  }
   0x1 LB: > { %s546_s16 = sadd.s32 4294967295, %s615_s15   ;;  %p550_p0 = scmp.ge.s32.totalorder %s615_s15, 1  ;;  %s615_s15 = sphi %s642_s15, %s14_s15  }
   0x2   : > { %p162_p1 = scmp.lt.s32.totalorder %s615_s15, 3 }
   0x4   : > { %p163_p2 = pnand %p550_p0, %p162_p1 }
   0x5   : > { %vm227_vm0 = vcmask (!%p163_p2), 1043456   ;;  %v559_v0 = vld [vmem:[%s697_s1 + $0x4] sm:$0xf] (!%p163_p2)  ;;  %p188_p3 = scmp.lt.s32.totalorder (!%p163_p2), %s546_s16, 1  ;;  %v563_v1 = vld [vmem:[%s697_s1 + $0x8] sm:$0xf] (!%p163_p2) }
   0x6   : > { %166 = sbr.rel (%p163_p2) target bundleno = 242 (0xf2), region = 36  ;;  %585 = vmatprep.subr.msk.mxu0 (!%p163_p2), %vm227_vm0, %v559_v0  ;;  %v220_v2 = vld [vmem:[%s697_s1] sm:$0xf] (!%p163_p2)  ;;  %vm221_vm1 = vcmask (!%p163_p2), 31744   ;;  %vm215_vm2 = vcmask (!%p163_p2), 1040384   ;;  %vm394_vm3 = vcmask (!%p163_p2), 1046528  }
   0x7   : > { %586 = vmatpush3.msk.msra.mxu0 (!%p163_p2), %vm227_vm0, %v559_v0  ;;  %580 = vmatprep.subr.msk.mxu1 (!%p163_p2), %vm227_vm0, %v220_v2  ;;  %v555_v13 = vld [vmem:[%s698_s2] ss:$0 sm:$0xff] (!%p163_p2)  ;;  %v202_v14 = vld [vmem:[%s699_s3 + $0x8] sm:$0xff] (!%p163_p2)  ;;  %vm488_vm4 = vcmask (!%p163_p2), 261120  }
   0x8   : > { %590 = vmatprep.subr.msk.mxu0 (!%p163_p2), %vm227_vm0, %v563_v1  ;;  %581 = vmatpush3.msk.msra.mxu1 (!%p163_p2), %vm227_vm0, %v220_v2  ;;  %v201_v15 = vld [vmem:[%s699_s3] sm:$0xff] (!%p163_p2)  ;;  %v210_v16 = vadd.f32 (!%p163_p2), %v555_v13, %v202_v14 }
   0x9   : > { %v209_v17 = vadd.f32 (!%p163_p2), %v555_v13, %v201_v15 }
   0xd   : > { %s702_s16 = smov (!%p188_p3, %s546_s16), 1 }
   0xe   : > { %s569_s23 = sshll.u32 %s702_s16, 4 }
   0xf   : > { %s192_s26 = scalar_lea.vmem %s696_s0, %s569_s23  ;;  %s197_s9 = scalar_lea.vmem %s700_s4, %s569_s23 }
  0x10   : > { %v198_v3 = vld [vmem:[%s192_s26] sm:$0xff]  ;;  %v199_v4 = vld [vmem:[%s192_s26 + $0x8] sm:$0xff] }
  0x11   : > { %v216_v5 = vrot.slane %v198_v3, 7  ;;  %587 = vmatprep.mubr.msk.f32.mxu0 %vm221_vm1, %v198_v3  ;;  %v395_v6 = vrot.slane %v198_v3, 1  ;;  %v396_v7 = vrot.slane %v199_v4, 1  ;;  %v212_v8 = vrot.slane %v199_v4, 7 }
  0x12   : > { %588 = vmatmul.mubr.msk.f32.vlgmr.msra.gmra.mrb[0].mxu0 %vm221_vm1, %v199_v4 }
  0x13   : > { %591 = vmatpush3.msk.msra.mxu0 %vm227_vm0, %v563_v1  ;;  %v219_v9 = vsel %vm215_vm2, %v212_v8, %v216_v5  ;;  %v217_v10 = vsel %vm215_vm2, %v216_v5, %v212_v8  ;;  %v397_v11 = vsel %vm394_vm3, %v395_v6, %v396_v7  ;;  %v400_v12 = vsel %vm394_vm3, %v396_v7, %v395_v6 }
  0x14   : > { %582 = vmatprep.mubr.msk.f32.mxu1 %vm221_vm1, %v219_v9  ;;  %592 = vmatprep.mubr.msk.f32.mxu0 %vm221_vm1, %v397_v11 }
  0x15   : > { %583 = vmatmul.mubr.msk.f32.vlgmr.msra.gmra.mrb[0].mxu1 %vm221_vm1, %v217_v10 }
  0x1a   : > { %593 = vmatmul.mubr.msk.f32.vlgmr.msra.gmra.mrb[0].mxu0 %vm221_vm1, %v400_v12 }
  0xe8   : > { %v584_v18 = vpop.f32.mrb[0].mxu1 }
  0xe9   : > { %v297_v19 = vpop.f32.mrb[1].mxu1  ;;  %v307_v20 = vadd.f32 %v584_v18, %v210_v16 }
  0xea   : > { %v306_v21 = vadd.f32 %v297_v19, %v209_v17 }
  0xed   : > { %v594_v22 = vpop.f32.mrb[0].mxu0 }
  0xee   : > { %v596_v23 = vadd.f32 %v594_v22, %v307_v20  ;;  %v477_v24 = vpop.f32.mrb[1].mxu0 }
  0xef   : > { %v598_v25 = vadd.f32 %v477_v24, %v306_v21 }
  0xf0   : > { %490 = vst.msk [vmem:[%s197_s9 + $0x8] sm:$0xff] %vm488_vm4, %v596_v23 }
  0xf1   : > { %489 = vst.msk [vmem:[%s197_s9] sm:$0xff] %vm488_vm4, %v598_v25 }
  0xf2 PF: > { %s14_s15 = sadd.s32 1, %s615_s15  }
  0xf3   : > { %p11_p4 = scmp.ge.s32.totalorder %s14_s15, 4  }
  0xf5   :  { %13 = sbr.rel (!%p11_p4) target bundleno = 1 (0x1), region = 68 }

// kernel: tstransformer_forward.10
= control target key start
LH: loop header
LB: loop body
LE: loop exit
PB: predicated region body
PF: predicated region fallthrough
CT: control target
= control target key end

     0   :  { %s835_s27 = smov 0   ;;  %s943_s0 = inlined_call_operand.vmem [shape: f32[2,16,32], index: 0, kind: input, shape index: {}]   ;;  %s944_s1 = inlined_call_operand.vmem [shape: f32[1,32], index: 1, kind: input, shape index: {}]   ;;  %s945_s2 = inlined_call_operand.vmem [shape: f32[1,32], index: 2, kind: input, shape index: {}]   ;;  %s946_s3 = inlined_call_operand.vmem [shape: f32[32,128], index: 3, kind: input, shape index: {}]   ;;  %s947_s4 = inlined_call_operand.vmem [shape: f32[1,128], index: 4, kind: input, shape index: {}]   ;;  %s948_s5 = inlined_call_operand.vmem [shape: f32[128,32], index: 5, kind: input, shape index: {}]   ;;  %s949_s6 = inlined_call_operand.vmem [shape: f32[1,32], index: 6, kind: input, shape index: {}]   ;;  %s950_s7 = inlined_call_operand.vmem [shape: f32[2,16,32], index: 7, kind: output, shape index: {0}]   ;;  %s951_s8 = inlined_call_operand.vmem [shape: f32[2,2,32], index: 8, kind: output, shape index: {1}]  }
   0x1 LB: > { %s644_s28 = sadd.s32 4294967295, %s788_s27   ;;  %p648_p0 = scmp.ge.s32.totalorder %s788_s27, 1  ;;  %s788_s27 = sphi %s835_s27, %s19_s27  }
   0x2   : > { %p265_p1 = scmp.lt.s32.totalorder %s788_s27, 3 }
   0x4   : > { %p266_p2 = pnand %p648_p0, %p265_p1 }
   0x5   : > { %v337_v0 = vld [vmem:[%s946_s3] sm:$0xff] (!%p266_p2)  ;;  %v338_v1 = vld [vmem:[%s946_s3 + $0x8] sm:$0xff] (!%p266_p2)  ;;  %v339_v2 = vld [vmem:[%s946_s3 + $0x10] sm:$0xff] (!%p266_p2)  ;;  %p303_p3 = scmp.lt.s32.totalorder (!%p266_p2), %s644_s28, 1  ;;  %vm348_vm0 = vcmask (!%p266_p2), 261120   ;;  %vm554_vm1 = vcmask (!%p266_p2), 1040384  }
   0x6   : > { %269 = sbr.rel (%p266_p2) target bundleno = 476 (0x1dc), region = 48  ;;  %v734_v3 = vpack.c.bf16 (!%p266_p2), %v338_v1, %v337_v0  ;;  %v340_v4 = vld [vmem:[%s946_s3 + $0x18] sm:$0xff] (!%p266_p2)  ;;  %v432_v6 = vld [vmem:[%s948_s5] sm:$0xff] (!%p266_p2)  ;;  %v433_v7 = vld [vmem:[%s948_s5 + $0x8] sm:$0xff] (!%p266_p2)  ;;  %vm556_vm2 = vcmask (!%p266_p2), 254976  }
   0x7   : > { %v738_v5 = vpack.c.bf16 (!%p266_p2), %v340_v4, %v339_v2  ;;  %v434_v8 = vld [vmem:[%s948_s5 + $0x10] sm:$0xff] (!%p266_p2)  ;;  %v742_v9 = vpack.c.bf16 (!%p266_p2), %v433_v7, %v432_v6  ;;  %v435_v10 = vld [vmem:[%s948_s5 + $0x18] sm:$0xff] (!%p266_p2)  ;;  %v654_v11 = vld [vmem:[%s944_s1] ss:$0 sm:$0xff] (!%p266_p2) }
   0x8   : > { %735 = vmatprep.subr.bf16.mxu0 (!%p266_p2), %v734_v3  ;;  %v746_v12 = vpack.c.bf16 (!%p266_p2), %v435_v10, %v434_v8  ;;  %v436_v13 = vld [vmem:[%s948_s5 + $0x20] sm:$0xff] (!%p266_p2)  ;;  %v437_v14 = vld [vmem:[%s948_s5 + $0x28] sm:$0xff] (!%p266_p2)  ;;  %v438_v21 = vld [vmem:[%s948_s5 + $0x30] sm:$0xff] (!%p266_p2) }
   0x9   : > { %737 = vmatpush3.bf16.msra.mxu0 (!%p266_p2), %v734_v3  ;;  %743 = vmatprep.subr.bf16.mxu1 (!%p266_p2), %v742_v9  ;;  %v655_v17 = vld [vmem:[%s945_s2] ss:$0 sm:$0xff] (!%p266_p2)  ;;  %v750_v20 = vpack.c.bf16 (!%p266_p2), %v437_v14, %v436_v13  ;;  %v439_v22 = vld [vmem:[%s948_s5 + $0x38] sm:$0xff] (!%p266_p2)  ;;  %v441_v27 = vld [vmem:[%s948_s5 + $0x48] sm:$0xff] (!%p266_p2) }
   0xa   : > { %739 = vmatprep.subr.bf16.mxu0 (!%p266_p2), %v738_v5  ;;  %745 = vmatpush3.bf16.msra.mxu1 (!%p266_p2), %v742_v9  ;;  %v754_v25 = vpack.c.bf16 (!%p266_p2), %v439_v22, %v438_v21  ;;  %v440_v26 = vld [vmem:[%s948_s5 + $0x40] sm:$0xff] (!%p266_p2)  ;;  %v442_v29 = vld [vmem:[%s948_s5 + $0x50] sm:$0xff] (!%p266_p2)  ;;  %v443_v30 = vld [vmem:[%s948_s5 + $0x58] sm:$0xff] (!%p266_p2) }
   0xb   : > { %747 = vmatprep.subr.bf16.mxu1 (!%p266_p2), %v746_v12  ;;  %v758_v28 = vpack.c.bf16 (!%p266_p2), %v441_v27, %v440_v26  ;;  %v762_v31 = vpack.c.bf16 (!%p266_p2), %v443_v30, %v442_v29  ;;  %v444_v32 = vld [vmem:[%s948_s5 + $0x60] sm:$0xff] (!%p266_p2)  ;;  %v445_v33 = vld [vmem:[%s948_s5 + $0x68] sm:$0xff] (!%p266_p2)  ;;  %v446_v35 = vld [vmem:[%s948_s5 + $0x70] sm:$0xff] (!%p266_p2) }
   0xc   : > { %v766_v34 = vpack.c.bf16 (!%p266_p2), %v445_v33, %v444_v32  ;;  %v447_v36 = vld [vmem:[%s948_s5 + $0x78] sm:$0xff] (!%p266_p2)  ;;  %v656_v38 = vld [vmem:[%s947_s4] ss:$0 sm:$0xff] (!%p266_p2) }
   0xd   : > { %s953_s28 = smov (!%p303_p3, %s644_s28), 1  ;;  %741 = vmatpush3.bf16.msra.mxu0 %v738_v5  ;;  %v770_v37 = vpack.c.bf16 %v447_v36, %v446_v35  ;;  %v659_v45 = vld [vmem:[%s949_s6] ss:$0 sm:$0xff] }
   0xe   : > { %s662_s23 = sshll.u32 %s953_s28, 4  ;;  %749 = vmatpush3.bf16.msra.mxu1 %v746_v12 }
   0xf   : > { %s307_s12 = scalar_lea.vmem %s943_s0, %s662_s23  ;;  %751 = vmatprep.subr.bf16.mxu1 %v750_v20  ;;  %s312_s22 = scalar_lea.vmem %s950_s7, %s662_s23 }
  0x10   : > { %v317_v15 = vld [vmem:[%s307_s12] sm:$0xff]  ;;  %v318_v16 = vld [vmem:[%s307_s12 + $0x8] sm:$0xff]  ;;  %s653_s23 = sshll.u32 %s953_s28, 1 }
  0x11   : > { %v326_v18 = vmul.f32 %v654_v11, %v317_v15  ;;  %v327_v19 = vmul.f32 %v654_v11, %v318_v16  ;;  %s316_s26 = scalar_lea.vmem %s951_s8, %s653_s23 }
  0x12   : > { %753 = vmatpush3.bf16.msra.mxu1 %v750_v20 }
  0x13   : > { %v335_v23 = vadd.f32 %v655_v17, %v326_v18  ;;  %v336_v24 = vadd.f32 %v655_v17, %v327_v19  ;;  %755 = vmatprep.subr.bf16.mxu1 %v754_v25 }
  0x15   : > { %696 = vmatprep.mubr.msk.f32.mxu0 %vm348_vm0, %v335_v23 }
  0x16   : > { %697 = vmatmul.mubr.msk.f32.vlgmr.msra.gmra.mrb[0].mxu0 %vm348_vm0, %v336_v24  ;;  %757 = vmatpush3.bf16.msra.mxu1 %v754_v25 }
  0x17   : > { %759 = vmatprep.subr.bf16.mxu1 %v758_v28 }
  0x1a   : > { %761 = vmatpush3.bf16.msra.mxu1 %v758_v28 }
  0x1b   : > { %763 = vmatprep.subr.bf16.mxu1 %v762_v31 }
  0x1e   : > { %765 = vmatpush3.bf16.msra.mxu1 %v762_v31 }
  0x1f   : > { %767 = vmatprep.subr.bf16.mxu1 %v766_v34 }
  0x22   : > { %769 = vmatpush3.bf16.msra.mxu1 %v766_v34 }
  0x23   : > { %771 = vmatprep.subr.bf16.mxu1 %v770_v37 }
  0x26   : > { %773 = vmatpush3.bf16.msra.mxu1 %v770_v37 }
  0xe9   : > { %v698_v39 = vpop.f32.mrb[0].mxu0 }
  0xea   : > { %v427_v40 = vadd.f32 %v698_v39, %v656_v38  ;;  %v421_v41 = vpop.f32.mrb[1].mxu0 }
  0xeb   : > { %v422_v42 = vadd.f32 %v656_v38, %v421_v41 }
  0xec   : > { %v431_v44 = vmax.f32 %v427_v40, 0.0 }
  0xed   : > { %v430_v43 = vmax.f32 %v422_v42, 0.0 }
  0xef   : > { %731 = vmatprep.mubr.f32.mxu1 %v430_v43 }
  0xf0   : > { %732 = vmatmul.mubr.f32.vlgmr.msra.gmra.mrb[0].mxu1 %v431_v44 }
 0x1c3   : > { %v733_v46 = vpop.f32.mrb[0].mxu1 }
 0x1c4   : > { %v527_v47 = vadd.f32 %v733_v46, %v659_v45  ;;  %v521_v48 = vpop.f32.mrb[1].mxu1 }
 0x1c5   : > { %v522_v49 = vadd.f32 %v659_v45, %v521_v48 }
 0x1c6   : > { %v531_v50 = vadd.f32 %v527_v47, %v336_v24 }
 0x1c7   : > { %v530_v51 = vadd.f32 %v522_v49, %v335_v23 }
 0x1c8   : > { %533 = vst.msk [vmem:[%s312_s22 + $0x8] sm:$0xff] %vm348_vm0, %v531_v50  ;;  %v535_v52 = vsel %vm348_vm0, %v531_v50, 0.0  ;;  %v544_v53 = vmul.f32 %v531_v50, %v531_v50 }
 0x1c9   : > { %532 = vst.msk [vmem:[%s312_s22] sm:$0xff] %vm348_vm0, %v530_v51  ;;  %v534_v54 = vsel %vm348_vm0, %v530_v51, 0.0  ;;  %v543_v55 = vmul.f32 %v530_v51, %v530_v51 }
 0x1ca   : > { %v546_v56 = vsel %vm348_vm0, %v544_v53, 0.0  ;;  %v536_v57 = vadd.f32 %v535_v52, %v534_v54 }
 0x1cb   : > { %v545_v58 = vsel %vm348_vm0, %v543_v55, 0.0 }
 0x1cc   : > { %v537_v59 = vrot.slane %v536_v57, 4  ;;  %v547_v60 = vadd.f32 %v546_v56, %v545_v58 }
 0x1ce   : > { %v538_v61 = vadd.f32 %v537_v59, %v536_v57  ;;  %v548_v62 = vrot.slane %v547_v60, 4 }
 0x1d0   : > { %v539_v63 = vrot.slane %v538_v61, 2  ;;  %v549_v0 = vadd.f32 %v548_v62, %v547_v60 }
 0x1d2   : > { %v540_v1 = vadd.f32 %v539_v63, %v538_v61  ;;  %v550_v2 = vrot.slane %v549_v0, 2 }
 0x1d4   : > { %v541_v3 = vrot.slane %v540_v1, 1  ;;  %v551_v4 = vadd.f32 %v550_v2, %v549_v0 }
 0x1d6   : > { %v552_v5 = vrot.slane %v551_v4, 1  ;;  %v542_v6 = vadd.f32 %v541_v3, %v540_v1 }
 0x1d8   : > { %v553_v7 = vadd.f32 %v552_v5, %v551_v4 }
 0x1da   : > { %v555_v8 = vsel %vm554_vm1, %v542_v6, %v553_v7 }
 0x1db   : > { %557 = vst.msk [vmem:[%s316_s26] sm:$0x3] %vm556_vm2, %v555_v8 }
 0x1dc PF: > { %s19_s27 = sadd.s32 1, %s788_s27  }
 0x1dd   : > { %p16_p4 = scmp.ge.s32.totalorder %s19_s27, 4  }
 0x1df   :  { %18 = sbr.rel (!%p16_p4) target bundleno = 1 (0x1), region = 90 }

// kernel: tstransformer_forward.13
= control target key start
LH: loop header
LB: loop body
LE: loop exit
PB: predicated region body
PF: predicated region fallthrough
CT: control target
= control target key end

     0   :  { %s837_s21 = smov 0   ;;  %s921_s0 = inlined_call_operand.vmem [shape: f32[2,16,32], index: 0, kind: input, shape index: {}]   ;;  %s922_s1 = inlined_call_operand.vmem [shape: f32[1,32], index: 1, kind: input, shape index: {}]   ;;  %s923_s2 = inlined_call_operand.vmem [shape: f32[1,32], index: 2, kind: input, shape index: {}]   ;;  %s924_s3 = inlined_call_operand.vmem [shape: f32[3,32,16], index: 3, kind: input, shape index: {}]   ;;  %s925_s4 = inlined_call_operand.vmem [shape: f32[1,16], index: 4, kind: input, shape index: {}]   ;;  %s926_s5 = inlined_call_operand.vmem [shape: f32[2,16,16], index: 5, kind: output, shape index: {0}]   ;;  %s927_s6 = inlined_call_operand.vmem [shape: f32[2,2,16], index: 6, kind: output, shape index: {1}]  }
   0x1 LB: > { %s676_s22 = sadd.s32 4294967295, %s800_s21   ;;  %p680_p0 = scmp.ge.s32.totalorder %s800_s21, 1  ;;  %s800_s21 = sphi %s837_s21, %s17_s21  }
   0x2   : > { %p215_p1 = scmp.lt.s32.totalorder %s800_s21, 3 }
   0x4   : > { %p216_p2 = pnand %p680_p0, %p215_p1 }
   0x5   : > { %v297_v0 = vld [vmem:[%s924_s3] sm:$0xff] (!%p216_p2)  ;;  %v298_v1 = vld [vmem:[%s924_s3 + $0x8] sm:$0xff] (!%p216_p2)  ;;  %v299_v2 = vld [vmem:[%s924_s3 + $0x10] sm:$0xff] (!%p216_p2)  ;;  %p249_p3 = scmp.lt.s32.totalorder (!%p216_p2), %s676_s22, 1  ;;  %vm285_vm0 = vcmask (!%p216_p2), 1040384   ;;  %vm306_vm1 = vcmask (!%p216_p2), 261120  }
   0x6   : > { %219 = sbr.rel (%p216_p2) target bundleno = 271 (0x10f), region = 40  ;;  %v766_v3 = vpack.c.bf16 (!%p216_p2), %v298_v1, %v297_v0  ;;  %v300_v4 = vld [vmem:[%s924_s3 + $0x18] sm:$0xff] (!%p216_p2)  ;;  %v688_v5 = vld [vmem:[%s924_s3 + $0x20] sm:$0xff] (!%p216_p2)  ;;  %v689_v6 = vld [vmem:[%s924_s3 + $0x28] sm:$0xff] (!%p216_p2)  ;;  %vm291_vm2 = vcmask (!%p216_p2), 1046528   ;;  %vm564_vm3 = vcmask (!%p216_p2), 130048  }
   0x7   : > { %v770_v7 = vpack.c.bf16 (!%p216_p2), %v300_v4, %v299_v2  ;;  %v758_v8 = vpack.c.bf16 (!%p216_p2), %v689_v6, %v688_v5  ;;  %v696_v9 = vld [vmem:[%s924_s3 + $0x40] sm:$0xff] (!%p216_p2)  ;;  %v697_v10 = vld [vmem:[%s924_s3 + $0x48] sm:$0xff] (!%p216_p2)  ;;  %v690_v11 = vld [vmem:[%s924_s3 + $0x30] sm:$0xff] (!%p216_p2)  ;;  %vm588_vm4 = vcmask (!%p216_p2), 123904  }
   0x8   : > { %767 = vmatprep.subr.bf16.mxu0 (!%p216_p2), %v766_v3  ;;  %v691_v12 = vld [vmem:[%s924_s3 + $0x38] sm:$0xff] (!%p216_p2)  ;;  %v686_v13 = vld [vmem:[%s922_s1] ss:$0 sm:$0xff] (!%p216_p2)  ;;  %v774_v15 = vpack.c.bf16 (!%p216_p2), %v697_v10, %v696_v9  ;;  %v698_v23 = vld [vmem:[%s924_s3 + $0x50] sm:$0xff] (!%p216_p2) }
   0x9   : > { %769 = vmatpush3.bf16.msra.mxu0 (!%p216_p2), %v766_v3  ;;  %759 = vmatprep.subr.bf16.mxu1 (!%p216_p2), %v758_v8  ;;  %v762_v14 = vpack.c.bf16 (!%p216_p2), %v691_v12, %v690_v11  ;;  %v687_v18 = vld [vmem:[%s923_s2] ss:$0 sm:$0xff] (!%p216_p2)  ;;  %v699_v24 = vld [vmem:[%s924_s3 + $0x58] sm:$0xff] (!%p216_p2) }
   0xa   : > { %771 = vmatprep.subr.bf16.mxu0 (!%p216_p2), %v770_v7  ;;  %761 = vmatpush3.bf16.msra.mxu1 (!%p216_p2), %v758_v8  ;;  %v778_v31 = vpack.c.bf16 (!%p216_p2), %v699_v24, %v698_v23  ;;  %v702_v37 = vld [vmem:[%s925_s4] ss:$0 sm:$0xff] (!%p216_p2) }
   0xb   : > { %763 = vmatprep.subr.bf16.mxu1 (!%p216_p2), %v762_v14 }
   0xd   : > { %s929_s22 = smov (!%p249_p3, %s676_s22), 1  ;;  %773 = vmatpush3.bf16.msra.mxu0 %v770_v7 }
   0xe   : > { %s705_s19 = sshll.u32 %s929_s22, 4  ;;  %775 = vmatprep.subr.bf16.mxu0 %v774_v15  ;;  %765 = vmatpush3.bf16.msra.mxu1 %v762_v14  ;;  %s685_s14 = sshll.u32 %s929_s22, 1 }
   0xf   : > { %s253_s26 = scalar_lea.vmem %s921_s0, %s705_s19  ;;  %s258_s13 = scalar_lea.vmem %s926_s5, %s705_s19 }
  0x10   : > { %v263_v16 = vld [vmem:[%s253_s26] sm:$0xff]  ;;  %v264_v17 = vld [vmem:[%s253_s26 + $0x8] sm:$0xff]  ;;  %s262_s17 = scalar_lea.vmem %s927_s6, %s685_s14 }
  0x11   : > { %v272_v19 = vmul.f32 %v686_v13, %v263_v16  ;;  %v273_v20 = vmul.f32 %v686_v13, %v264_v17 }
  0x13   : > { %v281_v21 = vadd.f32 %v687_v18, %v272_v19  ;;  %v282_v22 = vadd.f32 %v687_v18, %v273_v20 }
  0x15   : > { %v286_v25 = vrot.slane %v281_v21, 7  ;;  %v287_v26 = vrot.slane %v282_v22, 7  ;;  %733 = vmatprep.mubr.msk.f32.mxu1 %vm306_vm1, %v281_v21  ;;  %v292_v27 = vrot.slane %v281_v21, 1  ;;  %v293_v28 = vrot.slane %v282_v22, 1 }
  0x16   : > { %734 = vmatmul.mubr.msk.f32.vlgmr.msra.gmra.mrb[0].mxu1 %vm306_vm1, %v282_v22 }
  0x17   : > { %v290_v29 = vsel %vm285_vm0, %v281_v21, %v286_v25  ;;  %v288_v30 = vsel %vm285_vm0, %v286_v25, %v287_v26  ;;  %v294_v32 = vsel %vm291_vm2, %v292_v27, %v293_v28  ;;  %v296_v33 = vsel %vm291_vm2, %v293_v28, %v282_v22 }
  0x18   : > { %744 = vmatprep.mubr.msk.f32.mxu0 %vm306_vm1, %v290_v29 }
  0x19   : > { %745 = vmatmul.mubr.msk.f32.vlgmr.msra.gmra.mrb[0].mxu0 %vm306_vm1, %v288_v30 }
  0x1a   : > { %777 = vmatpush3.bf16.msra.mxu0 %v774_v15  ;;  %755 = vmatprep.mubr.msk.f32.mxu0 %vm306_vm1, %v294_v32 }
  0x1b   : > { %779 = vmatprep.subr.bf16.mxu0 %v778_v31 }
  0x1e   : > { %781 = vmatpush3.bf16.msra.mxu0 %v778_v31 }
  0x21   : > { %756 = vmatmul.mubr.msk.f32.vlgmr.msra.gmra.mrb[0].mxu0 %vm306_vm1, %v296_v33 }
  0xe9   : > { %v735_v34 = vpop.f32.mrb[0].mxu1 }
  0xea   : > { %v377_v35 = vpop.f32.mrb[1].mxu1 }
  0xf4   : > { %v757_v36 = vpop.f32.mrb[0].mxu0 }
  0xf5   : > { %v782_v38 = vadd.f32 %v757_v36, %v735_v34  ;;  %v542_v39 = vpop.f32.mrb[1].mxu0 }
  0xf6   : > { %v783_v40 = vadd.f32 %v542_v39, %v377_v35 }
  0xf7   : > { %v561_v41 = vadd.f32 %v782_v38, %v702_v37 }
  0xf8   : > { %v560_v42 = vadd.f32 %v783_v40, %v702_v37 }
  0xf9   : > { %v563_v43 = vmax.f32 %v561_v41, 0.0 }
  0xfa   : > { %v562_v44 = vmax.f32 %v560_v42, 0.0 }
  0xfb   : > { %566 = vst.msk [vmem:[%s258_s13 + $0x8] sm:$0xff] %vm564_vm3, %v563_v43  ;;  %v568_v45 = vsel %vm564_vm3, %v563_v43, 0.0  ;;  %v577_v46 = vmul.f32 %v563_v43, %v563_v43 }
  0xfc   : > { %565 = vst.msk [vmem:[%s258_s13] sm:$0xff] %vm564_vm3, %v562_v44  ;;  %v567_v47 = vsel %vm564_vm3, %v562_v44, 0.0  ;;  %v576_v48 = vmul.f32 %v562_v44, %v562_v44 }
  0xfd   : > { %v579_v49 = vsel %vm564_vm3, %v577_v46, 0.0  ;;  %v569_v50 = vadd.f32 %v568_v45, %v567_v47 }
  0xfe   : > { %v578_v51 = vsel %vm564_vm3, %v576_v48, 0.0 }
  0xff   : > { %v570_v52 = vrot.slane %v569_v50, 4  ;;  %v580_v53 = vadd.f32 %v579_v49, %v578_v51 }
 0x101   : > { %v571_v54 = vadd.f32 %v570_v52, %v569_v50  ;;  %v581_v55 = vrot.slane %v580_v53, 4 }
 0x103   : > { %v572_v56 = vrot.slane %v571_v54, 2  ;;  %v582_v57 = vadd.f32 %v581_v55, %v580_v53 }
 0x105   : > { %v573_v58 = vadd.f32 %v572_v56, %v571_v54  ;;  %v583_v59 = vrot.slane %v582_v57, 2 }
 0x107   : > { %v574_v60 = vrot.slane %v573_v58, 1  ;;  %v584_v61 = vadd.f32 %v583_v59, %v582_v57 }
 0x109   : > { %v585_v62 = vrot.slane %v584_v61, 1  ;;  %v575_v63 = vadd.f32 %v574_v60, %v573_v58 }
 0x10b   : > { %v586_v0 = vadd.f32 %v585_v62, %v584_v61 }
 0x10d   : > { %v587_v1 = vsel %vm285_vm0, %v575_v63, %v586_v0 }
 0x10e   : > { %589 = vst.msk [vmem:[%s262_s17] sm:$0x3] %vm588_vm4, %v587_v1 }
 0x10f PF: > { %s17_s21 = sadd.s32 1, %s800_s21  }
 0x110   : > { %p14_p4 = scmp.ge.s32.totalorder %s17_s21, 4  }
 0x112   :  { %16 = sbr.rel (!%p14_p4) target bundleno = 1 (0x1), region = 84 }

// kernel: tstransformer_forward.9
= control target key start
LH: loop header
LB: loop body
LE: loop exit
PB: predicated region body
PF: predicated region fallthrough
CT: control target
= control target key end

     0   :  { %19 = vsyncpa [#allocation3], 0  ;;  %s3326_s0 = inlined_call_operand.vmem [shape: f32[2,16,32], index: 0, kind: input, shape index: {}]   ;;  %s3327_s1 = inlined_call_operand.vmem [shape: f32[1,32], index: 1, kind: input, shape index: {}]   ;;  %s3328_s2 = inlined_call_operand.vmem [shape: f32[1,32], index: 2, kind: input, shape index: {}]   ;;  %s3329_s3 = inlined_call_operand.vmem [shape: f32[3,32,32], index: 3, kind: input, shape index: {}]   ;;  %s3330_s4 = inlined_call_operand.vmem [shape: f32[1,32], index: 4, kind: input, shape index: {}]   ;;  %s3331_s5 = inlined_call_operand.vmem [shape: f32[3,32,32], index: 5, kind: input, shape index: {}]   ;;  %s3332_s6 = inlined_call_operand.vmem [shape: f32[1,32], index: 6, kind: input, shape index: {}]   ;;  %s3333_s7 = inlined_call_operand.vmem [shape: f32[32,32], index: 7, kind: input, shape index: {}]   ;;  %s3334_s8 = inlined_call_operand.vmem [shape: f32[1,32], index: 8, kind: input, shape index: {}]   ;;  %s3335_s9 = inlined_call_operand.vmem [shape: f32[32,32], index: 9, kind: input, shape index: {}]   ;;  %s3336_s10 = inlined_call_operand.vmem [shape: f32[1,32], index: 10, kind: input, shape index: {}]   ;;  %s3337_s11 = inlined_call_operand.vmem [shape: f32[2,16,32], index: 11, kind: output, shape index: {0}]   ;;  %s3338_s12 = inlined_call_operand.vmem [shape: f32[2,2,32], index: 12, kind: output, shape index: {1}]   ;;  %s3339_s13 = inlined_call_operand.hbm [shape: f32[2,4,16,16], index: 13, kind: output, shape index: {2}]  }
   0x1   :  { %21 = vsyncpa [#allocation3 + $0x1], 0  ;;  %s2889_s25 = smov 0   ;;  %s2891_s26 = smov 0  }
   0x2   :  { %s2893_s27 = smov 0   ;;  %s2895_s28 = smov 0  }
   0x3 LB: > { %3345 = sst [smem:[#allocation5_spill]] %s2805_s27  ;;  %s2910_s29 = sadd.s32 4294967295, %s2809_s28   ;;  %s2809_s28 = sphi %s2895_s28, %s3355_s28   ;;  %s2805_s27 = sphi %s2893_s27, %s3360_s27   ;;  %s2801_s26 = sphi %s2891_s26, %s3359_s26   ;;  %s2797_s25 = sphi %s2889_s25, %s3358_s25  }
   0x4   : > { %s2213_s30 = sadd.s32 4294967294, %s2809_s28   ;;  %s2914_s14 = sadd.s32 1, %s2809_s28  }
   0x5   : > { %3346 = sst [smem:[#allocation6_spill]] %s2914_s14  ;;  %s322_s15 = sadd.s32 1, %s2805_s27 }
   0x6   : > { %s319_s16 = ssub.s32 %s2809_s28, %s2914_s14  ;;  %p332_p0 = scmp.ne.s32.totalorder %s2805_s27, %s2801_s26 }
   0x7   : > { %p320_p1 = scmp.eq.s32.totalorder %s319_s16, 0  ;;  %p333_p2 = scmp.eq.s32.totalorder %s2910_s29, 1 }
   0x8   : > { %p338_p3 = scmp.ne.s32.totalorder %s2801_s26, %s2797_s25  ;;  %p339_p4 = scmp.eq.s32.totalorder %s2213_s30, 1 }
   0x9   : > { %s2925_s17 = scalar_select %p320_p1, %s2805_s27, %s322_s15  }
   0xa   : > { %p2927_p5 = por %p333_p2, %p332_p0  ;;  %p2931_p6 = por %p339_p4, %p338_p3 }
   0xb   : > { %3347 = sst [smem:[#allocation7_spill]] %s2925_s17  ;;  %p2216_p7 = scmp.ge.s32.totalorder %s2809_s28, 1 }
   0xc   : > { %s3349_s19 = scalar_select %p2931_p6, 1, 0 }
   0xd   : > { %p395_p8 = scmp.lt.s32.totalorder %s2809_s28, 3 }
   0xe   : > { %3350 = sst [smem:[#allocation8_spill]] %s3349_s19 }
   0xf   : > { %p396_p9 = pnand %p2216_p7, %p395_p8 }
  0x10   : > { %v766_v0 = vld [vmem:[%s3331_s5] sm:$0xff] (!%p396_p9)  ;;  %v767_v1 = vld [vmem:[%s3331_s5 + $0x8] sm:$0xff] (!%p396_p9)  ;;  %p448_p10 = scmp.lt.s32.totalorder (!%p396_p9), %s2910_s29, 1  ;;  %v768_v5 = vld [vmem:[%s3331_s5 + $0x10] sm:$0xff] (!%p396_p9)  ;;  %vm490_vm0 = vcmask (!%p396_p9), 1041408   ;;  %vm501_vm1 = vcmask (!%p396_p9), 261120  }
  0x11   : > { %399 = sbr.rel (%p396_p9) target bundleno = 3001 (0xbb9), region = 64  ;;  %v497_v2 = vld [vmem:[%s3329_s3] sm:$0xff] (!%p396_p9)  ;;  %v2547_v3 = vpack.c.bf16 (!%p396_p9), %v767_v1, %v766_v0  ;;  %v498_v4 = vld [vmem:[%s3329_s3 + $0x8] sm:$0xff] (!%p396_p9)  ;;  %v769_v6 = vld [vmem:[%s3331_s5 + $0x18] sm:$0xff] (!%p396_p9)  ;;  %vm484_vm2 = vcmask (!%p396_p9), 1040384   ;;  %vm1110_vm3 = vcmask (!%p396_p9), 64512  }
  0x12   : > { %v2523_v7 = vpack.c.bf16 (!%p396_p9), %v498_v4, %v497_v2  ;;  %v2551_v8 = vpack.c.bf16 (!%p396_p9), %v769_v6, %v768_v5  ;;  %v499_v9 = vld [vmem:[%s3329_s3 + $0x10] sm:$0xff] (!%p396_p9)  ;;  %v500_v10 = vld [vmem:[%s3329_s3 + $0x18] sm:$0xff] (!%p396_p9)  ;;  %v2243_v12 = vld [vmem:[%s3331_s5 + $0x20] sm:$0xff] (!%p396_p9)  ;;  %s2811_s17 = smov (!%p396_p9), 120   ;;  %vm1200_vm6 = vcmask (!%p396_p9), 130048   ;;  %s445_s22 = sand.u32 (!%p396_p9), 1, %s2801_s26  }
  0x13   : > { %2548 = vmatprep.subr.bf16.mxu1 (!%p396_p9), %v2547_v3  ;;  %v2527_v11 = vpack.c.bf16 (!%p396_p9), %v500_v10, %v499_v9  ;;  %v2244_v13 = vld [vmem:[%s3331_s5 + $0x28] sm:$0xff] (!%p396_p9)  ;;  %v2223_v14 = vld [vmem:[%s3327_s1] ss:$0 sm:$0xff] (!%p396_p9)  ;;  %v2245_v26 = vld [vmem:[%s3331_s5 + $0x30] sm:$0xff] (!%p396_p9)  ;;  %v1103_v9 = vlaneseq (!%p396_p9)  ;;  %s2217_s14 = sshll.u32 (!%p396_p9), %s445_s22, 6  ;;  %s2812_s23 = smov (!%p396_p9), 112  }
  0x14   : > { %2524 = vmatprep.subr.bf16.mxu0 (!%p396_p9), %v2523_v7  ;;  %2550 = vmatpush3.bf16.msra.mxu1 (!%p396_p9), %v2547_v3  ;;  %v2228_v15 = vld [vmem:[%s3329_s3 + $0x20] sm:$0xff] (!%p396_p9)  ;;  %v2229_v16 = vld [vmem:[%s3329_s3 + $0x28] sm:$0xff] (!%p396_p9)  ;;  %v2555_v17 = vpack.c.bf16 (!%p396_p9), %v2244_v13, %v2243_v12  ;;  %v2246_v27 = vld [vmem:[%s3331_s5 + $0x38] sm:$0xff] (!%p396_p9)  ;;  %s3128_s19 = scalar_lea.vmem (!%p396_p9), [#allocation2], %s2217_s14  ;;  %s2813_s24 = smov (!%p396_p9), 104   ;;  %vm1951_vm8 = vcmask (!%p396_p9), 195584  }
  0x15   : > { %2526 = vmatpush3.bf16.msra.mxu0 (!%p396_p9), %v2523_v7  ;;  %2552 = vmatprep.subr.bf16.mxu1 (!%p396_p9), %v2551_v8  ;;  %v2224_v20 = vld [vmem:[%s3328_s2] ss:$0 sm:$0xff] (!%p396_p9)  ;;  %v2531_v21 = vpack.c.bf16 (!%p396_p9), %v2229_v16, %v2228_v15  ;;  %v2230_v28 = vld [vmem:[%s3329_s3 + $0x30] sm:$0xff] (!%p396_p9)  ;;  %v2231_v29 = vld [vmem:[%s3329_s3 + $0x38] sm:$0xff] (!%p396_p9)  ;;  %v2559_v35 = vpack.c.bf16 (!%p396_p9), %v2246_v27, %v2245_v26  ;;  %v3095_v10 = vshrl.u32 (!%p396_p9), %v1103_v9, 7  ;;  %s2814_s30 = smov (!%p396_p9), 8  }
  0x16   : > { %2528 = vmatprep.subr.bf16.mxu0 (!%p396_p9), %v2527_v11  ;;  %v2535_v36 = vpack.c.bf16 (!%p396_p9), %v2231_v29, %v2230_v28  ;;  %v2249_v37 = vld [vmem:[%s3331_s5 + $0x40] sm:$0xff] (!%p396_p9)  ;;  %v2250_v38 = vld [vmem:[%s3331_s5 + $0x48] sm:$0xff] (!%p396_p9)  ;;  %v2251_v45 = vld [vmem:[%s3331_s5 + $0x50] sm:$0xff] (!%p396_p9)  ;;  %s2815_s27 = smov (!%p396_p9), 16  }
  0x17   : > { %v2234_v39 = vld [vmem:[%s3329_s3 + $0x40] sm:$0xff] (!%p396_p9)  ;;  %v2235_v40 = vld [vmem:[%s3329_s3 + $0x48] sm:$0xff] (!%p396_p9)  ;;  %v2563_v43 = vpack.c.bf16 (!%p396_p9), %v2250_v38, %v2249_v37  ;;  %v2252_v46 = vld [vmem:[%s3331_s5 + $0x58] sm:$0xff] (!%p396_p9)  ;;  %v3100_v12 = vadd.s32 (!%p396_p9), 8, %v3095_v10 }
  0x18   : > { %s2963_s15 = scalar_select %p448_p10, %s2910_s29, 1  ;;  %2554 = vmatpush3.bf16.msra.mxu1 %v2551_v8  ;;  %v2539_v44 = vpack.c.bf16 %v2235_v40, %v2234_v39  ;;  %v2236_v47 = vld [vmem:[%s3329_s3 + $0x50] sm:$0xff]  ;;  %v2237_v48 = vld [vmem:[%s3329_s3 + $0x58] sm:$0xff]  ;;  %v2567_v50 = vpack.c.bf16 %v2252_v46, %v2251_v45  ;;  %v1017_v52 = vld [vmem:[%s3333_s7] sm:$0xff] }
  0x19   : > { %2530 = vmatpush3.bf16.msra.mxu0 %v2527_v11  ;;  %2556 = vmatprep.subr.bf16.mxu1 %v2555_v17  ;;  %v2543_v51 = vpack.c.bf16 %v2237_v48, %v2236_v47  ;;  %v1018_v53 = vld [vmem:[%s3333_s7 + $0x8] sm:$0xff]  ;;  %v1019_v54 = vld [vmem:[%s3333_s7 + $0x10] sm:$0xff]  ;;  %v1020_v56 = vld [vmem:[%s3333_s7 + $0x18] sm:$0xff]  ;;  %v3097_v11 = vand.u32 127, %v1103_v9 }
  0x1a   : > { %s3344_s21 = sshll.u32 %s2963_s15, 4  ;;  %2532 = vmatprep.subr.bf16.mxu0 %v2531_v21  ;;  %v2571_v55 = vpack.c.bf16 %v1018_v53, %v1017_v52  ;;  %v2575_v57 = vpack.c.bf16 %v1020_v56, %v1019_v54  ;;  %v2242_v58 = vld [vmem:[%s3332_s6] ss:$0 sm:$0xff]  ;;  %vm3073_vm4 = vmpackc.low %vm1110_vm3, %vm1110_vm3 }
  0x1b   : > { %s452_s16 = scalar_lea.vmem %s3326_s0, %s3344_s21  ;;  %v2227_v59 = vld [vmem:[%s3330_s4] ss:$0 sm:$0xff]  ;;  %vm1108_vm5 = vcmp.le.s32.totalorder %v3097_v11, %v3095_v10  ;;  %vm1109_vm7 = vcmp.le.s32.totalorder %v3097_v11, %v3100_v12  ;;  %s2298_s21 = sshll.u32 %s2910_s29, 10 }
  0x1c   : > { %v462_v18 = vld [vmem:[%s452_s16] sm:$0xff]  ;;  %v463_v19 = vld [vmem:[%s452_s16 + $0x8] sm:$0xff]  ;;  %s2102_s16 = sshll.u32 %s3128_s19, 4  ;;  %s2817_s29 = smov [#allocation2]   ;;  %s3259_s16 = int_to_ptr.vmem [resolvable:$true] %s2102_s16 }
  0x1d   : > { %v471_v22 = vmul.f32 %v2223_v14, %v462_v18  ;;  %v472_v23 = vmul.f32 %v2223_v14, %v463_v19 }
  0x1f   : > { %v2989_v24 = vadd.f32 %v2224_v20, %v471_v22  ;;  %v2991_v25 = vadd.f32 %v2224_v20, %v472_v23  ;;  %v2255_v20 = vld [vmem:[%s3334_s8] ss:$0 sm:$0xff] }
  0x21   : > { %v491_v30 = vrot.slane %v2989_v24, 6  ;;  %v492_v31 = vrot.slane %v2991_v25, 6  ;;  %v485_v32 = vrot.slane %v2989_v24, 7  ;;  %v486_v42 = vrot.slane %v2991_v25, 7 }
  0x23   : > { %v495_v33 = vsel %vm490_vm0, 0.0, %v491_v30  ;;  %v493_v34 = vsel %vm490_vm0, %v491_v30, %v492_v31  ;;  %v489_v41 = vsel %vm484_vm2, 0.0, %v485_v32  ;;  %v487_v49 = vsel %vm484_vm2, %v485_v32, %v486_v42 }
  0x24   : > { %2387 = vmatprep.mubr.msk.f32.mxu0 %vm501_vm1, %v495_v33  ;;  %2420 = vmatprep.mubr.msk.f32.mxu1 %vm501_vm1, %v495_v33 }
  0x25   : > { %2388 = vmatmul.mubr.msk.f32.vlgmr.msra.gmra.mrb[0].mxu0 %vm501_vm1, %v493_v34  ;;  %2421 = vmatmul.mubr.msk.f32.vlgmr.msra.gmra.mrb[0].mxu1 %vm501_vm1, %v493_v34 }
  0x26   : > { %2558 = vmatpush3.bf16.msra.mxu1 %v2555_v17  ;;  %2534 = vmatpush3.bf16.msra.mxu0 %v2531_v21 }
  0x27   : > { %2560 = vmatprep.subr.bf16.mxu1 %v2559_v35  ;;  %2536 = vmatprep.subr.bf16.mxu0 %v2535_v36 }
  0x28   : > { %2398 = vmatprep.mubr.msk.f32.mxu0 %vm501_vm1, %v489_v41  ;;  %2431 = vmatprep.mubr.msk.f32.mxu1 %vm501_vm1, %v489_v41 }
  0x2a   : > { %2562 = vmatpush3.bf16.msra.mxu1 %v2559_v35  ;;  %2538 = vmatpush3.bf16.msra.mxu0 %v2535_v36 }
  0x2b   : > { %2564 = vmatprep.subr.bf16.mxu1 %v2563_v43  ;;  %2540 = vmatprep.subr.bf16.mxu0 %v2539_v44 }
  0x2d   : > { %2399 = vmatmul.mubr.msk.f32.vlgmr.msra.gmra.mrb[0].mxu0 %vm501_vm1, %v487_v49  ;;  %2432 = vmatmul.mubr.msk.f32.vlgmr.msra.gmra.mrb[0].mxu1 %vm501_vm1, %v487_v49 }
  0x2e   : > { %2566 = vmatpush3.bf16.msra.mxu1 %v2563_v43  ;;  %2542 = vmatpush3.bf16.msra.mxu0 %v2539_v44 }
  0x2f   : > { %2568 = vmatprep.subr.bf16.mxu1 %v2567_v50  ;;  %2544 = vmatprep.subr.bf16.mxu0 %v2543_v51 }
  0x30   : > { %2409 = vmatprep.mubr.msk.f32.mxu0 %vm501_vm1, %v2989_v24  ;;  %2442 = vmatprep.mubr.msk.f32.mxu1 %vm501_vm1, %v2989_v24 }
  0x32   : > { %2570 = vmatpush3.bf16.msra.mxu1 %v2567_v50  ;;  %2546 = vmatpush3.bf16.msra.mxu0 %v2543_v51 }
  0x33   : > { %2572 = vmatprep.subr.bf16.mxu0 %v2571_v55 }
  0x35   : > { %2410 = vmatmul.mubr.msk.f32.vlgmr.msra.gmra.mrb[0].mxu0 %vm501_vm1, %v2991_v25  ;;  %2443 = vmatmul.mubr.msk.f32.vlgmr.msra.gmra.mrb[0].mxu1 %vm501_vm1, %v2991_v25 }
  0x36   : > { %2453 = vmatprep.mubr.msk.f32.mxu0 %vm501_vm1, %v2989_v24  ;;  %2574 = vmatpush3.bf16.msra.mxu0 %v2571_v55 }
  0x37   : > { %2576 = vmatprep.subr.bf16.mxu0 %v2575_v57 }
  0x3a   : > { %2578 = vmatpush3.bf16.msra.mxu0 %v2575_v57 }
  0x3d   : > { %2454 = vmatmul.mubr.msk.f32.vlgmr.msra.gmra.mrb[2].mxu0 %vm501_vm1, %v2991_v25 }
 0x108   : > { %v2411_v60 = vpop.f32.mrb[0].mxu0  ;;  %v2444_v61 = vpop.f32.mrb[0].mxu1 }
 0x109   : > { %v2629_v62 = vadd.f32 %v2444_v61, %v2242_v58  ;;  %v752_v63 = vpop.f32.mrb[1].mxu0  ;;  %v1006_v0 = vpop.f32.mrb[1].mxu1  ;;  %v2627_v7 = vadd.f32 %v2411_v60, %v2227_v59 }
 0x10a   : > { %v2628_v1 = vadd.f32 %v2227_v59, %v752_v63  ;;  %v2630_v2 = vadd.f32 %v2242_v58, %v1006_v0 }
 0x10b   : > { %v3091_v8 = vmul.f32 0.35355338, %v2627_v7 }
 0x10c   : > { %v3079_v4 = vmul.f32 0.35355338, %v2628_v1  ;;  %v2579_v5 = vpack.c.bf16 %v2629_v62, %v2630_v2  ;;  %v3081_v6 = vpack.i.bf16 %v2629_v62, %v2630_v2 }
 0x10e   : > { %2581 = vmatprep.subr.msk.bf16.mxu1 %vm3073_vm4, %v2579_v5  ;;  %1306 = vrot.lane.b32.xlu1 %v3079_v4, %s2811_s17 }
 0x10f   : > { %2460 = vmatprep.mubr.msk.f32.mxu1 %vm1110_vm3, %v3079_v4  ;;  %2584 = vmatpush3.bf16.xpose.msk.msra.mxu1 %vm3073_vm4, %v2579_v5 }
 0x110   : > { %v2455_v19 = vpop.f32.mrb[2].mxu0 }
 0x111   : > { %v1094_v21 = vpop.f32.mrb[3].mxu0  ;;  %v1100_v22 = vadd.f32 %v2455_v19, %v2255_v20 }
 0x112   : > { %v1095_v23 = vadd.f32 %v2255_v20, %v1094_v21 }
 0x114   : > { %v2585_v26 = vpack.c.bf16 %v1100_v22, %v1095_v23  ;;  %v3152_v57 = vpack.i.bf16 %v1100_v22, %v1095_v23 }
 0x116   : > { %2461 = vmatmul.mubr.msk.f32.vlgmr.msra.gmra.mrb[2].mxu1 %vm1110_vm3, %v3091_v8  ;;  %2586 = vmatprep.subr.bf16.mxu1 %v2585_v26 }
 0x117   : > { %2588 = vmatpush3.bf16.msra.mxu1 %v2585_v26 }
 0x180   : > { %v1307_v41 = vpop.permute.xlu1 %1306 }
 0x1e9   : > { %v2462_v13 = vpop.f32.mrb[2].mxu1 }
 0x1ea   : > { %v1189_v14 = vpop.f32.mrb[3].mxu1  ;;  %v1199_v17 = vsel %vm1109_vm7, %v2462_v13, -1e+30 }
 0x1eb   : > { %v1198_v15 = vsel %vm1108_vm5, %v1189_v14, -1e+30  ;;  %v1204_v18 = vsel %vm1200_vm6, %v1199_v17, -inf }
 0x1ec   : > { %v1201_v16 = vsel %vm1200_vm6, %v1198_v15, -inf }
 0x1ed   : > { %1202 = vmax.xlane.f32.xlu0 %v1201_v16 }
 0x1f1   : > { %1205 = vmax.xlane.f32.xlu0 %v1204_v18 }
 0x207   : > { %2686 = vrot.lane.b32.xlu0 %v3081_v6, %s2811_s17 }
 0x27a   : > { %v1203_v27 = vpop.xlane.xlu0 %1202 }
 0x27b   : > { %v1207_v28 = vsub.f32 %v1198_v15, %v1203_v27 }
 0x27d   : > { %v1209_v31 = vmul.f32 1.442695, %v1207_v28 }
 0x27e   : > { %v1206_v29 = vpop.xlane.xlu0 %1205 }
 0x27f   : > { %v1208_v30 = vsub.f32 %v1199_v17, %v1206_v29 }
 0x281   : > { %v1211_v32 = vmul.f32 1.442695, %v1208_v30 }
 0x282   : > { %v2687_v33 = vpop.permute.xlu0 %2686 }
 0x283   : > { %2715 = vpow2.f32 %v1211_v32  ;;  %v2689_v34 = vunpack.i.h.bf16 %v2687_v33  ;;  %v2688_v35 = vunpack.i.l.bf16 %v2687_v33 }
 0x284   : > { %2717 = vpow2.f32 %v1209_v31 }
 0x285   : > { %v2589_v36 = vpack.c.bf16 %v2689_v34, %v2688_v35 }
 0x287   : > { %2591 = vmatprep.subr.msk.bf16.mxu1 %vm3073_vm4, %v2589_v36 }
 0x28d   : > { %v2716_v37 = vpop.eup %2715 }
 0x28e   : > { %v1216_v38 = vsel %vm1200_vm6, %v2716_v37, 0.0  ;;  %v2718_v39 = vpop.eup %2717 }
 0x28f   : > { %1217 = vadd.xlane.f32.xlu1 %v1216_v38  ;;  %v1213_v40 = vsel %vm1200_vm6, %v2718_v39, 0.0 }
 0x293   : > { %1214 = vadd.xlane.f32.xlu1 %v1213_v40 }
 0x2a4   : > { %1308 = vrot.lane.b32.xlu1 %v3091_v8, %s2811_s17 }
 0x31c   : > { %v1218_v42 = vpop.xlane.xlu1 %1217 }
 0x31d   : > { %2719 = vrcp.f32 %v1218_v42 }
 0x320   : > { %v1215_v43 = vpop.xlane.xlu1 %1214 }
 0x321   : > { %2721 = vrcp.f32 %v1215_v43 }
 0x324   : > { %v1309_v48 = vpop.permute.xlu1 %1308 }
 0x327   : > { %v2720_v44 = vpop.eup %2719 }
 0x328   : > { %v1222_v45 = vmul.f32 %v2720_v44, %v2716_v37 }
 0x32a   : > { %1224 = vst.msk [vmem:[%s3128_s19 + $0x8] sm:$0xff] %vm1200_vm6, %v1222_v45 }
 0x32b   : > { %v2722_v46 = vpop.eup %2721 }
 0x32c   : > { %v1220_v47 = vmul.f32 %v2722_v46, %v2718_v39 }
 0x32e   : > { %1223 = vst.msk [vmem:[%s3128_s19] sm:$0xff] %vm1200_vm6, %v1220_v47  ;;  %2467 = vmatprep.mubr.msk.f32.mxu1 %vm1200_vm6, %v1220_v47 }
 0x32f   : > { %2468 = vmatmul.mubr.msk.f32.vlgmr.msra.gmra.mrb[4].mxu1 %vm1200_vm6, %v1222_v45 }
 0x330   : > { %2594 = vmatpush3.bf16.xpose.msk.msra.mxu1 %vm3073_vm4, %v2589_v36  ;;  %2474 = vmatprep.mubr.msk.f32.mxu1 %vm1110_vm3, %v1307_v41 }
 0x337   : > { %2475 = vmatmul.mubr.msk.f32.vlgmr.msra.gmra.mrb[6].mxu1 %vm1110_vm3, %v1309_v48 }
 0x402   : > { %v3140_v49 = vpop.f32.mrb[4].mxu1 }
 0x403   : > { %v3142_v50 = vpop.f32.mrb[5].mxu1 }
 0x40a   : > { %v2476_v51 = vpop.f32.mrb[6].mxu1 }
 0x40b   : > { %v1398_v52 = vsel %vm1109_vm7, %v2476_v51, -1e+30  ;;  %v1388_v53 = vpop.f32.mrb[7].mxu1 }
 0x40c   : > { %v1397_v54 = vsel %vm1108_vm5, %v1388_v53, -1e+30  ;;  %v1402_v55 = vsel %vm1200_vm6, %v1398_v52, -inf }
 0x40d   : > { %1403 = vmax.xlane.f32.xlu0 %v1402_v55  ;;  %v1399_v56 = vsel %vm1200_vm6, %v1397_v54, -inf }
 0x40e   : > { %1400 = vmax.xlane.f32.xlu1 %v1399_v56 }
 0x41f   : > { %2691 = vrot.lane.b32.xlu1 %v3152_v57, %s2811_s17  ;;  %s2816_s17 = smov 24  }
 0x423   : > { %1513 = vrot.lane.b32.xlu1 %v3079_v4, %s2812_s23 }
 0x427   : > { %1515 = vrot.lane.b32.xlu1 %v3091_v8, %s2812_s23 }
 0x49a   : > { %v1404_v58 = vpop.xlane.xlu0 %1403 }
 0x49b   : > { %v1406_v59 = vsub.f32 %v1398_v52, %v1404_v58  ;;  %v1401_v60 = vpop.xlane.xlu1 %1400 }
 0x49c   : > { %v1405_v61 = vsub.f32 %v1397_v54, %v1401_v60 }
 0x49d   : > { %v1409_v62 = vmul.f32 1.442695, %v1406_v59 }
 0x49e   : > { %v1407_v63 = vmul.f32 1.442695, %v1405_v61 }
 0x49f   : > { %2723 = vpow2.f32 %v1409_v62  ;;  %v2692_v0 = vpop.permute.xlu1 %2691 }
 0x4a0   : > { %v2694_v1 = vunpack.i.h.bf16 %v2692_v0  ;;  %v2693_v2 = vunpack.i.l.bf16 %v2692_v0  ;;  %2725 = vpow2.f32 %v1407_v63 }
 0x4a2   : > { %v2595_v5 = vpack.c.bf16 %v2694_v1, %v2693_v2 }
 0x4a3   : > { %v1514_v27 = vpop.permute.xlu1 %1513 }
 0x4a4   : > { %2596 = vmatprep.subr.bf16.mxu0 %v2595_v5 }
 0x4a5   : > { %2598 = vmatpush3.bf16.msra.mxu0 %v2595_v5 }
 0x4a7   : > { %v1516_v28 = vpop.permute.xlu1 %1515 }
 0x4a9   : > { %v2724_v7 = vpop.eup %2723 }
 0x4aa   : > { %v1414_v9 = vsel %vm1200_vm6, %v2724_v7, 0.0  ;;  %v2726_v13 = vpop.eup %2725 }
 0x4ab   : > { %1415 = vadd.xlane.f32.xlu0 %v1414_v9  ;;  %v1411_v14 = vsel %vm1200_vm6, %v2726_v13, 0.0 }
 0x4af   : > { %1412 = vadd.xlane.f32.xlu0 %v1411_v14 }
 0x4c5   : > { %2696 = vrot.lane.b32.xlu0 %v3081_v6, %s2812_s23 }
 0x538   : > { %v1416_v15 = vpop.xlane.xlu0 %1415 }
 0x539   : > { %2727 = vrcp.f32 %v1416_v15 }
 0x53c   : > { %v1413_v16 = vpop.xlane.xlu0 %1412 }
 0x53d   : > { %2729 = vrcp.f32 %v1413_v16 }
 0x540   : > { %v2697_v17 = vpop.permute.xlu0 %2696 }
 0x541   : > { %v2699_v18 = vunpack.i.h.bf16 %v2697_v17  ;;  %v2698_v19 = vunpack.i.l.bf16 %v2697_v17 }
 0x543   : > { %v2728_v20 = vpop.eup %2727  ;;  %v2599_v21 = vpack.c.bf16 %v2699_v18, %v2698_v19 }
 0x544   : > { %v1420_v22 = vmul.f32 %v2728_v20, %v2724_v7 }
 0x545   : > { %2601 = vmatprep.subr.msk.bf16.mxu0 %vm3073_vm4, %v2599_v21 }
 0x546   : > { %2269 = vst.msk [vmem:[%s3128_s19 + $0x18] sm:$0xff] %vm1200_vm6, %v1420_v22 }
 0x547   : > { %v2730_v23 = vpop.eup %2729 }
 0x548   : > { %v1418_v26 = vmul.f32 %v2730_v23, %v2726_v13 }
 0x54a   : > { %2268 = vst.msk [vmem:[%s3128_s19 + $0x10] sm:$0xff] %vm1200_vm6, %v1418_v26  ;;  %2481 = vmatprep.mubr.msk.f32.mxu0 %vm1200_vm6, %v1418_v26 }
 0x54b   : > { %2482 = vmatmul.mubr.msk.f32.vlgmr.msra.gmra.mrb[4].mxu0 %vm1200_vm6, %v1420_v22 }
 0x54c   : > { %2604 = vmatpush3.bf16.xpose.msk.msra.mxu0 %vm3073_vm4, %v2599_v21  ;;  %2488 = vmatprep.mubr.msk.f32.mxu0 %vm1110_vm3, %v1514_v27 }
 0x553   : > { %2489 = vmatmul.mubr.msk.f32.vlgmr.msra.gmra.mrb[6].mxu0 %vm1110_vm3, %v1516_v28 }
 0x61e   : > { %v3176_v29 = vpop.f32.mrb[4].mxu0 }
 0x61f   : > { %v3178_v30 = vpop.f32.mrb[5].mxu0 }
 0x626   : > { %v2490_v31 = vpop.f32.mrb[6].mxu0 }
 0x627   : > { %v1605_v32 = vsel %vm1109_vm7, %v2490_v31, -1e+30  ;;  %v1595_v33 = vpop.f32.mrb[7].mxu0 }
 0x628   : > { %v1604_v34 = vsel %vm1108_vm5, %v1595_v33, -1e+30  ;;  %v1609_v35 = vsel %vm1200_vm6, %v1605_v32, -inf  ;;  %v1956_v33 = vld [vmem:[%s3335_s9 + $0x10] sm:$0xff] }
 0x629   : > { %1610 = vmax.xlane.f32.xlu0 %v1609_v35  ;;  %v1606_v36 = vsel %vm1200_vm6, %v1604_v34, -inf  ;;  %v1957_v35 = vld [vmem:[%s3335_s9 + $0x18] sm:$0xff] }
 0x62a   : > { %1607 = vmax.xlane.f32.xlu1 %v1606_v36  ;;  %v2623_v36 = vpack.c.bf16 %v1957_v35, %v1956_v33 }
 0x63b   : > { %2701 = vrot.lane.b32.xlu1 %v3152_v57, %s2812_s23  ;;  %s3257_s23 = scalar_lea.hbm %s3339_s13, %s2298_s21 }
 0x63f   : > { %1718 = vrot.lane.b32.xlu1 %v3079_v4, %s2813_s24 }
 0x643   : > { %1720 = vrot.lane.b32.xlu1 %v3091_v8, %s2813_s24 }
 0x6b6   : > { %v1611_v37 = vpop.xlane.xlu0 %1610 }
 0x6b7   : > { %v1613_v38 = vsub.f32 %v1605_v32, %v1611_v37  ;;  %v1608_v39 = vpop.xlane.xlu1 %1607  ;;  %v1955_v32 = vld [vmem:[%s3335_s9 + $0x8] sm:$0xff] }
 0x6b8   : > { %v1612_v40 = vsub.f32 %v1604_v34, %v1608_v39 }
 0x6b9   : > { %v1616_v41 = vmul.f32 1.442695, %v1613_v38 }
 0x6ba   : > { %v1614_v42 = vmul.f32 1.442695, %v1612_v40 }
 0x6bb   : > { %2731 = vpow2.f32 %v1616_v41  ;;  %v2702_v43 = vpop.permute.xlu1 %2701 }
 0x6bc   : > { %v2704_v44 = vunpack.i.h.bf16 %v2702_v43  ;;  %v2703_v45 = vunpack.i.l.bf16 %v2702_v43  ;;  %2733 = vpow2.f32 %v1614_v42 }
 0x6be   : > { %v2605_v46 = vpack.c.bf16 %v2704_v44, %v2703_v45 }
 0x6c0   : > { %2606 = vmatprep.subr.bf16.mxu1 %v2605_v46 }
 0x6c1   : > { %2608 = vmatpush3.bf16.msra.mxu1 %v2605_v46 }
 0x6c5   : > { %v2732_v47 = vpop.eup %2731 }
 0x6c6   : > { %v1621_v4 = vsel %vm1200_vm6, %v2732_v47, 0.0  ;;  %v2734_v48 = vpop.eup %2733 }
 0x6c7   : > { %1622 = vadd.xlane.f32.xlu0 %v1621_v4  ;;  %v1618_v8 = vsel %vm1200_vm6, %v2734_v48, 0.0 }
 0x6cb   : > { %1619 = vadd.xlane.f32.xlu0 %v1618_v8 }
 0x6e1   : > { %2706 = vrot.lane.b32.xlu0 %v3081_v6, %s2813_s24  ;;  %v1719_v6 = vpop.permute.xlu1 %1718 }
 0x6e5   : > { %v1721_v62 = vpop.permute.xlu1 %1720 }
 0x754   : > { %v1623_v51 = vpop.xlane.xlu0 %1622 }
 0x755   : > { %2735 = vrcp.f32 %v1623_v51 }
 0x758   : > { %v1620_v52 = vpop.xlane.xlu0 %1619 }
 0x759   : > { %2737 = vrcp.f32 %v1620_v52 }
 0x75c   : > { %v2707_v53 = vpop.permute.xlu0 %2706 }
 0x75d   : > { %v2709_v54 = vunpack.i.h.bf16 %v2707_v53  ;;  %v2708_v55 = vunpack.i.l.bf16 %v2707_v53 }
 0x75f   : > { %v2736_v56 = vpop.eup %2735  ;;  %v2609_v58 = vpack.c.bf16 %v2709_v54, %v2708_v55 }
 0x760   : > { %v1627_v59 = vmul.f32 %v2736_v56, %v2732_v47 }
 0x761   : > { %2611 = vmatprep.subr.msk.bf16.mxu1 %vm3073_vm4, %v2609_v58 }
 0x762   : > { %2277 = vst.msk [vmem:[%s3128_s19 + $0x28] sm:$0xff] %vm1200_vm6, %v1627_v59 }
 0x763   : > { %v2738_v60 = vpop.eup %2737 }
 0x764   : > { %v1625_v61 = vmul.f32 %v2738_v60, %v2734_v48 }
 0x766   : > { %2276 = vst.msk [vmem:[%s3128_s19 + $0x20] sm:$0xff] %vm1200_vm6, %v1625_v61  ;;  %2495 = vmatprep.mubr.msk.f32.mxu1 %vm1200_vm6, %v1625_v61 }
 0x767   : > { %2496 = vmatmul.mubr.msk.f32.vlgmr.msra.gmra.mrb[8].mxu1 %vm1200_vm6, %v1627_v59 }
 0x768   : > { %2614 = vmatpush3.bf16.xpose.msk.msra.mxu1 %vm3073_vm4, %v2609_v58  ;;  %2502 = vmatprep.mubr.msk.f32.mxu1 %vm1110_vm3, %v1719_v6 }
 0x76f   : > { %2503 = vmatmul.mubr.msk.f32.vlgmr.msra.gmra.mrb[10].mxu1 %vm1110_vm3, %v1721_v62 }
 0x83a   : > { %v2497_v63 = vpop.f32.mrb[8].mxu1 }
 0x83b   : > { %v1709_v0 = vpop.f32.mrb[9].mxu1 }
 0x842   : > { %v2504_v1 = vpop.f32.mrb[10].mxu1 }
 0x843   : > { %v1810_v2 = vsel %vm1109_vm7, %v2504_v1, -1e+30  ;;  %v1800_v5 = vpop.f32.mrb[11].mxu1 }
 0x844   : > { %v1809_v7 = vsel %vm1108_vm5, %v1800_v5, -1e+30  ;;  %v1814_v3 = vsel %vm1200_vm6, %v1810_v2, -inf }
 0x845   : > { %1815 = vmax.xlane.f32.xlu0 %v1814_v3  ;;  %v1811_v9 = vsel %vm1200_vm6, %v1809_v7, -inf }
 0x846   : > { %1812 = vmax.xlane.f32.xlu1 %v1811_v9 }
 0x857   : > { %2711 = vrot.lane.b32.xlu1 %v3152_v57, %s2813_s24  ;;  %s3263_s24 = scalar_lea.sflag [#allocation3], %s445_s22 }
 0x85b   : > { %1927 = vrot.lane.b32.xlu1 %v3176_v29, %s2814_s30 }
 0x85f   : > { %1933 = vrot.lane.b32.xlu1 %v1709_v0, %s2815_s27 }
 0x863   : > { %1935 = vrot.lane.b32.xlu1 %v2497_v63, %s2815_s27  ;;  %s2747_s27 = scalar_lea.vmem %s3259_s16, 1024 }
 0x864   : > { %p2748_p11 = scmp.ne.s32.totalorder %s3259_s16, %s2747_s27 }
 0x866   : > { %p2749_p12 = pnand %p2748_p11, %p2927_p5 }
 0x868   : > { %p2750_p13 = pneg %p2749_p12 }
 0x8d2   : > { %v1816_v12 = vpop.xlane.xlu0 %1815 }
 0x8d3   : > { %v1818_v13 = vsub.f32 %v1810_v2, %v1816_v12  ;;  %v1813_v10 = vpop.xlane.xlu1 %1812 }
 0x8d4   : > { %v1817_v11 = vsub.f32 %v1809_v7, %v1813_v10 }
 0x8d5   : > { %v1821_v14 = vmul.f32 1.442695, %v1818_v13 }
 0x8d6   : > { %v1819_v15 = vmul.f32 1.442695, %v1817_v11 }
 0x8d7   : > { %v2712_v16 = vpop.permute.xlu1 %2711 }
 0x8d8   : > { %2739 = vpow2.f32 %v1819_v15  ;;  %v2714_v17 = vunpack.i.h.bf16 %v2712_v16  ;;  %v2713_v18 = vunpack.i.l.bf16 %v2712_v16 }
 0x8d9   : > { %2741 = vpow2.f32 %v1821_v14 }
 0x8da   : > { %v2615_v19 = vpack.c.bf16 %v2714_v17, %v2713_v18 }
 0x8db   : > { %v1928_v39 = vpop.permute.xlu1 %1927 }
 0x8dc   : > { %2616 = vmatprep.subr.bf16.mxu0 %v2615_v19  ;;  %v1948_v45 = vsel %vm1110_vm3, %v3140_v49, %v1928_v39 }
 0x8dd   : > { %2618 = vmatpush3.bf16.msra.mxu0 %v2615_v19 }
 0x8df   : > { %v1934_v40 = vpop.permute.xlu1 %1933 }
 0x8e2   : > { %v2740_v57 = vpop.eup %2739 }
 0x8e3   : > { %v1823_v20 = vsel %vm1200_vm6, %v2740_v57, 0.0  ;;  %v2742_v21 = vpop.eup %2741  ;;  %v1936_v42 = vpop.permute.xlu1 %1935 }
 0x8e4   : > { %1824 = vadd.xlane.f32.xlu0 %v1823_v20  ;;  %v1826_v22 = vsel %vm1200_vm6, %v2742_v21, 0.0  ;;  %v1950_v4 = vsel %vm1200_vm6, %v1948_v45, %v1936_v42 }
 0x8e8   : > { %1827 = vadd.xlane.f32.xlu0 %v1826_v22 }
 0x8fe   : > { %1925 = vrot.lane.b32.xlu0 %v3178_v30, %s2814_s30  ;;  %v1954_v30 = vld [vmem:[%s3335_s9] sm:$0xff] }
 0x8ff   : > { %v2619_v34 = vpack.c.bf16 %v1955_v32, %v1954_v30 }
 0x901   : > { %2620 = vmatprep.subr.bf16.mxu0 %v2619_v34 }
 0x971   : > { %v1825_v23 = vpop.xlane.xlu0 %1824 }
 0x972   : > { %2743 = vrcp.f32 %v1825_v23 }
 0x975   : > { %v1828_v26 = vpop.xlane.xlu0 %1827 }
 0x976   : > { %2745 = vrcp.f32 %v1828_v26 }
 0x979   : > { %v1926_v41 = vpop.permute.xlu0 %1925 }
 0x97a   : > { %v1947_v43 = vsel %vm1110_vm3, %v3142_v50, %v1926_v41 }
 0x97b   : > { %v1949_v46 = vsel %vm1200_vm6, %v1947_v43, %v1934_v40 }
 0x97c   : > { %v2744_v27 = vpop.eup %2743 }
 0x97d   : > { %v1830_v28 = vmul.f32 %v2744_v27, %v2740_v57 }
 0x97f   : > { %2284 = vst.msk [vmem:[%s3128_s19 + $0x30] sm:$0xff] %vm1200_vm6, %v1830_v28  ;;  %2509 = vmatprep.mubr.msk.f32.mxu0 %vm1200_vm6, %v1830_v28 }
 0x980   : > { %v2746_v29 = vpop.eup %2745 }
 0x981   : > { %v1832_v31 = vmul.f32 %v2746_v29, %v2742_v21 }
 0x983   : > { %2285 = vst.msk [vmem:[%s3128_s19 + $0x38] sm:$0xff] %vm1200_vm6, %v1832_v31  ;;  %2510 = vmatmul.mubr.msk.f32.vlgmr.msra.gmra.mrb[8].mxu0 %vm1200_vm6, %v1832_v31  ;;  %s2751_s19 = sshll.u32 %s2817_s29, 4  ;;  %s2752_s19 = int_to_ptr.vmem [resolvable:$false] %s2751_s19 }
 0x984   : > { %2622 = vmatpush3.bf16.msra.mxu0 %v2619_v34  ;;  %p2754_p0 = scmp.lt.s32.totalorder %s3259_s16, %s2752_s19 }
 0x985   : > { %2624 = vmatprep.subr.bf16.mxu0 %v2623_v36 }
 0x988   : > { %2626 = vmatpush3.bf16.msra.mxu0 %v2623_v36 }
 0xa56   : > { %v2511_v37 = vpop.f32.mrb[8].mxu0 }
 0xa57   : > { %1943 = vrot.lane.b32.xlu1 %v2511_v37, %s2816_s17  ;;  %v1914_v38 = vpop.f32.mrb[9].mxu0 }
 0xa58   : > { %1941 = vrot.lane.b32.xlu0 %v1914_v38, %s2816_s17  ;;  %s2753_s17 = scalar_lea.vmem %s2752_s19, 2048 }
 0xa59   : > { %p2755_p1 = scmp.lt.s32.totalorder %s2753_s17, %s2747_s27 }
 0xa5b   : > { %p2756_p2 = por %p2755_p1, %p2754_p0 }
 0xa5d   : > { %p2757_p3 = pnand %p2756_p2, %p2750_p13 }
 0xac9   : > { %v1944_v44 = vpop.permute.xlu1 %1943 }
 0xaca   : > { %v1942_v47 = vpop.permute.xlu0 %1941  ;;  %v1953_v8 = vsel %vm1951_vm8, %v1950_v4, %v1944_v44 }
 0xacb   : > { %v1952_v48 = vsel %vm1951_vm8, %v1949_v46, %v1942_v47 }
 0xacc   : > { %2520 = vmatprep.mubr.msk.f32.mxu0 %vm501_vm1, %v1952_v48 }
 0xacd   : > { %2521 = vmatmul.mubr.msk.f32.vlgmr.msra.gmra.mrb[10].mxu0 %vm501_vm1, %v1953_v8 }
 0xace   : > { %2760 = shalt.err (!%p2757_p3)
}
 0xacf   : > { %s2761_s22 = scalar_lea.hbm %s3257_s23, 1024  ;;  %s2765_s14 = scalar_lea.hbm %s3339_s13, 2048 }
 0xad0   : > { %p2762_p4 = scmp.ne.s32.totalorder %s3257_s23, %s2761_s22  ;;  %p2766_p9 = scmp.lt.u32.totalorder %s3257_s23, %s3339_s13 }
 0xad1   : > { %p2767_p10 = scmp.lt.u32.totalorder %s2765_s14, %s2761_s22  ;;  %p2769_p12 = scmp.lt.u32.totalorder %s2761_s22, %s3257_s23 }
 0xad2   : > { %p2763_p7 = pnand %p2762_p4, %p2927_p5 }
 0xad3   : > { %p2768_p11 = por %p2767_p10, %p2766_p9 }
 0xad4   : > { %p2764_p8 = pneg %p2763_p7 }
 0xad5   : > { %p2770_p13 = por %p2769_p12, %p2768_p11 }
 0xad7   : > { %p2771_p0 = pnand %p2770_p13, %p2764_p8 }
 0xad9   : > { %2774 = shalt.err (!%p2771_p0)
}
 0xada   : > { %s2818_s27 = smov 128   ;;  %v2288_v49 = vld [vmem:[%s3336_s10] ss:$0 sm:$0xff]  ;;  %s3353_s22 = sshll.u32 %s2963_s15, 4  ;;  %vm2071_vm9 = vcmask 254976  }
 0xadb   : > { %2639 = dma.vmem_to_hbm [thread:$0]  (%p2927_p5), %s3259_s16, 1024, %s3257_s23, %s3263_s24, %s2818_s27, %s2818_s27, %s2814_s30  }
 0xadc   : > { %s457_s29 = scalar_lea.vmem %s3337_s11, %s3353_s22  ;;  %s2222_s18 = sshll.u32 %s2963_s15, 1 }
 0xadd   : > { %s461_s23 = scalar_lea.vmem %s3338_s12, %s2222_s18 }
 0xba0   : > { %v2522_v50 = vpop.f32.mrb[10].mxu0 }
 0xba1   : > { %v2043_v51 = vadd.f32 %v2522_v50, %v2288_v49  ;;  %v2037_v52 = vpop.f32.mrb[11].mxu0 }
 0xba2   : > { %v2038_v53 = vadd.f32 %v2288_v49, %v2037_v52 }
 0xba3   : > { %v2047_v54 = vadd.f32 %v2043_v51, %v2991_v25 }
 0xba4   : > { %v2046_v55 = vadd.f32 %v2038_v53, %v2989_v24 }
 0xba5   : > { %2049 = vst.msk [vmem:[%s457_s29 + $0x8] sm:$0xff] %vm501_vm1, %v2047_v54  ;;  %v2051_v56 = vsel %vm501_vm1, %v2047_v54, 0.0  ;;  %v2060_v58 = vmul.f32 %v2047_v54, %v2047_v54 }
 0xba6   : > { %2048 = vst.msk [vmem:[%s457_s29] sm:$0xff] %vm501_vm1, %v2046_v55  ;;  %v2050_v59 = vsel %vm501_vm1, %v2046_v55, 0.0  ;;  %v2059_v60 = vmul.f32 %v2046_v55, %v2046_v55 }
 0xba7   : > { %v2062_v61 = vsel %vm501_vm1, %v2060_v58, 0.0  ;;  %v2052_v6 = vadd.f32 %v2051_v56, %v2050_v59 }
 0xba8   : > { %v2061_v62 = vsel %vm501_vm1, %v2059_v60, 0.0 }
 0xba9   : > { %v2053_v63 = vrot.slane %v2052_v6, 4  ;;  %v2063_v25 = vadd.f32 %v2062_v61, %v2061_v62 }
 0xbab   : > { %v2054_v0 = vadd.f32 %v2053_v63, %v2052_v6  ;;  %v2064_v24 = vrot.slane %v2063_v25, 4 }
 0xbad   : > { %v2055_v1 = vrot.slane %v2054_v0, 2  ;;  %v2065_v2 = vadd.f32 %v2064_v24, %v2063_v25 }
 0xbaf   : > { %v2056_v5 = vadd.f32 %v2055_v1, %v2054_v0  ;;  %v2066_v7 = vrot.slane %v2065_v2, 2 }
 0xbb1   : > { %v2057_v3 = vrot.slane %v2056_v5, 1  ;;  %v2067_v9 = vadd.f32 %v2066_v7, %v2065_v2 }
 0xbb3   : > { %v2068_v12 = vrot.slane %v2067_v9, 1  ;;  %v2058_v13 = vadd.f32 %v2057_v3, %v2056_v5 }
 0xbb5   : > { %v2069_v10 = vadd.f32 %v2068_v12, %v2067_v9 }
 0xbb7   : > { %v2070_v11 = vsel %vm484_vm2, %v2058_v13, %v2069_v10 }
 0xbb8   : > { %2072 = vst.msk [vmem:[%s461_s23] sm:$0x3] %vm2071_vm9, %v2070_v11 }
 0xbb9 PF: > { %p2645_p5 = scmp.ge.s32.totalorder %s2809_s28, 2  ;;  %s2132_s19 = sand.u32 1, %s2797_s25  }
 0xbba   : > { %s2133_s15 = scalar_lea.sflag [#allocation3], %s2132_s19 }
 0xbbb   : > { %p2642_p1 = pnand %p2645_p5, %p2931_p6 }
 0xbbd   : > { %2792 = dma.done.wait (!%p2642_p1), %s2133_s15, 1024  }
 0xbbe   : > { %2794 = vsyncadd (!%p2642_p1), %s2133_s15, 4294966272  ;;  %s3355_s28 = sld [smem:[#allocation6_spill]]  ;;  %s3356_s27 = sld [smem:[#allocation5_spill]] }
 0xbbf   : > { %s3357_s17 = sld [smem:[#allocation7_spill]]  ;;  %s3358_s25 = smov %s2801_s26 }
 0xbc4   : > { %p24_p2 = scmp.ge.s32.totalorder %s3355_s28, 4   ;;  %s3359_s26 = smov %s3356_s27 }
 0xbc5   : > { %s3360_s27 = smov %s3357_s17 }
 0xbc6   :  { %26 = sbr.rel (!%p24_p2) target bundleno = 3 (0x3), region = 130 }
 0xbcd   :  { %2138 = vsyncpa [#allocation3], 1 }
 0xbce   :  { %2140 = vsyncpa [#allocation3 + $0x1], 1 }

// kernel: tstransformer_forward.15
= control target key start
LH: loop header
LB: loop body
LE: loop exit
PB: predicated region body
PF: predicated region fallthrough
CT: control target
= control target key end

     0   :  { %s606_s0 = inlined_call_operand.vmem [shape: f32[2,16,1], index: 0, kind: input, shape index: {}]   ;;  %s607_s1 = inlined_call_operand.<no memory space> [shape: f32[1,1], index: 1, kind: input, shape index: {}]   ;;  %s608_s3 = inlined_call_operand.vmem [shape: f32[16,16], index: 3, kind: input, shape index: {}]   ;;  %s609_s4 = inlined_call_operand.vmem [shape: f32[1,16], index: 4, kind: input, shape index: {}]   ;;  %s610_s5 = inlined_call_operand.hbm [shape: f32[2,1,16], index: 5, kind: output, shape index: {}]   ;;  %s611_s2 = inlined_call_operand.<no memory space> [shape: f32[1,1], index: 2, kind: input, shape index: {}]  }
   0x1   :  { %v10_v0 = vstv %s607_s1  ;;  %v12_v1 = vstv %s611_s2 }
   0x2   :  { %11 = vst [vmem:[#allocation2] sm:$0x1] %v10_v0  ;;  %13 = vst [vmem:[#allocation3] sm:$0x1] %v12_v1 }
   0x3   :  { %14 = vsyncpa [#allocation5], 0 }
   0x4   :  { %16 = vsyncpa [#allocation5 + $0x1], 0  ;;  %s497_s22 = smov 0   ;;  %s499_s23 = smov 0  }
   0x5   :  { %s501_s24 = smov 0   ;;  %s503_s25 = smov 0  }
   0x6 LB: > { %s518_s1 = sadd.s32 4294967295, %s457_s25   ;;  %s342_s2 = sadd.s32 4294967294, %s457_s25   ;;  %s457_s25 = sphi %s503_s25, %s617_s25   ;;  %s453_s24 = sphi %s501_s24, %s616_s24   ;;  %s449_s23 = sphi %s499_s23, %s615_s23   ;;  %s445_s22 = sphi %s497_s22, %s614_s22  }
   0x7   : > { %s522_s26 = sadd.s32 1, %s457_s25   ;;  %s139_s27 = sadd.s32 1, %s453_s24 }
   0x8   : > { %s136_s28 = ssub.s32 %s457_s25, %s522_s26  ;;  %p149_p0 = scmp.ne.s32.totalorder %s453_s24, %s449_s23 }
   0x9   : > { %p137_p1 = scmp.eq.s32.totalorder %s136_s28, 0  ;;  %p150_p2 = scmp.eq.s32.totalorder %s518_s1, 1 }
   0xa   : > { %p155_p3 = scmp.ne.s32.totalorder %s449_s23, %s445_s22  ;;  %p156_p4 = scmp.eq.s32.totalorder %s342_s2, 1 }
   0xb   : > { %s533_s29 = scalar_select %p137_p1, %s453_s24, %s139_s27  }
   0xc   : > { %p535_p5 = por %p150_p2, %p149_p0  ;;  %p539_p6 = por %p156_p4, %p155_p3 }
   0xd   : > { %p345_p7 = scmp.ge.s32.totalorder %s457_s25, 1  ;;  %p194_p8 = scmp.lt.s32.totalorder %s457_s25, 3 }
   0xf   : > { %p195_p9 = pnand %p345_p7, %p194_p8 }
  0x10   : > { %p221_p10 = scmp.lt.s32.totalorder (!%p195_p9), %s518_s1, 1  ;;  %v459_v2 = vmov (!%p195_p9), 0   ;;  %v348_v3 = vld [vmem:[#allocation2] ss:$0 sm:$0xff] (!%p195_p9)  ;;  %v349_v6 = vld [vmem:[#allocation3] ss:$0 sm:$0xff] (!%p195_p9) }
  0x11   : > { %198 = sbr.rel (%p195_p9) target bundleno = 198 (0xc6), region = 40  ;;  %394 = vset.pattern.permute.xlu0 (!%p195_p9), %v459_v2  ;;  %v246_v11 = vld [vmem:[%s608_s3] sm:$0xff] (!%p195_p9)  ;;  %v247_v13 = vld [vmem:[%s608_s3 + $0x8] sm:$0xff] (!%p195_p9)  ;;  %vm260_vm0 = vcmask (!%p195_p9), 130048   ;;  %s219_s16 = sand.u32 (!%p195_p9), 1, %s449_s23   ;;  %vm272_vm1 = vcmask (!%p195_p9), 122880  }
  0x12   : > { %v270_v25 = vld [vmem:[%s609_s4] sm:$0x1] (!%p195_p9)  ;;  %s350_s19 = sshll.u32 (!%p195_p9), %s518_s1, 4  ;;  %s220_s20 = scalar_lea.vmem (!%p195_p9), [#allocation4], %s219_s16 }
  0x13   : > { %s287_s21 = sshll.u32 (!%p195_p9), %s220_s20, 4  ;;  %s564_s28 = scalar_lea.hbm (!%p195_p9), %s610_s5, %s350_s19  ;;  %s566_s21 = int_to_ptr.vmem [resolvable:$true] %s287_s21 }
  0x18   : > { %s222_s7 = scalar_select %p221_p10, %s518_s1, 1 }
  0x19   : > { %s460_s1 = smov [#allocation4]  }
  0x1a   : > { %s353_s8 = sshll.u32 %s222_s7, 4  ;;  %s275_s7 = scalar_lea.sflag [#allocation5], %s219_s16 }
  0x1b   : > { %s225_s11 = scalar_lea.vmem %s606_s0, %s353_s8  ;;  %s395_s8 = scalar_lea.vmem %s566_s21, 16 }
  0x1c   : > { %v226_v4 = vld [vmem:[%s225_s11] sm:$0xff]  ;;  %v227_v5 = vld [vmem:[%s225_s11 + $0x8] sm:$0xff]  ;;  %p396_p11 = scmp.ne.s32.totalorder %s566_s21, %s395_s8  ;;  %s399_s9 = sshll.u32 %s460_s1, 4  ;;  %s400_s9 = int_to_ptr.vmem [resolvable:$false] %s399_s9 }
  0x1d   : > { %v235_v7 = vmul.f32 %v348_v3, %v226_v4  ;;  %v236_v8 = vmul.f32 %v348_v3, %v227_v5  ;;  %s401_s10 = scalar_lea.vmem %s400_s9, 32  ;;  %p402_p0 = scmp.lt.s32.totalorder %s566_s21, %s400_s9 }
  0x1e   : > { %p397_p12 = pnand %p396_p11, %p535_p5  ;;  %p403_p1 = scmp.lt.s32.totalorder %s401_s10, %s395_s8 }
  0x1f   : > { %v244_v9 = vadd.f32 %v349_v6, %v235_v7  ;;  %v245_v10 = vadd.f32 %v349_v6, %v236_v8 }
  0x20   : > { %p398_p13 = pneg %p397_p12  ;;  %p404_p2 = por %p403_p1, %p402_p0 }
  0x21   : > { %250 = vperm.xlu0 %394, %v244_v9  }
  0x22   : > { %p405_p3 = pnand %p404_p2, %p398_p13 }
  0x25   : > { %255 = vperm.xlu0 %394, %v245_v10  }
  0xa0   : > { %v251_v12 = vpop.permute.xlu0 %250 }
  0xa1   : > { %v258_v14 = vmul.f32 %v251_v12, %v246_v11 }
  0xa3   : > { %v261_v17 = vsel %vm260_vm0, %v258_v14, 0.0 }
  0xa4   : > { %v256_v15 = vpop.permute.xlu0 %255 }
  0xa5   : > { %v259_v16 = vmul.f32 %v256_v15, %v247_v13 }
  0xa7   : > { %v262_v18 = vsel %vm260_vm0, %v259_v16, 0.0 }
  0xa8   : > { %v263_v19 = vadd.f32 %v262_v18, %v261_v17 }
  0xaa   : > { %v264_v20 = vrot.slane %v263_v19, 4 }
  0xac   : > { %v265_v21 = vadd.f32 %v264_v20, %v263_v19 }
  0xae   : > { %v266_v22 = vrot.slane %v265_v21, 2 }
  0xb0   : > { %v267_v23 = vadd.f32 %v266_v22, %v265_v21 }
  0xb2   : > { %v268_v24 = vrot.slane %v267_v23, 1 }
  0xb4   : > { %v269_v26 = vadd.f32 %v268_v24, %v267_v23 }
  0xb6   : > { %v271_v27 = vadd.f32 %v270_v25, %v269_v26 }
  0xb8   : > { %273 = vst.msk [vmem:[%s220_s20] sm:$0x1] %vm272_vm1, %v271_v27 }
  0xb9   : > { %408 = shalt.err (!%p405_p3)
}
  0xba   : > { %s409_s11 = scalar_lea.hbm %s564_s28, 16  ;;  %s413_s14 = scalar_lea.hbm %s610_s5, 32 }
  0xbb   : > { %p410_p4 = scmp.ne.s32.totalorder %s564_s28, %s409_s11  ;;  %p414_p9 = scmp.lt.u32.totalorder %s564_s28, %s610_s5 }
  0xbc   : > { %p415_p10 = scmp.lt.u32.totalorder %s413_s14, %s409_s11  ;;  %p417_p12 = scmp.lt.u32.totalorder %s409_s11, %s564_s28 }
  0xbd   : > { %p411_p7 = pnand %p410_p4, %p535_p5 }
  0xbe   : > { %p416_p11 = por %p415_p10, %p414_p9 }
  0xbf   : > { %p412_p8 = pneg %p411_p7 }
  0xc0   : > { %p418_p13 = por %p417_p12, %p416_p11 }
  0xc2   : > { %p419_p0 = pnand %p418_p13, %p412_p8 }
  0xc4   : > { %422 = shalt.err (!%p419_p0)
}
  0xc5   : > { %354 = dma.vmem_to_hbm [thread:$0]  (%p535_p5), %s566_s21, 16, %s564_s28, %s275_s7  }
  0xc6 PF: > { %p360_p1 = scmp.ge.s32.totalorder %s457_s25, 2  ;;  %s299_s17 = sand.u32 1, %s445_s22  }
  0xc7   : > { %s300_s18 = scalar_lea.sflag [#allocation5], %s299_s17 }
  0xc8   : > { %p357_p2 = pnand %p360_p1, %p539_p6 }
  0xca   : > { %440 = dma.done.wait (!%p357_p2), %s300_s18, 16  }
  0xcb   : > { %442 = vsyncadd (!%p357_p2), %s300_s18, 4294967280  ;;  %p19_p3 = scmp.ge.s32.totalorder %s522_s26, 4   ;;  %s614_s22 = smov %s449_s23 }
  0xcc   : > { %s615_s23 = smov %s453_s24  ;;  %s616_s24 = smov %s533_s29 }
  0xcd   : > { %s617_s25 = smov %s522_s26  ;;  %21 = sbr.rel (!%p19_p3) target bundleno = 6 (0x6), region = 75 }
  0xd4   :  { %304 = vsyncpa [#allocation5], 1 }
  0xd5   :  { %306 = vsyncpa [#allocation5 + $0x1], 1 }

// kernel: tstransformer_forward.14
= control target key start
LH: loop header
LB: loop body
LE: loop exit
PB: predicated region body
PF: predicated region fallthrough
CT: control target
= control target key end

     0   :  { %s802_s23 = smov 0   ;;  %s863_s0 = inlined_call_operand.vmem [shape: f32[2,16,16], index: 0, kind: input, shape index: {}]   ;;  %s864_s1 = inlined_call_operand.vmem [shape: f32[1,16], index: 1, kind: input, shape index: {}]   ;;  %s865_s2 = inlined_call_operand.vmem [shape: f32[1,16], index: 2, kind: input, shape index: {}]   ;;  %s866_s3 = inlined_call_operand.vmem [shape: f32[3,16,1], index: 3, kind: input, shape index: {}]   ;;  %s867_s4 = inlined_call_operand.<no memory space> [shape: f32[1,1], index: 4, kind: input, shape index: {}]   ;;  %s868_s5 = inlined_call_operand.vmem [shape: f32[2,16,1], index: 5, kind: output, shape index: {0}]   ;;  %s869_s6 = inlined_call_operand.vmem [shape: f32[2,2,1], index: 6, kind: output, shape index: {1}]  }
   0x1   :  { %v12_v0 = vstv %s867_s4 }
   0x2   :  { %13 = vst [vmem:[#allocation2] sm:$0x1] %v12_v0 }
   0x3 LB: > { %s672_s24 = sadd.s32 4294967295, %s762_s23   ;;  %p676_p0 = scmp.ge.s32.totalorder %s762_s23, 1  ;;  %s762_s23 = sphi %s802_s23, %s19_s23  }
   0x4   : > { %p217_p1 = scmp.lt.s32.totalorder %s762_s23, 3 }
   0x6   : > { %p218_p2 = pnand %p676_p0, %p217_p1 }
   0x7   : > { %v299_v1 = vld [vmem:[%s866_s3] sm:$0xff] (!%p218_p2)  ;;  %v300_v2 = vld [vmem:[%s866_s3 + $0x8] sm:$0xff] (!%p218_p2)  ;;  %p251_p3 = scmp.lt.s32.totalorder (!%p218_p2), %s672_s24, 1  ;;  %v684_v7 = vld [vmem:[%s866_s3 + $0x10] sm:$0xff] (!%p218_p2)  ;;  %vm287_vm0 = vcmask (!%p218_p2), 1040384   ;;  %vm304_vm1 = vcmask (!%p218_p2), 130048  }
   0x8   : > { %221 = sbr.rel (%p218_p2) target bundleno = 273 (0x111), region = 40  ;;  %v736_v3 = vpack.c.bf16 (!%p218_p2), %v300_v2, %v299_v1  ;;  %v690_v4 = vld [vmem:[%s866_s3 + $0x20] sm:$0xff] (!%p218_p2)  ;;  %v691_v5 = vld [vmem:[%s866_s3 + $0x28] sm:$0xff] (!%p218_p2)  ;;  %v685_v8 = vld [vmem:[%s866_s3 + $0x18] sm:$0xff] (!%p218_p2)  ;;  %vm293_vm2 = vcmask (!%p218_p2), 1046528   ;;  %vm560_vm3 = vcmask (!%p218_p2), 7168  }
   0x9   : > { %v740_v6 = vpack.c.bf16 (!%p218_p2), %v691_v5, %v690_v4  ;;  %v732_v9 = vpack.c.bf16 (!%p218_p2), %v685_v8, %v684_v7  ;;  %v682_v10 = vld [vmem:[%s864_s1] ss:$0 sm:$0xff] (!%p218_p2)  ;;  %vm584_vm4 = vcmask (!%p218_p2), 1024  }
   0xa   : > { %737 = vmatprep.subr.bf16.mxu0 (!%p218_p2), %v736_v3  ;;  %v683_v13 = vld [vmem:[%s865_s2] ss:$0 sm:$0xff] (!%p218_p2) }
   0xb   : > { %739 = vmatpush3.bf16.msra.mxu0 (!%p218_p2), %v736_v3  ;;  %733 = vmatprep.subr.bf16.mxu1 (!%p218_p2), %v732_v9  ;;  %v694_v29 = vld [vmem:[#allocation2] ss:$0 sm:$0xff] (!%p218_p2) }
   0xc   : > { %741 = vmatprep.subr.bf16.mxu0 (!%p218_p2), %v740_v6  ;;  %735 = vmatpush3.bf16.msra.mxu1 (!%p218_p2), %v732_v9 }
   0xf   : > { %s871_s24 = smov (!%p251_p3, %s672_s24), 1 }
  0x10   : > { %s697_s12 = sshll.u32 %s871_s24, 4  ;;  %s681_s25 = sshll.u32 %s871_s24, 1 }
  0x11   : > { %s255_s17 = scalar_lea.vmem %s863_s0, %s697_s12  ;;  %s260_s22 = scalar_lea.vmem %s868_s5, %s697_s12 }
  0x12   : > { %v265_v11 = vld [vmem:[%s255_s17] sm:$0xff]  ;;  %v266_v12 = vld [vmem:[%s255_s17 + $0x8] sm:$0xff]  ;;  %s264_s27 = scalar_lea.vmem %s869_s6, %s681_s25 }
  0x13   : > { %v274_v14 = vmul.f32 %v682_v10, %v265_v11  ;;  %v275_v15 = vmul.f32 %v682_v10, %v266_v12 }
  0x15   : > { %v283_v16 = vadd.f32 %v683_v13, %v274_v14  ;;  %v284_v17 = vadd.f32 %v683_v13, %v275_v15 }
  0x17   : > { %v288_v18 = vrot.slane %v283_v16, 7  ;;  %v289_v19 = vrot.slane %v284_v17, 7  ;;  %715 = vmatprep.mubr.msk.f32.mxu1 %vm304_vm1, %v283_v16  ;;  %v294_v20 = vrot.slane %v283_v16, 1  ;;  %v295_v21 = vrot.slane %v284_v17, 1 }
  0x18   : > { %716 = vmatmul.mubr.msk.f32.vlgmr.msra.gmra.mrb[0].mxu1 %vm304_vm1, %v284_v17 }
  0x19   : > { %v292_v22 = vsel %vm287_vm0, %v283_v16, %v288_v18  ;;  %v290_v23 = vsel %vm287_vm0, %v288_v18, %v289_v19  ;;  %v296_v24 = vsel %vm293_vm2, %v294_v20, %v295_v21  ;;  %v298_v25 = vsel %vm293_vm2, %v295_v21, %v284_v17 }
  0x1a   : > { %722 = vmatprep.mubr.msk.f32.mxu0 %vm304_vm1, %v292_v22 }
  0x1b   : > { %723 = vmatmul.mubr.msk.f32.vlgmr.msra.gmra.mrb[0].mxu0 %vm304_vm1, %v290_v23 }
  0x1c   : > { %743 = vmatpush3.bf16.msra.mxu0 %v740_v6  ;;  %729 = vmatprep.mubr.msk.f32.mxu0 %vm304_vm1, %v296_v24 }
  0x23   : > { %730 = vmatmul.mubr.msk.f32.vlgmr.msra.gmra.mrb[0].mxu0 %vm304_vm1, %v298_v25 }
  0xeb   : > { %v717_v26 = vpop.f32.mrb[0].mxu1 }
  0xec   : > { %v375_v27 = vpop.f32.mrb[1].mxu1 }
  0xf6   : > { %v731_v28 = vpop.f32.mrb[0].mxu0 }
  0xf7   : > { %v744_v30 = vadd.f32 %v731_v28, %v717_v26  ;;  %v538_v31 = vpop.f32.mrb[1].mxu0 }
  0xf8   : > { %v745_v32 = vadd.f32 %v538_v31, %v375_v27 }
  0xf9   : > { %v557_v33 = vadd.f32 %v744_v30, %v694_v29 }
  0xfa   : > { %v556_v34 = vadd.f32 %v745_v32, %v694_v29 }
  0xfb   : > { %v559_v35 = vmax.f32 %v557_v33, 0.0 }
  0xfc   : > { %v558_v36 = vmax.f32 %v556_v34, 0.0 }
  0xfd   : > { %562 = vst.msk [vmem:[%s260_s22 + $0x8] sm:$0xff] %vm560_vm3, %v559_v35  ;;  %v564_v37 = vsel %vm560_vm3, %v559_v35, 0.0  ;;  %v573_v38 = vmul.f32 %v559_v35, %v559_v35 }
  0xfe   : > { %561 = vst.msk [vmem:[%s260_s22] sm:$0xff] %vm560_vm3, %v558_v36  ;;  %v563_v39 = vsel %vm560_vm3, %v558_v36, 0.0  ;;  %v572_v40 = vmul.f32 %v558_v36, %v558_v36 }
  0xff   : > { %v575_v41 = vsel %vm560_vm3, %v573_v38, 0.0  ;;  %v565_v42 = vadd.f32 %v564_v37, %v563_v39 }
 0x100   : > { %v574_v43 = vsel %vm560_vm3, %v572_v40, 0.0 }
 0x101   : > { %v566_v44 = vrot.slane %v565_v42, 4  ;;  %v576_v45 = vadd.f32 %v575_v41, %v574_v43 }
 0x103   : > { %v567_v46 = vadd.f32 %v566_v44, %v565_v42  ;;  %v577_v47 = vrot.slane %v576_v45, 4 }
 0x105   : > { %v568_v48 = vrot.slane %v567_v46, 2  ;;  %v578_v49 = vadd.f32 %v577_v47, %v576_v45 }
 0x107   : > { %v569_v50 = vadd.f32 %v568_v48, %v567_v46  ;;  %v579_v51 = vrot.slane %v578_v49, 2 }
 0x109   : > { %v570_v52 = vrot.slane %v569_v50, 1  ;;  %v580_v53 = vadd.f32 %v579_v51, %v578_v49 }
 0x10b   : > { %v581_v54 = vrot.slane %v580_v53, 1  ;;  %v571_v55 = vadd.f32 %v570_v52, %v569_v50 }
 0x10d   : > { %v582_v56 = vadd.f32 %v581_v54, %v580_v53 }
 0x10f   : > { %v583_v57 = vsel %vm287_vm0, %v571_v55, %v582_v56 }
 0x110   : > { %585 = vst.msk [vmem:[%s264_s27] sm:$0x3] %vm584_vm4, %v583_v57 }
 0x111 PF: > { %s19_s23 = sadd.s32 1, %s762_s23  }
 0x112   : > { %p16_p4 = scmp.ge.s32.totalorder %s19_s23, 4  }
 0x114   :  { %18 = sbr.rel (!%p16_p4) target bundleno = 3 (0x3), region = 84 }

</bundles_post_ra>
